<compile_context>
chip_gen: v7x
topology: tpu7x:2x2x1
jax: 0.10.0
libtpu: 0.0.40
codegen_flags: <defaults>
</compile_context>

<pallas_src>
import math
from functools import partial

import jax
import jax.numpy as jnp
from jax.experimental import pallas as pl
from jax.experimental.pallas import tpu as pltpu

ALPHA1 = 3.0
ALPHA2 = 3.0
ALPHA3 = 3.0

_N_AGCN = 9  # wp_flat, bias_n, wdg, w1, b1, w2, b2, w3, b3


# ---------------------------------------------------------------------------
# In-kernel AGCN compute (cheb_k == 2, use_day == use_week == True)
# All E-only terms (A_hat, AG, bias_n, E_exp, Et) are precomputed outside.
# ---------------------------------------------------------------------------
def _agcn_block(xin, Et, A_hat, AG, E_exp, prm, a_s, b_s):
    wp_flat, bias_n, wdg, w1, b1, w2, b2, w3, b3 = prm
    Bt, N, din = xin.shape
    D = Et.shape[-1]
    dout = wdg.shape[-1]

    # Static-graph propagation (graphs shared across the batch).
    A_hat_b = jnp.broadcast_to(A_hat[None], (Bt, N, N))
    AG_b = jnp.broadcast_to(AG[None], (Bt, N, N))
    ho = jnp.einsum('bnm,bmc->bnc', A_hat_b, xin, preferred_element_type=jnp.float32)
    x_ag2 = jnp.einsum('bnm,bmc->bnc', AG_b, xin, preferred_element_type=jnp.float32)

    # sgcn MLP -> dynamic filter DF.
    h2 = ho.reshape(Bt * N, din)
    h2 = jax.nn.sigmoid(jnp.dot(h2, w1, preferred_element_type=jnp.float32) + b1)
    h2 = jax.nn.sigmoid(jnp.dot(h2, w2, preferred_element_type=jnp.float32) + b2)
    DF = (jnp.dot(h2, w3, preferred_element_type=jnp.float32) + b3).reshape(Bt, N, D)

    DE = jnp.tanh(ALPHA3 * Et * DF)
    DA = jnp.maximum(
        jnp.tanh(ALPHA3 * jnp.einsum('bne,bme->bnm', DE, DE,
                                     preferred_element_type=jnp.float32)), 0.0)

    # Static-graph conv with node-adaptive weights, one merged MXU contraction:
    #   x_agconv[b,n,o] = sum_{d,ki} E[n,d] * x_ag_cat[b,n,ki] * wp[d,ki,o]
    x_ag_cat = jnp.concatenate([xin, x_ag2], axis=-1)            # (Bt,N,2*din)
    x_tiled = jnp.concatenate([x_ag_cat] * D, axis=-1)           # (Bt,N,D*2*din)
    scaled = (x_tiled * E_exp[None]).reshape(Bt * N, D * 2 * din)
    x_agconv = jnp.dot(scaled, wp_flat,
                       preferred_element_type=jnp.float32).reshape(Bt, N, dout)
    x_agconv = x_agconv + bias_n[None]

    # Dynamic-graph conv.
    x_dg2 = jnp.einsum('bnm,bmi->bni', DA, xin, preferred_element_type=jnp.float32)
    x_dgconv = jnp.dot(x_dg2.reshape(Bt * N, din), wdg,
                       preferred_element_type=jnp.float32).reshape(Bt, N, dout)

    return a_s * x_agconv + b_s * x_dgconv


# ---------------------------------------------------------------------------
# Pallas kernel: one encoder layer over the full sequence, grid = (B_tiles, T)
# ---------------------------------------------------------------------------
def _encoder_layer_kernel(*refs):
    x_ref, et_ref, s0_ref, ahat_ref, ag_ref, eexp_ref, scal_ref = refs[:7]
    gate_refs = refs[7:7 + _N_AGCN]
    upd_refs = refs[7 + _N_AGCN:7 + 2 * _N_AGCN]
    out_ref = refs[7 + 2 * _N_AGCN]
    state_ref = refs[7 + 2 * _N_AGCN + 1]

    t = pl.program_id(1)

    @pl.when(t == 0)
    def _():
        state_ref[...] = s0_ref[...]

    x = x_ref[0]              # (Bt, N, din)
    Et = et_ref[0]            # (Bt, N, D)
    state = state_ref[...]    # (Bt, N, hidden)
    A_hat = ahat_ref[...]
    AG = ag_ref[...]
    E_exp = eexp_ref[...]

    gate_prm = tuple(r[...] for r in gate_refs)
    upd_prm = tuple(r[...] for r in upd_refs)
    a_g, b_g = scal_ref[0, 0], scal_ref[0, 1]
    a_u, b_u = scal_ref[1, 0], scal_ref[1, 1]

    hid = state.shape[-1]
    inp = jnp.concatenate([x, state], axis=-1)
    z_r = jax.nn.sigmoid(_agcn_block(inp, Et, A_hat, AG, E_exp, gate_prm, a_g, b_g))
    z = z_r[..., :hid]
    r = z_r[..., hid:]
    cand = jnp.concatenate([x, z * state], axis=-1)
    hc = jnp.tanh(_agcn_block(cand, Et, A_hat, AG, E_exp, upd_prm, a_u, b_u))
    h = r * state + (1.0 - r) * hc

    state_ref[...] = h
    out_ref[0] = h


def _encoder_layer(x_seq, et_seq, state0, E, A_hat, AG, gate_p, upd_p, batch_tile):
    """x_seq/et_seq are time-major (T, B, N, C); returns (T, B, N, hidden)."""
    T, B, N, din = x_seq.shape
    D = E.shape[1]
    hidden = state0.shape[-1]
    din_tot = din + hidden
    K = D * 2 * din_tot
    assert B % batch_tile == 0

    def prep(prm):
        wp, bp, wdg, a, b, w1, b1_, w2, b2_, w3, b3_ = prm
        dout = wdg.shape[1]
        wp_flat = wp.reshape(K, dout)          # row index = d * (2*din_tot) + ki
        bias_n = jnp.dot(E, bp)                # (N, dout)  -- hoisted E @ bias_pool
        return (wp_flat, bias_n, wdg, w1, b1_, w2, b2_, w3, b3_), a[0, 0], b[0, 0]

    gate_pack, a_g, b_g = prep(gate_p)
    upd_pack, a_u, b_u = prep(upd_p)
    scal = jnp.stack([jnp.stack([a_g, b_g]),
                      jnp.stack([a_u, b_u])]).astype(jnp.float32)   # (2, 2)

    # E_exp[n, d*2*din_tot + ki] = E[n, d]  (matches wp_flat row ordering)
    E_exp = jnp.repeat(E, 2 * din_tot, axis=1)                      # (N, K)

    grid = (B // batch_tile, T)

    def stream_spec(c):
        return pl.BlockSpec((1, batch_tile, N, c), lambda b, t: (t, b, 0, 0))

    def const_spec(arr):
        nd = arr.ndim
        return pl.BlockSpec(arr.shape, lambda b, t, _nd=nd: (0,) * _nd)

    in_specs = ([
        stream_spec(din),                                            # x_seq
        stream_spec(D),                                              # Et_seq
        pl.BlockSpec((batch_tile, N, hidden), lambda b, t: (b, 0, 0)),  # state0
        const_spec(A_hat),
        const_spec(AG),
        const_spec(E_exp),
        pl.BlockSpec((2, 2), lambda b, t: (0, 0),
                     memory_space=pltpu.MemorySpace.SMEM),           # a/b scalars
    ] + [const_spec(w) for w in gate_pack]
      + [const_spec(w) for w in upd_pack])

    out_spec = pl.BlockSpec((1, batch_tile, N, hidden), lambda b, t: (t, b, 0, 0))

    return pl.pallas_call(
        _encoder_layer_kernel,
        out_shape=jax.ShapeDtypeStruct((T, B, N, hidden), jnp.float32),
        grid_spec=pltpu.PrefetchScalarGridSpec(
            num_scalar_prefetch=0,
            grid=grid,
            in_specs=in_specs,
            out_specs=out_spec,
            scratch_shapes=[pltpu.VMEM((batch_tile, N, hidden), jnp.float32)],
        ),
        compiler_params=pltpu.CompilerParams(
            dimension_semantics=("parallel", "arbitrary")),
    )(x_seq, et_seq, state0, A_hat, AG, E_exp, scal, *gate_pack, *upd_pack)


# ---------------------------------------------------------------------------
# ADCRNN_Encoder forward (layer loop in JAX glue; time loop inside the kernel)
# ---------------------------------------------------------------------------
@partial(jax.jit, static_argnames=("batch_tile",))
def adcrnn_encoder_forward(x, init_states, E, TD, TW, layer_params, batch_tile=1):
    # E-only graph terms hoisted out of the recurrence, computed once.
    EEt = jnp.dot(E, E.T)
    AS = jax.nn.relu(jnp.tanh(ALPHA1 * EEt))
    d = jnp.sum(AS, axis=-1) ** -0.5
    AG = d[:, None] * AS * d[None, :]
    A_hat = jax.nn.relu(jnp.tanh(ALPHA2 * EEt))
    Et = E[None, None] * TD * TW                      # (B, T, N, D), layer-independent

    x_tm = jnp.transpose(x, (1, 0, 2, 3))             # time-major (T, B, N, C)
    et_tm = jnp.transpose(Et, (1, 0, 2, 3))

    current = x_tm
    hiddens = []
    for (gate_p, upd_p), s0 in zip(layer_params, init_states):
        current = _encoder_layer(current, et_tm, s0, E, A_hat, AG,
                                 gate_p, upd_p, batch_tile)
        hiddens.append(current[-1])                   # last timestep state (B, N, h)
    return jnp.transpose(current, (1, 0, 2, 3)), hiddens


# ---------------------------------------------------------------------------
# Pure-JAX reference (mirrors the PyTorch math literally), for verification
# ---------------------------------------------------------------------------
def _agcn_ref(xin, E, TD, TW, prm):
    wp, bp, wdg, a_p, b_p, w1, b1, w2, b2, w3, b3 = prm
    B, N, din = xin.shape
    Demb = E.shape[1]
    wp4 = wp.reshape(Demb, 2, din, wdg.shape[1])
    AS = jax.nn.relu(jnp.tanh(ALPHA1 * (E @ E.T)))
    d = jnp.sum(AS, -1) ** -0.5
    AG = d[:, None] * AS * d[None, :]
    A_hat = jax.nn.relu(jnp.tanh(ALPHA2 * (E @ E.T)))
    Et = E[None] * TD * TW
    ho = jnp.einsum('bvc,vw->bwc', xin, A_hat)
    h2 = jax.nn.sigmoid(ho @ w1 + b1)
    h2 = jax.nn.sigmoid(h2 @ w2 + b2)
    DF = h2 @ w3 + b3
    DE = jnp.tanh(ALPHA3 * Et * DF)
    DA = jax.nn.relu(jnp.tanh(ALPHA3 * jnp.einsum('bne,bme->bnm', DE, DE)))
    x_ag = jnp.stack([xin, jnp.einsum('nm,bmi->bni', AG, xin)], axis=1).transpose(0, 2, 1, 3)
    weights = jnp.einsum('nd,dkio->nkio', E, wp4)
    bias = E @ bp
    x_agconv = jnp.einsum('bnki,nkio->bno', x_ag, weights) + bias
    x_dg2 = jnp.einsum('bnm,bmi->bni', DA, xin)
    x_dgconv = jnp.einsum('bni,io->bno', x_dg2, wdg)
    return a_p * x_agconv + b_p * x_dgconv


def _cell_ref(x, state, E, TD, TW, gate_p, upd_p):
    hid = state.shape[-1]
    z_r = jax.nn.sigmoid(_agcn_ref(jnp.concatenate([x, state], -1), E, TD, TW, gate_p))
    z, r = z_r[..., :hid], z_r[..., hid:]
    hc = jnp.tanh(_agcn_ref(jnp.concatenate([x, z * state], -1), E, TD, TW, upd_p))
    return r * state + (1 - r) * hc


def encoder_ref(x, init_states, E, TD, TW, layer_params):
    T = x.shape[1]
    current = x
    hiddens = []
    for (gp, up), s0 in zip(layer_params, init_states):
        s = s0
        inner = []
        for t in range(T):
            s = _cell_ref(current[:, t], s, E, TD[:, t], TW[:, t], gp, up)
            inner.append(s)
        hiddens.append(s)
        current = jnp.stack(inner, 1)
    return current, hiddens


# ---------------------------------------------------------------------------
# Deterministic parameter init
# ---------------------------------------------------------------------------
def _xavier(key, shape):
    std = math.sqrt(2.0 / (shape[-2] + shape[-1]))
    return (std * jax.random.normal(key, shape)).astype(jnp.float32)


def _linear(key, fan_in, shape):
    bound = 1.0 / math.sqrt(fan_in)
    return jax.random.uniform(key, shape, jnp.float32, -bound, bound)


def init_agcn_params(key, din, dout, embed_dim, cheb_k=2):
    ks = jax.random.split(key, 11)
    wp = _xavier(ks[0], (embed_dim, cheb_k, din, dout)).reshape(embed_dim, cheb_k * din, dout)
    bp = _xavier(ks[1], (embed_dim, dout))
    wdg = _xavier(ks[2], (din, dout))
    a = jax.random.uniform(ks[3], (1, 1), jnp.float32)
    b = jax.random.uniform(ks[4], (1, 1), jnp.float32)
    w1 = _linear(ks[5], din, (din, din))
    b1 = _linear(ks[6], din, (1, din))
    w2 = _linear(ks[7], din, (din, embed_dim))
    b2 = _linear(ks[8], din, (1, embed_dim))
    w3 = _linear(ks[9], embed_dim, (embed_dim, embed_dim))
    b3 = _linear(ks[10], embed_dim, (1, embed_dim))
    return (wp, bp, wdg, a, b, w1, b1, w2, b2, w3, b3)


if __name__ == "__main__":
    B, T, N = 2, 4, 16
    dim_in, hidden, embed_dim, cheb_k, num_layers = 2, 32, 8, 2, 2

    key = jax.random.PRNGKey(0)
    k_x, k_e, k_td, k_tw, k_p = jax.random.split(key, 5)
    x = jax.random.normal(k_x, (B, T, N, dim_in), jnp.float32)
    E = jax.random.normal(k_e, (N, embed_dim), jnp.float32)
    TD = jax.random.normal(k_td, (B, T, N, embed_dim), jnp.float32)
    TW = jax.random.normal(k_tw, (B, T, N, embed_dim), jnp.float32)

    init_states = [jnp.zeros((B, N, hidden), jnp.float32) for _ in range(num_layers)]

    layer_params = []
    pkeys = jax.random.split(k_p, num_layers * 2)
    for layer in range(num_layers):
        d_in = dim_in if layer == 0 else hidden
        gate_p = init_agcn_params(pkeys[2 * layer], d_in + hidden, 2 * hidden, embed_dim, cheb_k)
        upd_p = init_agcn_params(pkeys[2 * layer + 1], d_in + hidden, hidden, embed_dim, cheb_k)
        layer_params.append((gate_p, upd_p))

    out, hiddens = adcrnn_encoder_forward(x, init_states, E, TD, TW, layer_params,
                                          batch_tile=1)
    out = jax.block_until_ready(out)

    ref_out, ref_hiddens = encoder_ref(x, init_states, E, TD, TW, layer_params)
    assert out.shape == (B, T, N, hidden)
    assert len(hiddens) == num_layers and hiddens[-1].shape == (B, N, hidden)
    assert float(jnp.max(jnp.abs(out - ref_out))) < 2e-3
    assert float(jnp.max(jnp.abs(hiddens[-1] - ref_hiddens[-1]))) < 2e-3
    print("KERNEL_OK")
</pallas_src>

<mosaic_0001>
module attributes {stable_mosaic.version = 11 : i64} {
  func.func @_encoder_layer_kernel(%arg0: i32, %arg1: i32, %arg2: memref<1x1x16x2xf32, #tpu.memory_space<vmem>>, %arg3: memref<1x1x16x8xf32, #tpu.memory_space<vmem>>, %arg4: memref<1x16x32xf32, #tpu.memory_space<vmem>>, %arg5: memref<16x16xf32, #tpu.memory_space<vmem>>, %arg6: memref<16x16xf32, #tpu.memory_space<vmem>>, %arg7: memref<16x544xf32, #tpu.memory_space<vmem>>, %arg8: memref<2x2xf32, #tpu.memory_space<smem>>, %arg9: memref<544x64xf32, #tpu.memory_space<vmem>>, %arg10: memref<16x64xf32, #tpu.memory_space<vmem>>, %arg11: memref<34x64xf32, #tpu.memory_space<vmem>>, %arg12: memref<34x34xf32, #tpu.memory_space<vmem>>, %arg13: memref<1x34xf32, #tpu.memory_space<vmem>>, %arg14: memref<34x8xf32, #tpu.memory_space<vmem>>, %arg15: memref<1x8xf32, #tpu.memory_space<vmem>>, %arg16: memref<8x8xf32, #tpu.memory_space<vmem>>, %arg17: memref<1x8xf32, #tpu.memory_space<vmem>>, %arg18: memref<544x32xf32, #tpu.memory_space<vmem>>, %arg19: memref<16x32xf32, #tpu.memory_space<vmem>>, %arg20: memref<34x32xf32, #tpu.memory_space<vmem>>, %arg21: memref<34x34xf32, #tpu.memory_space<vmem>>, %arg22: memref<1x34xf32, #tpu.memory_space<vmem>>, %arg23: memref<34x8xf32, #tpu.memory_space<vmem>>, %arg24: memref<1x8xf32, #tpu.memory_space<vmem>>, %arg25: memref<8x8xf32, #tpu.memory_space<vmem>>, %arg26: memref<1x8xf32, #tpu.memory_space<vmem>>, %arg27: memref<1x1x16x32xf32, #tpu.memory_space<vmem>>, %arg28: memref<1x16x32xf32, #tpu.memory_space<vmem>>) attributes {dimension_semantics = [#tpu.dimension_semantics<parallel>, #tpu.dimension_semantics<arbitrary>], iteration_bounds = array<i64: 2, 4>, scalar_prefetch = 0 : i64, scratch_operands = 1 : i64, tpu.core_type = #tpu.core_type<tc>, window_params = [{transform_indices = @transform_0, window_bounds = array<i64: 1, 1, 16, 2>}, {transform_indices = @transform_1, window_bounds = array<i64: 1, 1, 16, 8>}, {transform_indices = @transform_2, window_bounds = array<i64: 1, 16, 32>}, {pipeline_mode = #tpu.pipeline_mode<synchronous>, transform_indices = @transform_3, window_bounds = array<i64: 16, 16>}, {pipeline_mode = #tpu.pipeline_mode<synchronous>, transform_indices = @transform_4, window_bounds = array<i64: 16, 16>}, {pipeline_mode = #tpu.pipeline_mode<synchronous>, transform_indices = @transform_5, window_bounds = array<i64: 16, 544>}, {transform_indices = @transform_6, window_bounds = array<i64: 2, 2>}, {pipeline_mode = #tpu.pipeline_mode<synchronous>, transform_indices = @transform_7, window_bounds = array<i64: 544, 64>}, {pipeline_mode = #tpu.pipeline_mode<synchronous>, transform_indices = @transform_8, window_bounds = array<i64: 16, 64>}, {pipeline_mode = #tpu.pipeline_mode<synchronous>, transform_indices = @transform_9, window_bounds = array<i64: 34, 64>}, {pipeline_mode = #tpu.pipeline_mode<synchronous>, transform_indices = @transform_10, window_bounds = array<i64: 34, 34>}, {pipeline_mode = #tpu.pipeline_mode<synchronous>, transform_indices = @transform_11, window_bounds = array<i64: 1, 34>}, {pipeline_mode = #tpu.pipeline_mode<synchronous>, transform_indices = @transform_12, window_bounds = array<i64: 34, 8>}, {pipeline_mode = #tpu.pipeline_mode<synchronous>, transform_indices = @transform_13, window_bounds = array<i64: 1, 8>}, {pipeline_mode = #tpu.pipeline_mode<synchronous>, transform_indices = @transform_14, window_bounds = array<i64: 8, 8>}, {pipeline_mode = #tpu.pipeline_mode<synchronous>, transform_indices = @transform_15, window_bounds = array<i64: 1, 8>}, {pipeline_mode = #tpu.pipeline_mode<synchronous>, transform_indices = @transform_16, window_bounds = array<i64: 544, 32>}, {pipeline_mode = #tpu.pipeline_mode<synchronous>, transform_indices = @transform_17, window_bounds = array<i64: 16, 32>}, {pipeline_mode = #tpu.pipeline_mode<synchronous>, transform_indices = @transform_18, window_bounds = array<i64: 34, 32>}, {pipeline_mode = #tpu.pipeline_mode<synchronous>, transform_indices = @transform_19, window_bounds = array<i64: 34, 34>}, {pipeline_mode = #tpu.pipeline_mode<synchronous>, transform_indices = @transform_20, window_bounds = array<i64: 1, 34>}, {pipeline_mode = #tpu.pipeline_mode<synchronous>, transform_indices = @transform_21, window_bounds = array<i64: 34, 8>}, {pipeline_mode = #tpu.pipeline_mode<synchronous>, transform_indices = @transform_22, window_bounds = array<i64: 1, 8>}, {pipeline_mode = #tpu.pipeline_mode<synchronous>, transform_indices = @transform_23, window_bounds = array<i64: 8, 8>}, {pipeline_mode = #tpu.pipeline_mode<synchronous>, transform_indices = @transform_24, window_bounds = array<i64: 1, 8>}, {transform_indices = @transform_25, window_bounds = array<i64: 1, 1, 16, 32>}]} {
    %c0_i32 = arith.constant 0 : i32
    %0 = arith.cmpi eq, %arg1, %c0_i32 : i32
    %1 = arith.extui %0 : i1 to i32
    %c0_i32_0 = arith.constant 0 : i32
    %2 = arith.cmpi ne, %1, %c0_i32_0 : i32
    scf.if %2 {
      %c0_96 = arith.constant 0 : index
      %c0_97 = arith.constant 0 : index
      %c0_98 = arith.constant 0 : index
      %159 = vector.load %arg4[%c0_96, %c0_97, %c0_98] : memref<1x16x32xf32, #tpu.memory_space<vmem>>, vector<1x16x32xf32>
      %c0_99 = arith.constant 0 : index
      %c0_100 = arith.constant 0 : index
      %c0_101 = arith.constant 0 : index
      %160 = vector.load %arg28[%c0_99, %c0_100, %c0_101] : memref<1x16x32xf32, #tpu.memory_space<vmem>>, vector<1x16x32xf32>
      tpu.vector_store %arg28[%c0_99, %c0_100, %c0_101], %159 {strides = array<i32>} : memref<1x16x32xf32, #tpu.memory_space<vmem>>, vector<1x16x32xf32>,
    } else {
    }
    %c0 = arith.constant 0 : index
    %c0_1 = arith.constant 0 : index
    %c0_2 = arith.constant 0 : index
    %c0_3 = arith.constant 0 : index
    %3 = vector.load %arg2[%c0, %c0_1, %c0_2, %c0_3] : memref<1x1x16x2xf32, #tpu.memory_space<vmem>>, vector<1x1x16x2xf32>
    %4 = vector.shape_cast %3 : vector<1x1x16x2xf32> to vector<1x16x2xf32>
    %c0_4 = arith.constant 0 : index
    %c0_5 = arith.constant 0 : index
    %c0_6 = arith.constant 0 : index
    %c0_7 = arith.constant 0 : index
    %5 = vector.load %arg3[%c0_4, %c0_5, %c0_6, %c0_7] : memref<1x1x16x8xf32, #tpu.memory_space<vmem>>, vector<1x1x16x8xf32>
    %6 = vector.shape_cast %5 : vector<1x1x16x8xf32> to vector<1x16x8xf32>
    %c0_8 = arith.constant 0 : index
    %c0_9 = arith.constant 0 : index
    %c0_10 = arith.constant 0 : index
    %7 = vector.load %arg28[%c0_8, %c0_9, %c0_10] : memref<1x16x32xf32, #tpu.memory_space<vmem>>, vector<1x16x32xf32>
    %c0_11 = arith.constant 0 : index
    %c0_12 = arith.constant 0 : index
    %8 = vector.load %arg5[%c0_11, %c0_12] : memref<16x16xf32, #tpu.memory_space<vmem>>, vector<16x16xf32>
    %c0_13 = arith.constant 0 : index
    %c0_14 = arith.constant 0 : index
    %9 = vector.load %arg6[%c0_13, %c0_14] : memref<16x16xf32, #tpu.memory_space<vmem>>, vector<16x16xf32>
    %c0_15 = arith.constant 0 : index
    %c0_16 = arith.constant 0 : index
    %10 = vector.load %arg7[%c0_15, %c0_16] : memref<16x544xf32, #tpu.memory_space<vmem>>, vector<16x544xf32>
    %c0_17 = arith.constant 0 : index
    %c0_18 = arith.constant 0 : index
    %11 = vector.load %arg9[%c0_17, %c0_18] : memref<544x64xf32, #tpu.memory_space<vmem>>, vector<544x64xf32>
    %c0_19 = arith.constant 0 : index
    %c0_20 = arith.constant 0 : index
    %12 = vector.load %arg10[%c0_19, %c0_20] : memref<16x64xf32, #tpu.memory_space<vmem>>, vector<16x64xf32>
    %c0_21 = arith.constant 0 : index
    %c0_22 = arith.constant 0 : index
    %13 = vector.load %arg11[%c0_21, %c0_22] : memref<34x64xf32, #tpu.memory_space<vmem>>, vector<34x64xf32>
    %c0_23 = arith.constant 0 : index
    %c0_24 = arith.constant 0 : index
    %14 = vector.load %arg12[%c0_23, %c0_24] : memref<34x34xf32, #tpu.memory_space<vmem>>, vector<34x34xf32>
    %c0_25 = arith.constant 0 : index
    %c0_26 = arith.constant 0 : index
    %15 = vector.load %arg13[%c0_25, %c0_26] : memref<1x34xf32, #tpu.memory_space<vmem>>, vector<1x34xf32>
    %c0_27 = arith.constant 0 : index
    %c0_28 = arith.constant 0 : index
    %16 = vector.load %arg14[%c0_27, %c0_28] : memref<34x8xf32, #tpu.memory_space<vmem>>, vector<34x8xf32>
    %c0_29 = arith.constant 0 : index
    %c0_30 = arith.constant 0 : index
    %17 = vector.load %arg15[%c0_29, %c0_30] : memref<1x8xf32, #tpu.memory_space<vmem>>, vector<1x8xf32>
    %c0_31 = arith.constant 0 : index
    %c0_32 = arith.constant 0 : index
    %18 = vector.load %arg16[%c0_31, %c0_32] : memref<8x8xf32, #tpu.memory_space<vmem>>, vector<8x8xf32>
    %c0_33 = arith.constant 0 : index
    %c0_34 = arith.constant 0 : index
    %19 = vector.load %arg17[%c0_33, %c0_34] : memref<1x8xf32, #tpu.memory_space<vmem>>, vector<1x8xf32>
    %c0_35 = arith.constant 0 : index
    %c0_36 = arith.constant 0 : index
    %20 = vector.load %arg18[%c0_35, %c0_36] : memref<544x32xf32, #tpu.memory_space<vmem>>, vector<544x32xf32>
    %c0_37 = arith.constant 0 : index
    %c0_38 = arith.constant 0 : index
    %21 = vector.load %arg19[%c0_37, %c0_38] : memref<16x32xf32, #tpu.memory_space<vmem>>, vector<16x32xf32>
    %c0_39 = arith.constant 0 : index
    %c0_40 = arith.constant 0 : index
    %22 = vector.load %arg20[%c0_39, %c0_40] : memref<34x32xf32, #tpu.memory_space<vmem>>, vector<34x32xf32>
    %c0_41 = arith.constant 0 : index
    %c0_42 = arith.constant 0 : index
    %23 = vector.load %arg21[%c0_41, %c0_42] : memref<34x34xf32, #tpu.memory_space<vmem>>, vector<34x34xf32>
    %c0_43 = arith.constant 0 : index
    %c0_44 = arith.constant 0 : index
    %24 = vector.load %arg22[%c0_43, %c0_44] : memref<1x34xf32, #tpu.memory_space<vmem>>, vector<1x34xf32>
    %c0_45 = arith.constant 0 : index
    %c0_46 = arith.constant 0 : index
    %25 = vector.load %arg23[%c0_45, %c0_46] : memref<34x8xf32, #tpu.memory_space<vmem>>, vector<34x8xf32>
    %c0_47 = arith.constant 0 : index
    %c0_48 = arith.constant 0 : index
    %26 = vector.load %arg24[%c0_47, %c0_48] : memref<1x8xf32, #tpu.memory_space<vmem>>, vector<1x8xf32>
    %c0_49 = arith.constant 0 : index
    %c0_50 = arith.constant 0 : index
    %27 = vector.load %arg25[%c0_49, %c0_50] : memref<8x8xf32, #tpu.memory_space<vmem>>, vector<8x8xf32>
    %c0_51 = arith.constant 0 : index
    %c0_52 = arith.constant 0 : index
    %28 = vector.load %arg26[%c0_51, %c0_52] : memref<1x8xf32, #tpu.memory_space<vmem>>, vector<1x8xf32>
    %c0_53 = arith.constant 0 : index
    %c0_54 = arith.constant 0 : index
    %29 = memref.load %arg8[%c0_53, %c0_54] : memref<2x2xf32, #tpu.memory_space<smem>>
    %c0_55 = arith.constant 0 : index
    %c1 = arith.constant 1 : index
    %30 = memref.load %arg8[%c0_55, %c1] : memref<2x2xf32, #tpu.memory_space<smem>>
    %c1_56 = arith.constant 1 : index
    %c0_57 = arith.constant 0 : index
    %31 = memref.load %arg8[%c1_56, %c0_57] : memref<2x2xf32, #tpu.memory_space<smem>>
    %c1_58 = arith.constant 1 : index
    %c1_59 = arith.constant 1 : index
    %32 = memref.load %arg8[%c1_58, %c1_59] : memref<2x2xf32, #tpu.memory_space<smem>>
    %33 = tpu.concatenate %4, %7 in 2 : vector<1x16x2xf32>, vector<1x16x32xf32> -> vector<1x16x34xf32>
    %34 = vector.shape_cast %8 : vector<16x16xf32> to vector<1x16x16xf32>
    %35 = vector.shape_cast %9 : vector<16x16xf32> to vector<1x16x16xf32>
    "tpu.trace_start"() <{level = 10 : i32, message = "bnm,bmc->bnc"}> : () -> ()
    %cst = arith.constant dense<0.000000e+00> : vector<1x16x34xf32>
    %36 = tpu.matmul %34, %33, %cst {dimension_numbers = #tpu.dot_dimension_numbers<[2], [1], [1], [2], [0, 0, 0, 1, 1, 2], [0], [0]>} : vector<1x16x16xf32>, vector<1x16x34xf32>, vector<1x16x34xf32> -> vector<1x16x34xf32>
    %cst_60 = arith.constant dense<0.000000e+00> : vector<1x16x34xf32>
    %37 = tpu.matmul %35, %33, %cst_60 {dimension_numbers = #tpu.dot_dimension_numbers<[2], [1], [1], [2], [0, 0, 0, 1, 1, 2], [0], [0]>} : vector<1x16x16xf32>, vector<1x16x34xf32>, vector<1x16x34xf32> -> vector<1x16x34xf32>
    "tpu.trace_stop"() : () -> ()
    %38 = vector.shape_cast %36 : vector<1x16x34xf32> to vector<16x34xf32>
    %cst_61 = arith.constant dense<0.000000e+00> : vector<16x34xf32>
    %39 = tpu.matmul %38, %14, %cst_61 {dimension_numbers = #tpu.dot_dimension_numbers<[1], [0], [0], [1], [0, 0, 1, 1], [], []>} : vector<16x34xf32>, vector<34x34xf32>, vector<16x34xf32> -> vector<16x34xf32>
    %40 = vector.broadcast %15 : vector<1x34xf32> to vector<16x34xf32>
    %41 = arith.addf %39, %40 : vector<16x34xf32>
    %42 = arith.negf %41 : vector<16x34xf32>
    %43 = math.exp %42 : vector<16x34xf32>
    %cst_62 = arith.constant 1.000000e+00 : f32
    %44 = vector.broadcast %cst_62 : f32 to vector<16x34xf32>
    %45 = arith.addf %44, %43 : vector<16x34xf32>
    %46 = arith.divf %44, %45 : vector<16x34xf32>
    %cst_63 = arith.constant dense<0.000000e+00> : vector<16x8xf32>
    %47 = tpu.matmul %46, %16, %cst_63 {dimension_numbers = #tpu.dot_dimension_numbers<[1], [0], [0], [1], [0, 0, 1, 1], [], []>} : vector<16x34xf32>, vector<34x8xf32>, vector<16x8xf32> -> vector<16x8xf32>
    %48 = vector.broadcast %17 : vector<1x8xf32> to vector<16x8xf32>
    %49 = arith.addf %47, %48 : vector<16x8xf32>
    %50 = arith.negf %49 : vector<16x8xf32>
    %51 = math.exp %50 : vector<16x8xf32>
    %cst_64 = arith.constant 1.000000e+00 : f32
    %52 = vector.broadcast %cst_64 : f32 to vector<16x8xf32>
    %53 = arith.addf %52, %51 : vector<16x8xf32>
    %54 = arith.divf %52, %53 : vector<16x8xf32>
    %cst_65 = arith.constant dense<0.000000e+00> : vector<16x8xf32>
    %55 = tpu.matmul %54, %18, %cst_65 {dimension_numbers = #tpu.dot_dimension_numbers<[1], [0], [0], [1], [0, 0, 1, 1], [], []>} : vector<16x8xf32>, vector<8x8xf32>, vector<16x8xf32> -> vector<16x8xf32>
    %56 = vector.broadcast %19 : vector<1x8xf32> to vector<16x8xf32>
    %57 = arith.addf %55, %56 : vector<16x8xf32>
    %58 = vector.shape_cast %57 : vector<16x8xf32> to vector<1x16x8xf32>
    %cst_66 = arith.constant 3.000000e+00 : f32
    %59 = vector.broadcast %cst_66 : f32 to vector<1x16x8xf32>
    %60 = arith.mulf %59, %6 : vector<1x16x8xf32>
    %61 = arith.mulf %60, %58 : vector<1x16x8xf32>
    %62 = math.tanh %61 : vector<1x16x8xf32>
    "tpu.trace_start"() <{level = 10 : i32, message = "bne,bme->bnm"}> : () -> ()
    %cst_67 = arith.constant dense<0.000000e+00> : vector<1x16x16xf32>
    %63 = tpu.matmul %62, %62, %cst_67 {dimension_numbers = #tpu.dot_dimension_numbers<[2], [2], [1], [1], [0, 0, 0, 1, 1, 1], [0], [0]>} : vector<1x16x8xf32>, vector<1x16x8xf32>, vector<1x16x16xf32> -> vector<1x16x16xf32>
    "tpu.trace_stop"() : () -> ()
    %cst_68 = arith.constant 3.000000e+00 : f32
    %64 = vector.broadcast %cst_68 : f32 to vector<1x16x16xf32>
    %65 = arith.mulf %64, %63 : vector<1x16x16xf32>
    %66 = math.tanh %65 : vector<1x16x16xf32>
    %cst_69 = arith.constant 0.000000e+00 : f32
    %67 = vector.broadcast %cst_69 : f32 to vector<1x16x16xf32>
    %68 = arith.maximumf %66, %67 : vector<1x16x16xf32>
    %69 = tpu.concatenate %33, %37 in 2 : vector<1x16x34xf32>, vector<1x16x34xf32> -> vector<1x16x68xf32>
    %70 = tpu.concatenate %69, %69, %69, %69, %69, %69, %69, %69 in 2 : vector<1x16x68xf32>, vector<1x16x68xf32>, vector<1x16x68xf32>, vector<1x16x68xf32>, vector<1x16x68xf32>, vector<1x16x68xf32>, vector<1x16x68xf32>, vector<1x16x68xf32> -> vector<1x16x544xf32>
    %71 = vector.shape_cast %10 : vector<16x544xf32> to vector<1x16x544xf32>
    %72 = arith.mulf %70, %71 : vector<1x16x544xf32>
    %73 = vector.shape_cast %72 : vector<1x16x544xf32> to vector<16x544xf32>
    %cst_70 = arith.constant dense<0.000000e+00> : vector<16x64xf32>
    %74 = tpu.matmul %73, %11, %cst_70 {dimension_numbers = #tpu.dot_dimension_numbers<[1], [0], [0], [1], [0, 0, 1, 1], [], []>} : vector<16x544xf32>, vector<544x64xf32>, vector<16x64xf32> -> vector<16x64xf32>
    %75 = vector.shape_cast %74 : vector<16x64xf32> to vector<1x16x64xf32>
    %76 = vector.shape_cast %12 : vector<16x64xf32> to vector<1x16x64xf32>
    %77 = arith.addf %75, %76 : vector<1x16x64xf32>
    "tpu.trace_start"() <{level = 10 : i32, message = "bnm,bmi->bni"}> : () -> ()
    %cst_71 = arith.constant dense<0.000000e+00> : vector<1x16x34xf32>
    %78 = tpu.matmul %68, %33, %cst_71 {dimension_numbers = #tpu.dot_dimension_numbers<[2], [1], [1], [2], [0, 0, 0, 1, 1, 2], [0], [0]>} : vector<1x16x16xf32>, vector<1x16x34xf32>, vector<1x16x34xf32> -> vector<1x16x34xf32>
    "tpu.trace_stop"() : () -> ()
    %79 = vector.shape_cast %78 : vector<1x16x34xf32> to vector<16x34xf32>
    %cst_72 = arith.constant dense<0.000000e+00> : vector<16x64xf32>
    %80 = tpu.matmul %79, %13, %cst_72 {dimension_numbers = #tpu.dot_dimension_numbers<[1], [0], [0], [1], [0, 0, 1, 1], [], []>} : vector<16x34xf32>, vector<34x64xf32>, vector<16x64xf32> -> vector<16x64xf32>
    %81 = vector.shape_cast %80 : vector<16x64xf32> to vector<1x16x64xf32>
    %82 = vector.broadcast %29 : f32 to vector<1x16x64xf32>
    %83 = arith.mulf %82, %77 : vector<1x16x64xf32>
    %84 = vector.broadcast %30 : f32 to vector<1x16x64xf32>
    %85 = arith.mulf %84, %81 : vector<1x16x64xf32>
    %86 = arith.addf %83, %85 : vector<1x16x64xf32>
    %87 = arith.negf %86 : vector<1x16x64xf32>
    %88 = math.exp %87 : vector<1x16x64xf32>
    %cst_73 = arith.constant 1.000000e+00 : f32
    %89 = vector.broadcast %cst_73 : f32 to vector<1x16x64xf32>
    %90 = arith.addf %89, %88 : vector<1x16x64xf32>
    %91 = arith.divf %89, %90 : vector<1x16x64xf32>
    %92 = vector.extract_strided_slice %91 {offsets = [0, 0, 0], sizes = [1, 16, 32], strides = [1, 1, 1]} : vector<1x16x64xf32> to vector<1x16x32xf32>
    %93 = vector.extract_strided_slice %91 {offsets = [0, 0, 32], sizes = [1, 16, 32], strides = [1, 1, 1]} : vector<1x16x64xf32> to vector<1x16x32xf32>
    %94 = arith.mulf %92, %7 : vector<1x16x32xf32>
    %95 = tpu.concatenate %4, %94 in 2 : vector<1x16x2xf32>, vector<1x16x32xf32> -> vector<1x16x34xf32>
    %96 = vector.shape_cast %8 : vector<16x16xf32> to vector<1x16x16xf32>
    %97 = vector.shape_cast %9 : vector<16x16xf32> to vector<1x16x16xf32>
    "tpu.trace_start"() <{level = 10 : i32, message = "bnm,bmc->bnc"}> : () -> ()
    %cst_74 = arith.constant dense<0.000000e+00> : vector<1x16x34xf32>
    %98 = tpu.matmul %96, %95, %cst_74 {dimension_numbers = #tpu.dot_dimension_numbers<[2], [1], [1], [2], [0, 0, 0, 1, 1, 2], [0], [0]>} : vector<1x16x16xf32>, vector<1x16x34xf32>, vector<1x16x34xf32> -> vector<1x16x34xf32>
    %cst_75 = arith.constant dense<0.000000e+00> : vector<1x16x34xf32>
    %99 = tpu.matmul %97, %95, %cst_75 {dimension_numbers = #tpu.dot_dimension_numbers<[2], [1], [1], [2], [0, 0, 0, 1, 1, 2], [0], [0]>} : vector<1x16x16xf32>, vector<1x16x34xf32>, vector<1x16x34xf32> -> vector<1x16x34xf32>
    "tpu.trace_stop"() : () -> ()
    %100 = vector.shape_cast %98 : vector<1x16x34xf32> to vector<16x34xf32>
    %cst_76 = arith.constant dense<0.000000e+00> : vector<16x34xf32>
    %101 = tpu.matmul %100, %23, %cst_76 {dimension_numbers = #tpu.dot_dimension_numbers<[1], [0], [0], [1], [0, 0, 1, 1], [], []>} : vector<16x34xf32>, vector<34x34xf32>, vector<16x34xf32> -> vector<16x34xf32>
    %102 = vector.broadcast %24 : vector<1x34xf32> to vector<16x34xf32>
    %103 = arith.addf %101, %102 : vector<16x34xf32>
    %104 = arith.negf %103 : vector<16x34xf32>
    %105 = math.exp %104 : vector<16x34xf32>
    %cst_77 = arith.constant 1.000000e+00 : f32
    %106 = vector.broadcast %cst_77 : f32 to vector<16x34xf32>
    %107 = arith.addf %106, %105 : vector<16x34xf32>
    %108 = arith.divf %106, %107 : vector<16x34xf32>
    %cst_78 = arith.constant dense<0.000000e+00> : vector<16x8xf32>
    %109 = tpu.matmul %108, %25, %cst_78 {dimension_numbers = #tpu.dot_dimension_numbers<[1], [0], [0], [1], [0, 0, 1, 1], [], []>} : vector<16x34xf32>, vector<34x8xf32>, vector<16x8xf32> -> vector<16x8xf32>
    %110 = vector.broadcast %26 : vector<1x8xf32> to vector<16x8xf32>
    %111 = arith.addf %109, %110 : vector<16x8xf32>
    %112 = arith.negf %111 : vector<16x8xf32>
    %113 = math.exp %112 : vector<16x8xf32>
    %cst_79 = arith.constant 1.000000e+00 : f32
    %114 = vector.broadcast %cst_79 : f32 to vector<16x8xf32>
    %115 = arith.addf %114, %113 : vector<16x8xf32>
    %116 = arith.divf %114, %115 : vector<16x8xf32>
    %cst_80 = arith.constant dense<0.000000e+00> : vector<16x8xf32>
    %117 = tpu.matmul %116, %27, %cst_80 {dimension_numbers = #tpu.dot_dimension_numbers<[1], [0], [0], [1], [0, 0, 1, 1], [], []>} : vector<16x8xf32>, vector<8x8xf32>, vector<16x8xf32> -> vector<16x8xf32>
    %118 = vector.broadcast %28 : vector<1x8xf32> to vector<16x8xf32>
    %119 = arith.addf %117, %118 : vector<16x8xf32>
    %120 = vector.shape_cast %119 : vector<16x8xf32> to vector<1x16x8xf32>
    %cst_81 = arith.constant 3.000000e+00 : f32
    %121 = vector.broadcast %cst_81 : f32 to vector<1x16x8xf32>
    %122 = arith.mulf %121, %6 : vector<1x16x8xf32>
    %123 = arith.mulf %122, %120 : vector<1x16x8xf32>
    %124 = math.tanh %123 : vector<1x16x8xf32>
    "tpu.trace_start"() <{level = 10 : i32, message = "bne,bme->bnm"}> : () -> ()
    %cst_82 = arith.constant dense<0.000000e+00> : vector<1x16x16xf32>
    %125 = tpu.matmul %124, %124, %cst_82 {dimension_numbers = #tpu.dot_dimension_numbers<[2], [2], [1], [1], [0, 0, 0, 1, 1, 1], [0], [0]>} : vector<1x16x8xf32>, vector<1x16x8xf32>, vector<1x16x16xf32> -> vector<1x16x16xf32>
    "tpu.trace_stop"() : () -> ()
    %cst_83 = arith.constant 3.000000e+00 : f32
    %126 = vector.broadcast %cst_83 : f32 to vector<1x16x16xf32>
    %127 = arith.mulf %126, %125 : vector<1x16x16xf32>
    %128 = math.tanh %127 : vector<1x16x16xf32>
    %cst_84 = arith.constant 0.000000e+00 : f32
    %129 = vector.broadcast %cst_84 : f32 to vector<1x16x16xf32>
    %130 = arith.maximumf %128, %129 : vector<1x16x16xf32>
    %131 = tpu.concatenate %95, %99 in 2 : vector<1x16x34xf32>, vector<1x16x34xf32> -> vector<1x16x68xf32>
    %132 = tpu.concatenate %131, %131, %131, %131, %131, %131, %131, %131 in 2 : vector<1x16x68xf32>, vector<1x16x68xf32>, vector<1x16x68xf32>, vector<1x16x68xf32>, vector<1x16x68xf32>, vector<1x16x68xf32>, vector<1x16x68xf32>, vector<1x16x68xf32> -> vector<1x16x544xf32>
    %133 = vector.shape_cast %10 : vector<16x544xf32> to vector<1x16x544xf32>
    %134 = arith.mulf %132, %133 : vector<1x16x544xf32>
    %135 = vector.shape_cast %134 : vector<1x16x544xf32> to vector<16x544xf32>
    %cst_85 = arith.constant dense<0.000000e+00> : vector<16x32xf32>
    %136 = tpu.matmul %135, %20, %cst_85 {dimension_numbers = #tpu.dot_dimension_numbers<[1], [0], [0], [1], [0, 0, 1, 1], [], []>} : vector<16x544xf32>, vector<544x32xf32>, vector<16x32xf32> -> vector<16x32xf32>
    %137 = vector.shape_cast %136 : vector<16x32xf32> to vector<1x16x32xf32>
    %138 = vector.shape_cast %21 : vector<16x32xf32> to vector<1x16x32xf32>
    %139 = arith.addf %137, %138 : vector<1x16x32xf32>
    "tpu.trace_start"() <{level = 10 : i32, message = "bnm,bmi->bni"}> : () -> ()
    %cst_86 = arith.constant dense<0.000000e+00> : vector<1x16x34xf32>
    %140 = tpu.matmul %130, %95, %cst_86 {dimension_numbers = #tpu.dot_dimension_numbers<[2], [1], [1], [2], [0, 0, 0, 1, 1, 2], [0], [0]>} : vector<1x16x16xf32>, vector<1x16x34xf32>, vector<1x16x34xf32> -> vector<1x16x34xf32>
    "tpu.trace_stop"() : () -> ()
    %141 = vector.shape_cast %140 : vector<1x16x34xf32> to vector<16x34xf32>
    %cst_87 = arith.constant dense<0.000000e+00> : vector<16x32xf32>
    %142 = tpu.matmul %141, %22, %cst_87 {dimension_numbers = #tpu.dot_dimension_numbers<[1], [0], [0], [1], [0, 0, 1, 1], [], []>} : vector<16x34xf32>, vector<34x32xf32>, vector<16x32xf32> -> vector<16x32xf32>
    %143 = vector.shape_cast %142 : vector<16x32xf32> to vector<1x16x32xf32>
    %144 = vector.broadcast %31 : f32 to vector<1x16x32xf32>
    %145 = arith.mulf %144, %139 : vector<1x16x32xf32>
    %146 = vector.broadcast %32 : f32 to vector<1x16x32xf32>
    %147 = arith.mulf %146, %143 : vector<1x16x32xf32>
    %148 = arith.addf %145, %147 : vector<1x16x32xf32>
    %149 = math.tanh %148 : vector<1x16x32xf32>
    %150 = arith.mulf %93, %7 : vector<1x16x32xf32>
    %cst_88 = arith.constant 1.000000e+00 : f32
    %151 = vector.broadcast %cst_88 : f32 to vector<1x16x32xf32>
    %152 = arith.subf %151, %93 : vector<1x16x32xf32>
    %153 = arith.mulf %152, %149 : vector<1x16x32xf32>
    %154 = arith.addf %150, %153 : vector<1x16x32xf32>
    %c0_89 = arith.constant 0 : index
    %c0_90 = arith.constant 0 : index
    %c0_91 = arith.constant 0 : index
    %155 = vector.load %arg28[%c0_89, %c0_90, %c0_91] : memref<1x16x32xf32, #tpu.memory_space<vmem>>, vector<1x16x32xf32>
    tpu.vector_store %arg28[%c0_89, %c0_90, %c0_91], %154 {strides = array<i32>} : memref<1x16x32xf32, #tpu.memory_space<vmem>>, vector<1x16x32xf32>,
    %c0_92 = arith.constant 0 : index
    %c0_93 = arith.constant 0 : index
    %c0_94 = arith.constant 0 : index
    %c0_95 = arith.constant 0 : index
    %156 = vector.load %arg27[%c0_92, %c0_93, %c0_94, %c0_95] : memref<1x1x16x32xf32, #tpu.memory_space<vmem>>, vector<1x1x16x32xf32>
    %157 = vector.shape_cast %156 : vector<1x1x16x32xf32> to vector<1x16x32xf32>
    %158 = vector.shape_cast %154 : vector<1x16x32xf32> to vector<1x1x16x32xf32>
    tpu.vector_store %arg27[%c0_92, %c0_93, %c0_94, %c0_95], %158 {strides = array<i32>} : memref<1x1x16x32xf32, #tpu.memory_space<vmem>>, vector<1x1x16x32xf32>,
    return
  }
  func.func @transform_0(%arg0: i32, %arg1: i32) -> (i32, i32, i32, i32) {
    %c0_i32 = arith.constant 0 : i32
    %c0_i32_0 = arith.constant 0 : i32
    %c0_i32_1 = arith.constant 0 : i32
    return %arg1, %arg0, %c0_i32, %c0_i32_0 : i32, i32, i32, i32
  }
  func.func @transform_1(%arg0: i32, %arg1: i32) -> (i32, i32, i32, i32) {
    %c0_i32 = arith.constant 0 : i32
    %c0_i32_0 = arith.constant 0 : i32
    %c0_i32_1 = arith.constant 0 : i32
    return %arg1, %arg0, %c0_i32, %c0_i32_0 : i32, i32, i32, i32
  }
  func.func @transform_2(%arg0: i32, %arg1: i32) -> (i32, i32, i32) {
    %c0_i32 = arith.constant 0 : i32
    %c0_i32_0 = arith.constant 0 : i32
    %c0_i32_1 = arith.constant 0 : i32
    return %arg0, %c0_i32, %c0_i32_0 : i32, i32, i32
  }
  func.func @transform_3(%arg0: i32, %arg1: i32) -> (i32, i32) {
    %c0_i32 = arith.constant 0 : i32
    %c0_i32_0 = arith.constant 0 : i32
    %c0_i32_1 = arith.constant 0 : i32
    return %c0_i32, %c0_i32_0 : i32, i32
  }
  func.func @transform_4(%arg0: i32, %arg1: i32) -> (i32, i32) {
    %c0_i32 = arith.constant 0 : i32
    %c0_i32_0 = arith.constant 0 : i32
    %c0_i32_1 = arith.constant 0 : i32
    return %c0_i32, %c0_i32_0 : i32, i32
  }
  func.func @transform_5(%arg0: i32, %arg1: i32) -> (i32, i32) {
    %c0_i32 = arith.constant 0 : i32
    %c0_i32_0 = arith.constant 0 : i32
    %c0_i32_1 = arith.constant 0 : i32
    return %c0_i32, %c0_i32_0 : i32, i32
  }
  func.func @transform_6(%arg0: i32, %arg1: i32) -> (i32, i32) {
    %c0_i32 = arith.constant 0 : i32
    %c0_i32_0 = arith.constant 0 : i32
    %c0_i32_1 = arith.constant 0 : i32
    return %c0_i32, %c0_i32_0 : i32, i32
  }
  func.func @transform_7(%arg0: i32, %arg1: i32) -> (i32, i32) {
    %c0_i32 = arith.constant 0 : i32
    %c0_i32_0 = arith.constant 0 : i32
    %c0_i32_1 = arith.constant 0 : i32
    return %c0_i32, %c0_i32_0 : i32, i32
  }
  func.func @transform_8(%arg0: i32, %arg1: i32) -> (i32, i32) {
    %c0_i32 = arith.constant 0 : i32
    %c0_i32_0 = arith.constant 0 : i32
    %c0_i32_1 = arith.constant 0 : i32
    return %c0_i32, %c0_i32_0 : i32, i32
  }
  func.func @transform_9(%arg0: i32, %arg1: i32) -> (i32, i32) {
    %c0_i32 = arith.constant 0 : i32
    %c0_i32_0 = arith.constant 0 : i32
    %c0_i32_1 = arith.constant 0 : i32
    return %c0_i32, %c0_i32_0 : i32, i32
  }
  func.func @transform_10(%arg0: i32, %arg1: i32) -> (i32, i32) {
    %c0_i32 = arith.constant 0 : i32
    %c0_i32_0 = arith.constant 0 : i32
    %c0_i32_1 = arith.constant 0 : i32
    return %c0_i32, %c0_i32_0 : i32, i32
  }
  func.func @transform_11(%arg0: i32, %arg1: i32) -> (i32, i32) {
    %c0_i32 = arith.constant 0 : i32
    %c0_i32_0 = arith.constant 0 : i32
    %c0_i32_1 = arith.constant 0 : i32
    return %c0_i32, %c0_i32_0 : i32, i32
  }
  func.func @transform_12(%arg0: i32, %arg1: i32) -> (i32, i32) {
    %c0_i32 = arith.constant 0 : i32
    %c0_i32_0 = arith.constant 0 : i32
    %c0_i32_1 = arith.constant 0 : i32
    return %c0_i32, %c0_i32_0 : i32, i32
  }
  func.func @transform_13(%arg0: i32, %arg1: i32) -> (i32, i32) {
    %c0_i32 = arith.constant 0 : i32
    %c0_i32_0 = arith.constant 0 : i32
    %c0_i32_1 = arith.constant 0 : i32
    return %c0_i32, %c0_i32_0 : i32, i32
  }
  func.func @transform_14(%arg0: i32, %arg1: i32) -> (i32, i32) {
    %c0_i32 = arith.constant 0 : i32
    %c0_i32_0 = arith.constant 0 : i32
    %c0_i32_1 = arith.constant 0 : i32
    return %c0_i32, %c0_i32_0 : i32, i32
  }
  func.func @transform_15(%arg0: i32, %arg1: i32) -> (i32, i32) {
    %c0_i32 = arith.constant 0 : i32
    %c0_i32_0 = arith.constant 0 : i32
    %c0_i32_1 = arith.constant 0 : i32
    return %c0_i32, %c0_i32_0 : i32, i32
  }
  func.func @transform_16(%arg0: i32, %arg1: i32) -> (i32, i32) {
    %c0_i32 = arith.constant 0 : i32
    %c0_i32_0 = arith.constant 0 : i32
    %c0_i32_1 = arith.constant 0 : i32
    return %c0_i32, %c0_i32_0 : i32, i32
  }
  func.func @transform_17(%arg0: i32, %arg1: i32) -> (i32, i32) {
    %c0_i32 = arith.constant 0 : i32
    %c0_i32_0 = arith.constant 0 : i32
    %c0_i32_1 = arith.constant 0 : i32
    return %c0_i32, %c0_i32_0 : i32, i32
  }
  func.func @transform_18(%arg0: i32, %arg1: i32) -> (i32, i32) {
    %c0_i32 = arith.constant 0 : i32
    %c0_i32_0 = arith.constant 0 : i32
    %c0_i32_1 = arith.constant 0 : i32
    return %c0_i32, %c0_i32_0 : i32, i32
  }
  func.func @transform_19(%arg0: i32, %arg1: i32) -> (i32, i32) {
    %c0_i32 = arith.constant 0 : i32
    %c0_i32_0 = arith.constant 0 : i32
    %c0_i32_1 = arith.constant 0 : i32
    return %c0_i32, %c0_i32_0 : i32, i32
  }
  func.func @transform_20(%arg0: i32, %arg1: i32) -> (i32, i32) {
    %c0_i32 = arith.constant 0 : i32
    %c0_i32_0 = arith.constant 0 : i32
    %c0_i32_1 = arith.constant 0 : i32
    return %c0_i32, %c0_i32_0 : i32, i32
  }
  func.func @transform_21(%arg0: i32, %arg1: i32) -> (i32, i32) {
    %c0_i32 = arith.constant 0 : i32
    %c0_i32_0 = arith.constant 0 : i32
    %c0_i32_1 = arith.constant 0 : i32
    return %c0_i32, %c0_i32_0 : i32, i32
  }
  func.func @transform_22(%arg0: i32, %arg1: i32) -> (i32, i32) {
    %c0_i32 = arith.constant 0 : i32
    %c0_i32_0 = arith.constant 0 : i32
    %c0_i32_1 = arith.constant 0 : i32
    return %c0_i32, %c0_i32_0 : i32, i32
  }
  func.func @transform_23(%arg0: i32, %arg1: i32) -> (i32, i32) {
    %c0_i32 = arith.constant 0 : i32
    %c0_i32_0 = arith.constant 0 : i32
    %c0_i32_1 = arith.constant 0 : i32
    return %c0_i32, %c0_i32_0 : i32, i32
  }
  func.func @transform_24(%arg0: i32, %arg1: i32) -> (i32, i32) {
    %c0_i32 = arith.constant 0 : i32
    %c0_i32_0 = arith.constant 0 : i32
    %c0_i32_1 = arith.constant 0 : i32
    return %c0_i32, %c0_i32_0 : i32, i32
  }
  func.func @transform_25(%arg0: i32, %arg1: i32) -> (i32, i32, i32, i32) {
    %c0_i32 = arith.constant 0 : i32
    %c0_i32_0 = arith.constant 0 : i32
    %c0_i32_1 = arith.constant 0 : i32
    return %arg1, %arg0, %c0_i32, %c0_i32_0 : i32, i32, i32, i32
  }
}

module attributes {stable_mosaic.version = 11 : i64} {
  func.func @_encoder_layer_kernel(%arg0: i32, %arg1: i32, %arg2: memref<1x1x16x32xf32, #tpu.memory_space<vmem>>, %arg3: memref<1x1x16x8xf32, #tpu.memory_space<vmem>>, %arg4: memref<1x16x32xf32, #tpu.memory_space<vmem>>, %arg5: memref<16x16xf32, #tpu.memory_space<vmem>>, %arg6: memref<16x16xf32, #tpu.memory_space<vmem>>, %arg7: memref<16x1024xf32, #tpu.memory_space<vmem>>, %arg8: memref<2x2xf32, #tpu.memory_space<smem>>, %arg9: memref<1024x64xf32, #tpu.memory_space<vmem>>, %arg10: memref<16x64xf32, #tpu.memory_space<vmem>>, %arg11: memref<64x64xf32, #tpu.memory_space<vmem>>, %arg12: memref<64x64xf32, #tpu.memory_space<vmem>>, %arg13: memref<1x64xf32, #tpu.memory_space<vmem>>, %arg14: memref<64x8xf32, #tpu.memory_space<vmem>>, %arg15: memref<1x8xf32, #tpu.memory_space<vmem>>, %arg16: memref<8x8xf32, #tpu.memory_space<vmem>>, %arg17: memref<1x8xf32, #tpu.memory_space<vmem>>, %arg18: memref<1024x32xf32, #tpu.memory_space<vmem>>, %arg19: memref<16x32xf32, #tpu.memory_space<vmem>>, %arg20: memref<64x32xf32, #tpu.memory_space<vmem>>, %arg21: memref<64x64xf32, #tpu.memory_space<vmem>>, %arg22: memref<1x64xf32, #tpu.memory_space<vmem>>, %arg23: memref<64x8xf32, #tpu.memory_space<vmem>>, %arg24: memref<1x8xf32, #tpu.memory_space<vmem>>, %arg25: memref<8x8xf32, #tpu.memory_space<vmem>>, %arg26: memref<1x8xf32, #tpu.memory_space<vmem>>, %arg27: memref<1x1x16x32xf32, #tpu.memory_space<vmem>>, %arg28: memref<1x16x32xf32, #tpu.memory_space<vmem>>) attributes {dimension_semantics = [#tpu.dimension_semantics<parallel>, #tpu.dimension_semantics<arbitrary>], iteration_bounds = array<i64: 2, 4>, scalar_prefetch = 0 : i64, scratch_operands = 1 : i64, tpu.core_type = #tpu.core_type<tc>, window_params = [{transform_indices = @transform_0, window_bounds = array<i64: 1, 1, 16, 32>}, {transform_indices = @transform_1, window_bounds = array<i64: 1, 1, 16, 8>}, {transform_indices = @transform_2, window_bounds = array<i64: 1, 16, 32>}, {pipeline_mode = #tpu.pipeline_mode<synchronous>, transform_indices = @transform_3, window_bounds = array<i64: 16, 16>}, {pipeline_mode = #tpu.pipeline_mode<synchronous>, transform_indices = @transform_4, window_bounds = array<i64: 16, 16>}, {pipeline_mode = #tpu.pipeline_mode<synchronous>, transform_indices = @transform_5, window_bounds = array<i64: 16, 1024>}, {transform_indices = @transform_6, window_bounds = array<i64: 2, 2>}, {pipeline_mode = #tpu.pipeline_mode<synchronous>, transform_indices = @transform_7, window_bounds = array<i64: 1024, 64>}, {pipeline_mode = #tpu.pipeline_mode<synchronous>, transform_indices = @transform_8, window_bounds = array<i64: 16, 64>}, {pipeline_mode = #tpu.pipeline_mode<synchronous>, transform_indices = @transform_9, window_bounds = array<i64: 64, 64>}, {pipeline_mode = #tpu.pipeline_mode<synchronous>, transform_indices = @transform_10, window_bounds = array<i64: 64, 64>}, {pipeline_mode = #tpu.pipeline_mode<synchronous>, transform_indices = @transform_11, window_bounds = array<i64: 1, 64>}, {pipeline_mode = #tpu.pipeline_mode<synchronous>, transform_indices = @transform_12, window_bounds = array<i64: 64, 8>}, {pipeline_mode = #tpu.pipeline_mode<synchronous>, transform_indices = @transform_13, window_bounds = array<i64: 1, 8>}, {pipeline_mode = #tpu.pipeline_mode<synchronous>, transform_indices = @transform_14, window_bounds = array<i64: 8, 8>}, {pipeline_mode = #tpu.pipeline_mode<synchronous>, transform_indices = @transform_15, window_bounds = array<i64: 1, 8>}, {pipeline_mode = #tpu.pipeline_mode<synchronous>, transform_indices = @transform_16, window_bounds = array<i64: 1024, 32>}, {pipeline_mode = #tpu.pipeline_mode<synchronous>, transform_indices = @transform_17, window_bounds = array<i64: 16, 32>}, {pipeline_mode = #tpu.pipeline_mode<synchronous>, transform_indices = @transform_18, window_bounds = array<i64: 64, 32>}, {pipeline_mode = #tpu.pipeline_mode<synchronous>, transform_indices = @transform_19, window_bounds = array<i64: 64, 64>}, {pipeline_mode = #tpu.pipeline_mode<synchronous>, transform_indices = @transform_20, window_bounds = array<i64: 1, 64>}, {pipeline_mode = #tpu.pipeline_mode<synchronous>, transform_indices = @transform_21, window_bounds = array<i64: 64, 8>}, {pipeline_mode = #tpu.pipeline_mode<synchronous>, transform_indices = @transform_22, window_bounds = array<i64: 1, 8>}, {pipeline_mode = #tpu.pipeline_mode<synchronous>, transform_indices = @transform_23, window_bounds = array<i64: 8, 8>}, {pipeline_mode = #tpu.pipeline_mode<synchronous>, transform_indices = @transform_24, window_bounds = array<i64: 1, 8>}, {transform_indices = @transform_25, window_bounds = array<i64: 1, 1, 16, 32>}]} {
    %c0_i32 = arith.constant 0 : i32
    %0 = arith.cmpi eq, %arg1, %c0_i32 : i32
    %1 = arith.extui %0 : i1 to i32
    %c0_i32_0 = arith.constant 0 : i32
    %2 = arith.cmpi ne, %1, %c0_i32_0 : i32
    scf.if %2 {
      %c0_96 = arith.constant 0 : index
      %c0_97 = arith.constant 0 : index
      %c0_98 = arith.constant 0 : index
      %159 = vector.load %arg4[%c0_96, %c0_97, %c0_98] : memref<1x16x32xf32, #tpu.memory_space<vmem>>, vector<1x16x32xf32>
      %c0_99 = arith.constant 0 : index
      %c0_100 = arith.constant 0 : index
      %c0_101 = arith.constant 0 : index
      %160 = vector.load %arg28[%c0_99, %c0_100, %c0_101] : memref<1x16x32xf32, #tpu.memory_space<vmem>>, vector<1x16x32xf32>
      tpu.vector_store %arg28[%c0_99, %c0_100, %c0_101], %159 {strides = array<i32>} : memref<1x16x32xf32, #tpu.memory_space<vmem>>, vector<1x16x32xf32>,
    } else {
    }
    %c0 = arith.constant 0 : index
    %c0_1 = arith.constant 0 : index
    %c0_2 = arith.constant 0 : index
    %c0_3 = arith.constant 0 : index
    %3 = vector.load %arg2[%c0, %c0_1, %c0_2, %c0_3] : memref<1x1x16x32xf32, #tpu.memory_space<vmem>>, vector<1x1x16x32xf32>
    %4 = vector.shape_cast %3 : vector<1x1x16x32xf32> to vector<1x16x32xf32>
    %c0_4 = arith.constant 0 : index
    %c0_5 = arith.constant 0 : index
    %c0_6 = arith.constant 0 : index
    %c0_7 = arith.constant 0 : index
    %5 = vector.load %arg3[%c0_4, %c0_5, %c0_6, %c0_7] : memref<1x1x16x8xf32, #tpu.memory_space<vmem>>, vector<1x1x16x8xf32>
    %6 = vector.shape_cast %5 : vector<1x1x16x8xf32> to vector<1x16x8xf32>
    %c0_8 = arith.constant 0 : index
    %c0_9 = arith.constant 0 : index
    %c0_10 = arith.constant 0 : index
    %7 = vector.load %arg28[%c0_8, %c0_9, %c0_10] : memref<1x16x32xf32, #tpu.memory_space<vmem>>, vector<1x16x32xf32>
    %c0_11 = arith.constant 0 : index
    %c0_12 = arith.constant 0 : index
    %8 = vector.load %arg5[%c0_11, %c0_12] : memref<16x16xf32, #tpu.memory_space<vmem>>, vector<16x16xf32>
    %c0_13 = arith.constant 0 : index
    %c0_14 = arith.constant 0 : index
    %9 = vector.load %arg6[%c0_13, %c0_14] : memref<16x16xf32, #tpu.memory_space<vmem>>, vector<16x16xf32>
    %c0_15 = arith.constant 0 : index
    %c0_16 = arith.constant 0 : index
    %10 = vector.load %arg7[%c0_15, %c0_16] : memref<16x1024xf32, #tpu.memory_space<vmem>>, vector<16x1024xf32>
    %c0_17 = arith.constant 0 : index
    %c0_18 = arith.constant 0 : index
    %11 = vector.load %arg9[%c0_17, %c0_18] : memref<1024x64xf32, #tpu.memory_space<vmem>>, vector<1024x64xf32>
    %c0_19 = arith.constant 0 : index
    %c0_20 = arith.constant 0 : index
    %12 = vector.load %arg10[%c0_19, %c0_20] : memref<16x64xf32, #tpu.memory_space<vmem>>, vector<16x64xf32>
    %c0_21 = arith.constant 0 : index
    %c0_22 = arith.constant 0 : index
    %13 = vector.load %arg11[%c0_21, %c0_22] : memref<64x64xf32, #tpu.memory_space<vmem>>, vector<64x64xf32>
    %c0_23 = arith.constant 0 : index
    %c0_24 = arith.constant 0 : index
    %14 = vector.load %arg12[%c0_23, %c0_24] : memref<64x64xf32, #tpu.memory_space<vmem>>, vector<64x64xf32>
    %c0_25 = arith.constant 0 : index
    %c0_26 = arith.constant 0 : index
    %15 = vector.load %arg13[%c0_25, %c0_26] : memref<1x64xf32, #tpu.memory_space<vmem>>, vector<1x64xf32>
    %c0_27 = arith.constant 0 : index
    %c0_28 = arith.constant 0 : index
    %16 = vector.load %arg14[%c0_27, %c0_28] : memref<64x8xf32, #tpu.memory_space<vmem>>, vector<64x8xf32>
    %c0_29 = arith.constant 0 : index
    %c0_30 = arith.constant 0 : index
    %17 = vector.load %arg15[%c0_29, %c0_30] : memref<1x8xf32, #tpu.memory_space<vmem>>, vector<1x8xf32>
    %c0_31 = arith.constant 0 : index
    %c0_32 = arith.constant 0 : index
    %18 = vector.load %arg16[%c0_31, %c0_32] : memref<8x8xf32, #tpu.memory_space<vmem>>, vector<8x8xf32>
    %c0_33 = arith.constant 0 : index
    %c0_34 = arith.constant 0 : index
    %19 = vector.load %arg17[%c0_33, %c0_34] : memref<1x8xf32, #tpu.memory_space<vmem>>, vector<1x8xf32>
    %c0_35 = arith.constant 0 : index
    %c0_36 = arith.constant 0 : index
    %20 = vector.load %arg18[%c0_35, %c0_36] : memref<1024x32xf32, #tpu.memory_space<vmem>>, vector<1024x32xf32>
    %c0_37 = arith.constant 0 : index
    %c0_38 = arith.constant 0 : index
    %21 = vector.load %arg19[%c0_37, %c0_38] : memref<16x32xf32, #tpu.memory_space<vmem>>, vector<16x32xf32>
    %c0_39 = arith.constant 0 : index
    %c0_40 = arith.constant 0 : index
    %22 = vector.load %arg20[%c0_39, %c0_40] : memref<64x32xf32, #tpu.memory_space<vmem>>, vector<64x32xf32>
    %c0_41 = arith.constant 0 : index
    %c0_42 = arith.constant 0 : index
    %23 = vector.load %arg21[%c0_41, %c0_42] : memref<64x64xf32, #tpu.memory_space<vmem>>, vector<64x64xf32>
    %c0_43 = arith.constant 0 : index
    %c0_44 = arith.constant 0 : index
    %24 = vector.load %arg22[%c0_43, %c0_44] : memref<1x64xf32, #tpu.memory_space<vmem>>, vector<1x64xf32>
    %c0_45 = arith.constant 0 : index
    %c0_46 = arith.constant 0 : index
    %25 = vector.load %arg23[%c0_45, %c0_46] : memref<64x8xf32, #tpu.memory_space<vmem>>, vector<64x8xf32>
    %c0_47 = arith.constant 0 : index
    %c0_48 = arith.constant 0 : index
    %26 = vector.load %arg24[%c0_47, %c0_48] : memref<1x8xf32, #tpu.memory_space<vmem>>, vector<1x8xf32>
    %c0_49 = arith.constant 0 : index
    %c0_50 = arith.constant 0 : index
    %27 = vector.load %arg25[%c0_49, %c0_50] : memref<8x8xf32, #tpu.memory_space<vmem>>, vector<8x8xf32>
    %c0_51 = arith.constant 0 : index
    %c0_52 = arith.constant 0 : index
    %28 = vector.load %arg26[%c0_51, %c0_52] : memref<1x8xf32, #tpu.memory_space<vmem>>, vector<1x8xf32>
    %c0_53 = arith.constant 0 : index
    %c0_54 = arith.constant 0 : index
    %29 = memref.load %arg8[%c0_53, %c0_54] : memref<2x2xf32, #tpu.memory_space<smem>>
    %c0_55 = arith.constant 0 : index
    %c1 = arith.constant 1 : index
    %30 = memref.load %arg8[%c0_55, %c1] : memref<2x2xf32, #tpu.memory_space<smem>>
    %c1_56 = arith.constant 1 : index
    %c0_57 = arith.constant 0 : index
    %31 = memref.load %arg8[%c1_56, %c0_57] : memref<2x2xf32, #tpu.memory_space<smem>>
    %c1_58 = arith.constant 1 : index
    %c1_59 = arith.constant 1 : index
    %32 = memref.load %arg8[%c1_58, %c1_59] : memref<2x2xf32, #tpu.memory_space<smem>>
    %33 = tpu.concatenate %4, %7 in 2 : vector<1x16x32xf32>, vector<1x16x32xf32> -> vector<1x16x64xf32>
    %34 = vector.shape_cast %8 : vector<16x16xf32> to vector<1x16x16xf32>
    %35 = vector.shape_cast %9 : vector<16x16xf32> to vector<1x16x16xf32>
    "tpu.trace_start"() <{level = 10 : i32, message = "bnm,bmc->bnc"}> : () -> ()
    %cst = arith.constant dense<0.000000e+00> : vector<1x16x64xf32>
    %36 = tpu.matmul %34, %33, %cst {dimension_numbers = #tpu.dot_dimension_numbers<[2], [1], [1], [2], [0, 0, 0, 1, 1, 2], [0], [0]>} : vector<1x16x16xf32>, vector<1x16x64xf32>, vector<1x16x64xf32> -> vector<1x16x64xf32>
    %cst_60 = arith.constant dense<0.000000e+00> : vector<1x16x64xf32>
    %37 = tpu.matmul %35, %33, %cst_60 {dimension_numbers = #tpu.dot_dimension_numbers<[2], [1], [1], [2], [0, 0, 0, 1, 1, 2], [0], [0]>} : vector<1x16x16xf32>, vector<1x16x64xf32>, vector<1x16x64xf32> -> vector<1x16x64xf32>
    "tpu.trace_stop"() : () -> ()
    %38 = vector.shape_cast %36 : vector<1x16x64xf32> to vector<16x64xf32>
    %cst_61 = arith.constant dense<0.000000e+00> : vector<16x64xf32>
    %39 = tpu.matmul %38, %14, %cst_61 {dimension_numbers = #tpu.dot_dimension_numbers<[1], [0], [0], [1], [0, 0, 1, 1], [], []>} : vector<16x64xf32>, vector<64x64xf32>, vector<16x64xf32> -> vector<16x64xf32>
    %40 = vector.broadcast %15 : vector<1x64xf32> to vector<16x64xf32>
    %41 = arith.addf %39, %40 : vector<16x64xf32>
    %42 = arith.negf %41 : vector<16x64xf32>
    %43 = math.exp %42 : vector<16x64xf32>
    %cst_62 = arith.constant 1.000000e+00 : f32
    %44 = vector.broadcast %cst_62 : f32 to vector<16x64xf32>
    %45 = arith.addf %44, %43 : vector<16x64xf32>
    %46 = arith.divf %44, %45 : vector<16x64xf32>
    %cst_63 = arith.constant dense<0.000000e+00> : vector<16x8xf32>
    %47 = tpu.matmul %46, %16, %cst_63 {dimension_numbers = #tpu.dot_dimension_numbers<[1], [0], [0], [1], [0, 0, 1, 1], [], []>} : vector<16x64xf32>, vector<64x8xf32>, vector<16x8xf32> -> vector<16x8xf32>
    %48 = vector.broadcast %17 : vector<1x8xf32> to vector<16x8xf32>
    %49 = arith.addf %47, %48 : vector<16x8xf32>
    %50 = arith.negf %49 : vector<16x8xf32>
    %51 = math.exp %50 : vector<16x8xf32>
    %cst_64 = arith.constant 1.000000e+00 : f32
    %52 = vector.broadcast %cst_64 : f32 to vector<16x8xf32>
    %53 = arith.addf %52, %51 : vector<16x8xf32>
    %54 = arith.divf %52, %53 : vector<16x8xf32>
    %cst_65 = arith.constant dense<0.000000e+00> : vector<16x8xf32>
    %55 = tpu.matmul %54, %18, %cst_65 {dimension_numbers = #tpu.dot_dimension_numbers<[1], [0], [0], [1], [0, 0, 1, 1], [], []>} : vector<16x8xf32>, vector<8x8xf32>, vector<16x8xf32> -> vector<16x8xf32>
    %56 = vector.broadcast %19 : vector<1x8xf32> to vector<16x8xf32>
    %57 = arith.addf %55, %56 : vector<16x8xf32>
    %58 = vector.shape_cast %57 : vector<16x8xf32> to vector<1x16x8xf32>
    %cst_66 = arith.constant 3.000000e+00 : f32
    %59 = vector.broadcast %cst_66 : f32 to vector<1x16x8xf32>
    %60 = arith.mulf %59, %6 : vector<1x16x8xf32>
    %61 = arith.mulf %60, %58 : vector<1x16x8xf32>
    %62 = math.tanh %61 : vector<1x16x8xf32>
    "tpu.trace_start"() <{level = 10 : i32, message = "bne,bme->bnm"}> : () -> ()
    %cst_67 = arith.constant dense<0.000000e+00> : vector<1x16x16xf32>
    %63 = tpu.matmul %62, %62, %cst_67 {dimension_numbers = #tpu.dot_dimension_numbers<[2], [2], [1], [1], [0, 0, 0, 1, 1, 1], [0], [0]>} : vector<1x16x8xf32>, vector<1x16x8xf32>, vector<1x16x16xf32> -> vector<1x16x16xf32>
    "tpu.trace_stop"() : () -> ()
    %cst_68 = arith.constant 3.000000e+00 : f32
    %64 = vector.broadcast %cst_68 : f32 to vector<1x16x16xf32>
    %65 = arith.mulf %64, %63 : vector<1x16x16xf32>
    %66 = math.tanh %65 : vector<1x16x16xf32>
    %cst_69 = arith.constant 0.000000e+00 : f32
    %67 = vector.broadcast %cst_69 : f32 to vector<1x16x16xf32>
    %68 = arith.maximumf %66, %67 : vector<1x16x16xf32>
    %69 = tpu.concatenate %33, %37 in 2 : vector<1x16x64xf32>, vector<1x16x64xf32> -> vector<1x16x128xf32>
    %70 = tpu.concatenate %69, %69, %69, %69, %69, %69, %69, %69 in 2 : vector<1x16x128xf32>, vector<1x16x128xf32>, vector<1x16x128xf32>, vector<1x16x128xf32>, vector<1x16x128xf32>, vector<1x16x128xf32>, vector<1x16x128xf32>, vector<1x16x128xf32> -> vector<1x16x1024xf32>
    %71 = vector.shape_cast %10 : vector<16x1024xf32> to vector<1x16x1024xf32>
    %72 = arith.mulf %70, %71 : vector<1x16x1024xf32>
    %73 = vector.shape_cast %72 : vector<1x16x1024xf32> to vector<16x1024xf32>
    %cst_70 = arith.constant dense<0.000000e+00> : vector<16x64xf32>
    %74 = tpu.matmul %73, %11, %cst_70 {dimension_numbers = #tpu.dot_dimension_numbers<[1], [0], [0], [1], [0, 0, 1, 1], [], []>} : vector<16x1024xf32>, vector<1024x64xf32>, vector<16x64xf32> -> vector<16x64xf32>
    %75 = vector.shape_cast %74 : vector<16x64xf32> to vector<1x16x64xf32>
    %76 = vector.shape_cast %12 : vector<16x64xf32> to vector<1x16x64xf32>
    %77 = arith.addf %75, %76 : vector<1x16x64xf32>
    "tpu.trace_start"() <{level = 10 : i32, message = "bnm,bmi->bni"}> : () -> ()
    %cst_71 = arith.constant dense<0.000000e+00> : vector<1x16x64xf32>
    %78 = tpu.matmul %68, %33, %cst_71 {dimension_numbers = #tpu.dot_dimension_numbers<[2], [1], [1], [2], [0, 0, 0, 1, 1, 2], [0], [0]>} : vector<1x16x16xf32>, vector<1x16x64xf32>, vector<1x16x64xf32> -> vector<1x16x64xf32>
    "tpu.trace_stop"() : () -> ()
    %79 = vector.shape_cast %78 : vector<1x16x64xf32> to vector<16x64xf32>
    %cst_72 = arith.constant dense<0.000000e+00> : vector<16x64xf32>
    %80 = tpu.matmul %79, %13, %cst_72 {dimension_numbers = #tpu.dot_dimension_numbers<[1], [0], [0], [1], [0, 0, 1, 1], [], []>} : vector<16x64xf32>, vector<64x64xf32>, vector<16x64xf32> -> vector<16x64xf32>
    %81 = vector.shape_cast %80 : vector<16x64xf32> to vector<1x16x64xf32>
    %82 = vector.broadcast %29 : f32 to vector<1x16x64xf32>
    %83 = arith.mulf %82, %77 : vector<1x16x64xf32>
    %84 = vector.broadcast %30 : f32 to vector<1x16x64xf32>
    %85 = arith.mulf %84, %81 : vector<1x16x64xf32>
    %86 = arith.addf %83, %85 : vector<1x16x64xf32>
    %87 = arith.negf %86 : vector<1x16x64xf32>
    %88 = math.exp %87 : vector<1x16x64xf32>
    %cst_73 = arith.constant 1.000000e+00 : f32
    %89 = vector.broadcast %cst_73 : f32 to vector<1x16x64xf32>
    %90 = arith.addf %89, %88 : vector<1x16x64xf32>
    %91 = arith.divf %89, %90 : vector<1x16x64xf32>
    %92 = vector.extract_strided_slice %91 {offsets = [0, 0, 0], sizes = [1, 16, 32], strides = [1, 1, 1]} : vector<1x16x64xf32> to vector<1x16x32xf32>
    %93 = vector.extract_strided_slice %91 {offsets = [0, 0, 32], sizes = [1, 16, 32], strides = [1, 1, 1]} : vector<1x16x64xf32> to vector<1x16x32xf32>
    %94 = arith.mulf %92, %7 : vector<1x16x32xf32>
    %95 = tpu.concatenate %4, %94 in 2 : vector<1x16x32xf32>, vector<1x16x32xf32> -> vector<1x16x64xf32>
    %96 = vector.shape_cast %8 : vector<16x16xf32> to vector<1x16x16xf32>
    %97 = vector.shape_cast %9 : vector<16x16xf32> to vector<1x16x16xf32>
    "tpu.trace_start"() <{level = 10 : i32, message = "bnm,bmc->bnc"}> : () -> ()
    %cst_74 = arith.constant dense<0.000000e+00> : vector<1x16x64xf32>
    %98 = tpu.matmul %96, %95, %cst_74 {dimension_numbers = #tpu.dot_dimension_numbers<[2], [1], [1], [2], [0, 0, 0, 1, 1, 2], [0], [0]>} : vector<1x16x16xf32>, vector<1x16x64xf32>, vector<1x16x64xf32> -> vector<1x16x64xf32>
    %cst_75 = arith.constant dense<0.000000e+00> : vector<1x16x64xf32>
    %99 = tpu.matmul %97, %95, %cst_75 {dimension_numbers = #tpu.dot_dimension_numbers<[2], [1], [1], [2], [0, 0, 0, 1, 1, 2], [0], [0]>} : vector<1x16x16xf32>, vector<1x16x64xf32>, vector<1x16x64xf32> -> vector<1x16x64xf32>
    "tpu.trace_stop"() : () -> ()
    %100 = vector.shape_cast %98 : vector<1x16x64xf32> to vector<16x64xf32>
    %cst_76 = arith.constant dense<0.000000e+00> : vector<16x64xf32>
    %101 = tpu.matmul %100, %23, %cst_76 {dimension_numbers = #tpu.dot_dimension_numbers<[1], [0], [0], [1], [0, 0, 1, 1], [], []>} : vector<16x64xf32>, vector<64x64xf32>, vector<16x64xf32> -> vector<16x64xf32>
    %102 = vector.broadcast %24 : vector<1x64xf32> to vector<16x64xf32>
    %103 = arith.addf %101, %102 : vector<16x64xf32>
    %104 = arith.negf %103 : vector<16x64xf32>
    %105 = math.exp %104 : vector<16x64xf32>
    %cst_77 = arith.constant 1.000000e+00 : f32
    %106 = vector.broadcast %cst_77 : f32 to vector<16x64xf32>
    %107 = arith.addf %106, %105 : vector<16x64xf32>
    %108 = arith.divf %106, %107 : vector<16x64xf32>
    %cst_78 = arith.constant dense<0.000000e+00> : vector<16x8xf32>
    %109 = tpu.matmul %108, %25, %cst_78 {dimension_numbers = #tpu.dot_dimension_numbers<[1], [0], [0], [1], [0, 0, 1, 1], [], []>} : vector<16x64xf32>, vector<64x8xf32>, vector<16x8xf32> -> vector<16x8xf32>
    %110 = vector.broadcast %26 : vector<1x8xf32> to vector<16x8xf32>
    %111 = arith.addf %109, %110 : vector<16x8xf32>
    %112 = arith.negf %111 : vector<16x8xf32>
    %113 = math.exp %112 : vector<16x8xf32>
    %cst_79 = arith.constant 1.000000e+00 : f32
    %114 = vector.broadcast %cst_79 : f32 to vector<16x8xf32>
    %115 = arith.addf %114, %113 : vector<16x8xf32>
    %116 = arith.divf %114, %115 : vector<16x8xf32>
    %cst_80 = arith.constant dense<0.000000e+00> : vector<16x8xf32>
    %117 = tpu.matmul %116, %27, %cst_80 {dimension_numbers = #tpu.dot_dimension_numbers<[1], [0], [0], [1], [0, 0, 1, 1], [], []>} : vector<16x8xf32>, vector<8x8xf32>, vector<16x8xf32> -> vector<16x8xf32>
    %118 = vector.broadcast %28 : vector<1x8xf32> to vector<16x8xf32>
    %119 = arith.addf %117, %118 : vector<16x8xf32>
    %120 = vector.shape_cast %119 : vector<16x8xf32> to vector<1x16x8xf32>
    %cst_81 = arith.constant 3.000000e+00 : f32
    %121 = vector.broadcast %cst_81 : f32 to vector<1x16x8xf32>
    %122 = arith.mulf %121, %6 : vector<1x16x8xf32>
    %123 = arith.mulf %122, %120 : vector<1x16x8xf32>
    %124 = math.tanh %123 : vector<1x16x8xf32>
    "tpu.trace_start"() <{level = 10 : i32, message = "bne,bme->bnm"}> : () -> ()
    %cst_82 = arith.constant dense<0.000000e+00> : vector<1x16x16xf32>
    %125 = tpu.matmul %124, %124, %cst_82 {dimension_numbers = #tpu.dot_dimension_numbers<[2], [2], [1], [1], [0, 0, 0, 1, 1, 1], [0], [0]>} : vector<1x16x8xf32>, vector<1x16x8xf32>, vector<1x16x16xf32> -> vector<1x16x16xf32>
    "tpu.trace_stop"() : () -> ()
    %cst_83 = arith.constant 3.000000e+00 : f32
    %126 = vector.broadcast %cst_83 : f32 to vector<1x16x16xf32>
    %127 = arith.mulf %126, %125 : vector<1x16x16xf32>
    %128 = math.tanh %127 : vector<1x16x16xf32>
    %cst_84 = arith.constant 0.000000e+00 : f32
    %129 = vector.broadcast %cst_84 : f32 to vector<1x16x16xf32>
    %130 = arith.maximumf %128, %129 : vector<1x16x16xf32>
    %131 = tpu.concatenate %95, %99 in 2 : vector<1x16x64xf32>, vector<1x16x64xf32> -> vector<1x16x128xf32>
    %132 = tpu.concatenate %131, %131, %131, %131, %131, %131, %131, %131 in 2 : vector<1x16x128xf32>, vector<1x16x128xf32>, vector<1x16x128xf32>, vector<1x16x128xf32>, vector<1x16x128xf32>, vector<1x16x128xf32>, vector<1x16x128xf32>, vector<1x16x128xf32> -> vector<1x16x1024xf32>
    %133 = vector.shape_cast %10 : vector<16x1024xf32> to vector<1x16x1024xf32>
    %134 = arith.mulf %132, %133 : vector<1x16x1024xf32>
    %135 = vector.shape_cast %134 : vector<1x16x1024xf32> to vector<16x1024xf32>
    %cst_85 = arith.constant dense<0.000000e+00> : vector<16x32xf32>
    %136 = tpu.matmul %135, %20, %cst_85 {dimension_numbers = #tpu.dot_dimension_numbers<[1], [0], [0], [1], [0, 0, 1, 1], [], []>} : vector<16x1024xf32>, vector<1024x32xf32>, vector<16x32xf32> -> vector<16x32xf32>
    %137 = vector.shape_cast %136 : vector<16x32xf32> to vector<1x16x32xf32>
    %138 = vector.shape_cast %21 : vector<16x32xf32> to vector<1x16x32xf32>
    %139 = arith.addf %137, %138 : vector<1x16x32xf32>
    "tpu.trace_start"() <{level = 10 : i32, message = "bnm,bmi->bni"}> : () -> ()
    %cst_86 = arith.constant dense<0.000000e+00> : vector<1x16x64xf32>
    %140 = tpu.matmul %130, %95, %cst_86 {dimension_numbers = #tpu.dot_dimension_numbers<[2], [1], [1], [2], [0, 0, 0, 1, 1, 2], [0], [0]>} : vector<1x16x16xf32>, vector<1x16x64xf32>, vector<1x16x64xf32> -> vector<1x16x64xf32>
    "tpu.trace_stop"() : () -> ()
    %141 = vector.shape_cast %140 : vector<1x16x64xf32> to vector<16x64xf32>
    %cst_87 = arith.constant dense<0.000000e+00> : vector<16x32xf32>
    %142 = tpu.matmul %141, %22, %cst_87 {dimension_numbers = #tpu.dot_dimension_numbers<[1], [0], [0], [1], [0, 0, 1, 1], [], []>} : vector<16x64xf32>, vector<64x32xf32>, vector<16x32xf32> -> vector<16x32xf32>
    %143 = vector.shape_cast %142 : vector<16x32xf32> to vector<1x16x32xf32>
    %144 = vector.broadcast %31 : f32 to vector<1x16x32xf32>
    %145 = arith.mulf %144, %139 : vector<1x16x32xf32>
    %146 = vector.broadcast %32 : f32 to vector<1x16x32xf32>
    %147 = arith.mulf %146, %143 : vector<1x16x32xf32>
    %148 = arith.addf %145, %147 : vector<1x16x32xf32>
    %149 = math.tanh %148 : vector<1x16x32xf32>
    %150 = arith.mulf %93, %7 : vector<1x16x32xf32>
    %cst_88 = arith.constant 1.000000e+00 : f32
    %151 = vector.broadcast %cst_88 : f32 to vector<1x16x32xf32>
    %152 = arith.subf %151, %93 : vector<1x16x32xf32>
    %153 = arith.mulf %152, %149 : vector<1x16x32xf32>
    %154 = arith.addf %150, %153 : vector<1x16x32xf32>
    %c0_89 = arith.constant 0 : index
    %c0_90 = arith.constant 0 : index
    %c0_91 = arith.constant 0 : index
    %155 = vector.load %arg28[%c0_89, %c0_90, %c0_91] : memref<1x16x32xf32, #tpu.memory_space<vmem>>, vector<1x16x32xf32>
    tpu.vector_store %arg28[%c0_89, %c0_90, %c0_91], %154 {strides = array<i32>} : memref<1x16x32xf32, #tpu.memory_space<vmem>>, vector<1x16x32xf32>,
    %c0_92 = arith.constant 0 : index
    %c0_93 = arith.constant 0 : index
    %c0_94 = arith.constant 0 : index
    %c0_95 = arith.constant 0 : index
    %156 = vector.load %arg27[%c0_92, %c0_93, %c0_94, %c0_95] : memref<1x1x16x32xf32, #tpu.memory_space<vmem>>, vector<1x1x16x32xf32>
    %157 = vector.shape_cast %156 : vector<1x1x16x32xf32> to vector<1x16x32xf32>
    %158 = vector.shape_cast %154 : vector<1x16x32xf32> to vector<1x1x16x32xf32>
    tpu.vector_store %arg27[%c0_92, %c0_93, %c0_94, %c0_95], %158 {strides = array<i32>} : memref<1x1x16x32xf32, #tpu.memory_space<vmem>>, vector<1x1x16x32xf32>,
    return
  }
  func.func @transform_0(%arg0: i32, %arg1: i32) -> (i32, i32, i32, i32) {
    %c0_i32 = arith.constant 0 : i32
    %c0_i32_0 = arith.constant 0 : i32
    %c0_i32_1 = arith.constant 0 : i32
    return %arg1, %arg0, %c0_i32, %c0_i32_0 : i32, i32, i32, i32
  }
  func.func @transform_1(%arg0: i32, %arg1: i32) -> (i32, i32, i32, i32) {
    %c0_i32 = arith.constant 0 : i32
    %c0_i32_0 = arith.constant 0 : i32
    %c0_i32_1 = arith.constant 0 : i32
    return %arg1, %arg0, %c0_i32, %c0_i32_0 : i32, i32, i32, i32
  }
  func.func @transform_2(%arg0: i32, %arg1: i32) -> (i32, i32, i32) {
    %c0_i32 = arith.constant 0 : i32
    %c0_i32_0 = arith.constant 0 : i32
    %c0_i32_1 = arith.constant 0 : i32
    return %arg0, %c0_i32, %c0_i32_0 : i32, i32, i32
  }
  func.func @transform_3(%arg0: i32, %arg1: i32) -> (i32, i32) {
    %c0_i32 = arith.constant 0 : i32
    %c0_i32_0 = arith.constant 0 : i32
    %c0_i32_1 = arith.constant 0 : i32
    return %c0_i32, %c0_i32_0 : i32, i32
  }
  func.func @transform_4(%arg0: i32, %arg1: i32) -> (i32, i32) {
    %c0_i32 = arith.constant 0 : i32
    %c0_i32_0 = arith.constant 0 : i32
    %c0_i32_1 = arith.constant 0 : i32
    return %c0_i32, %c0_i32_0 : i32, i32
  }
  func.func @transform_5(%arg0: i32, %arg1: i32) -> (i32, i32) {
    %c0_i32 = arith.constant 0 : i32
    %c0_i32_0 = arith.constant 0 : i32
    %c0_i32_1 = arith.constant 0 : i32
    return %c0_i32, %c0_i32_0 : i32, i32
  }
  func.func @transform_6(%arg0: i32, %arg1: i32) -> (i32, i32) {
    %c0_i32 = arith.constant 0 : i32
    %c0_i32_0 = arith.constant 0 : i32
    %c0_i32_1 = arith.constant 0 : i32
    return %c0_i32, %c0_i32_0 : i32, i32
  }
  func.func @transform_7(%arg0: i32, %arg1: i32) -> (i32, i32) {
    %c0_i32 = arith.constant 0 : i32
    %c0_i32_0 = arith.constant 0 : i32
    %c0_i32_1 = arith.constant 0 : i32
    return %c0_i32, %c0_i32_0 : i32, i32
  }
  func.func @transform_8(%arg0: i32, %arg1: i32) -> (i32, i32) {
    %c0_i32 = arith.constant 0 : i32
    %c0_i32_0 = arith.constant 0 : i32
    %c0_i32_1 = arith.constant 0 : i32
    return %c0_i32, %c0_i32_0 : i32, i32
  }
  func.func @transform_9(%arg0: i32, %arg1: i32) -> (i32, i32) {
    %c0_i32 = arith.constant 0 : i32
    %c0_i32_0 = arith.constant 0 : i32
    %c0_i32_1 = arith.constant 0 : i32
    return %c0_i32, %c0_i32_0 : i32, i32
  }
  func.func @transform_10(%arg0: i32, %arg1: i32) -> (i32, i32) {
    %c0_i32 = arith.constant 0 : i32
    %c0_i32_0 = arith.constant 0 : i32
    %c0_i32_1 = arith.constant 0 : i32
    return %c0_i32, %c0_i32_0 : i32, i32
  }
  func.func @transform_11(%arg0: i32, %arg1: i32) -> (i32, i32) {
    %c0_i32 = arith.constant 0 : i32
    %c0_i32_0 = arith.constant 0 : i32
    %c0_i32_1 = arith.constant 0 : i32
    return %c0_i32, %c0_i32_0 : i32, i32
  }
  func.func @transform_12(%arg0: i32, %arg1: i32) -> (i32, i32) {
    %c0_i32 = arith.constant 0 : i32
    %c0_i32_0 = arith.constant 0 : i32
    %c0_i32_1 = arith.constant 0 : i32
    return %c0_i32, %c0_i32_0 : i32, i32
  }
  func.func @transform_13(%arg0: i32, %arg1: i32) -> (i32, i32) {
    %c0_i32 = arith.constant 0 : i32
    %c0_i32_0 = arith.constant 0 : i32
    %c0_i32_1 = arith.constant 0 : i32
    return %c0_i32, %c0_i32_0 : i32, i32
  }
  func.func @transform_14(%arg0: i32, %arg1: i32) -> (i32, i32) {
    %c0_i32 = arith.constant 0 : i32
    %c0_i32_0 = arith.constant 0 : i32
    %c0_i32_1 = arith.constant 0 : i32
    return %c0_i32, %c0_i32_0 : i32, i32
  }
  func.func @transform_15(%arg0: i32, %arg1: i32) -> (i32, i32) {
    %c0_i32 = arith.constant 0 : i32
    %c0_i32_0 = arith.constant 0 : i32
    %c0_i32_1 = arith.constant 0 : i32
    return %c0_i32, %c0_i32_0 : i32, i32
  }
  func.func @transform_16(%arg0: i32, %arg1: i32) -> (i32, i32) {
    %c0_i32 = arith.constant 0 : i32
    %c0_i32_0 = arith.constant 0 : i32
    %c0_i32_1 = arith.constant 0 : i32
    return %c0_i32, %c0_i32_0 : i32, i32
  }
  func.func @transform_17(%arg0: i32, %arg1: i32) -> (i32, i32) {
    %c0_i32 = arith.constant 0 : i32
    %c0_i32_0 = arith.constant 0 : i32
    %c0_i32_1 = arith.constant 0 : i32
    return %c0_i32, %c0_i32_0 : i32, i32
  }
  func.func @transform_18(%arg0: i32, %arg1: i32) -> (i32, i32) {
    %c0_i32 = arith.constant 0 : i32
    %c0_i32_0 = arith.constant 0 : i32
    %c0_i32_1 = arith.constant 0 : i32
    return %c0_i32, %c0_i32_0 : i32, i32
  }
  func.func @transform_19(%arg0: i32, %arg1: i32) -> (i32, i32) {
    %c0_i32 = arith.constant 0 : i32
    %c0_i32_0 = arith.constant 0 : i32
    %c0_i32_1 = arith.constant 0 : i32
    return %c0_i32, %c0_i32_0 : i32, i32
  }
  func.func @transform_20(%arg0: i32, %arg1: i32) -> (i32, i32) {
    %c0_i32 = arith.constant 0 : i32
    %c0_i32_0 = arith.constant 0 : i32
    %c0_i32_1 = arith.constant 0 : i32
    return %c0_i32, %c0_i32_0 : i32, i32
  }
  func.func @transform_21(%arg0: i32, %arg1: i32) -> (i32, i32) {
    %c0_i32 = arith.constant 0 : i32
    %c0_i32_0 = arith.constant 0 : i32
    %c0_i32_1 = arith.constant 0 : i32
    return %c0_i32, %c0_i32_0 : i32, i32
  }
  func.func @transform_22(%arg0: i32, %arg1: i32) -> (i32, i32) {
    %c0_i32 = arith.constant 0 : i32
    %c0_i32_0 = arith.constant 0 : i32
    %c0_i32_1 = arith.constant 0 : i32
    return %c0_i32, %c0_i32_0 : i32, i32
  }
  func.func @transform_23(%arg0: i32, %arg1: i32) -> (i32, i32) {
    %c0_i32 = arith.constant 0 : i32
    %c0_i32_0 = arith.constant 0 : i32
    %c0_i32_1 = arith.constant 0 : i32
    return %c0_i32, %c0_i32_0 : i32, i32
  }
  func.func @transform_24(%arg0: i32, %arg1: i32) -> (i32, i32) {
    %c0_i32 = arith.constant 0 : i32
    %c0_i32_0 = arith.constant 0 : i32
    %c0_i32_1 = arith.constant 0 : i32
    return %c0_i32, %c0_i32_0 : i32, i32
  }
  func.func @transform_25(%arg0: i32, %arg1: i32) -> (i32, i32, i32, i32) {
    %c0_i32 = arith.constant 0 : i32
    %c0_i32_0 = arith.constant 0 : i32
    %c0_i32_1 = arith.constant 0 : i32
    return %arg1, %arg0, %c0_i32, %c0_i32_0 : i32, i32, i32, i32
  }
}

</mosaic_0001>

<bundles_post_ra>
// kernel: adcrnn_encoder_forward.2
= control target key start
LH: loop header
LB: loop body
LE: loop exit
PB: predicated region body
PF: predicated region fallthrough
CT: control target
= control target key end

     0   :  { %s5422_s0 = inlined_call_operand.vmem [shape: f32[4,2,16,2], index: 0, kind: input, shape index: {}]   ;;  %s5423_s1 = inlined_call_operand.vmem [shape: f32[4,2,16,8], index: 1, kind: input, shape index: {}]   ;;  %s5424_s2 = inlined_call_operand.vmem [shape: f32[2,16,32], index: 2, kind: input, shape index: {}]   ;;  %s5425_s3 = inlined_call_operand.vmem [shape: f32[16,16], index: 3, kind: input, shape index: {}]   ;;  %s5426_s4 = inlined_call_operand.vmem [shape: f32[16,16], index: 4, kind: input, shape index: {}]   ;;  %s5427_s5 = inlined_call_operand.vmem [shape: f32[16,544], index: 5, kind: input, shape index: {}]   ;;  %s5428_s6 = inlined_call_operand.vmem [shape: f32[2,2], index: 6, kind: input, shape index: {}]   ;;  %s5429_s7 = inlined_call_operand.vmem [shape: f32[544,64], index: 7, kind: input, shape index: {}]   ;;  %s5430_s8 = inlined_call_operand.vmem [shape: f32[16,64], index: 8, kind: input, shape index: {}]   ;;  %s5431_s9 = inlined_call_operand.vmem [shape: f32[34,64], index: 9, kind: input, shape index: {}]   ;;  %s5432_s10 = inlined_call_operand.vmem [shape: f32[34,34], index: 10, kind: input, shape index: {}]   ;;  %s5433_s11 = inlined_call_operand.vmem [shape: f32[1,34], index: 11, kind: input, shape index: {}]   ;;  %s5434_s12 = inlined_call_operand.vmem [shape: f32[34,8], index: 12, kind: input, shape index: {}]   ;;  %s5435_s13 = inlined_call_operand.vmem [shape: f32[1,8], index: 13, kind: input, shape index: {}]   ;;  %s5436_s14 = inlined_call_operand.vmem [shape: f32[8,8], index: 14, kind: input, shape index: {}]   ;;  %s5437_s15 = inlined_call_operand.vmem [shape: f32[1,8], index: 15, kind: input, shape index: {}]   ;;  %s5438_s16 = inlined_call_operand.vmem [shape: f32[544,32], index: 16, kind: input, shape index: {}]   ;;  %s5439_s17 = inlined_call_operand.vmem [shape: f32[16,32], index: 17, kind: input, shape index: {}]   ;;  %s5440_s18 = inlined_call_operand.vmem [shape: f32[34,32], index: 18, kind: input, shape index: {}]   ;;  %s5441_s19 = inlined_call_operand.vmem [shape: f32[34,34], index: 19, kind: input, shape index: {}]   ;;  %s5442_s20 = inlined_call_operand.vmem [shape: f32[1,34], index: 20, kind: input, shape index: {}]   ;;  %s5443_s21 = inlined_call_operand.vmem [shape: f32[34,8], index: 21, kind: input, shape index: {}]   ;;  %s5444_s22 = inlined_call_operand.vmem [shape: f32[1,8], index: 22, kind: input, shape index: {}]   ;;  %s5445_s23 = inlined_call_operand.vmem [shape: f32[8,8], index: 23, kind: input, shape index: {}]   ;;  %s5446_s24 = inlined_call_operand.vmem [shape: f32[1,8], index: 24, kind: input, shape index: {}]   ;;  %s5447_s25 = inlined_call_operand.vmem [shape: f32[4,2,16,32], index: 25, kind: output, shape index: {}]  }
   0x1   :  { %5466 = sst [smem:[#allocation11_spill]] %s5422_s0 }
   0x2   :  { %5467 = sst [smem:[#allocation12_spill]] %s5423_s1 }
   0x3   :  { %5468 = sst [smem:[#allocation13_spill]] %s5424_s2 }
   0x4   :  { %5469 = sst [smem:[#allocation14_spill]] %s5425_s3 }
   0x5   :  { %5470 = sst [smem:[#allocation15_spill]] %s5426_s4 }
   0x6   :  { %5471 = sst [smem:[#allocation16_spill]] %s5427_s5 }
   0x7   :  { %5472 = sst [smem:[#allocation17_spill]] %s5428_s6 }
   0x8   :  { %5473 = sst [smem:[#allocation18_spill]] %s5429_s7 }
   0x9   :  { %5474 = sst [smem:[#allocation19_spill]] %s5430_s8 }
   0xa   :  { %5475 = sst [smem:[#allocation20_spill]] %s5431_s9 }
   0xb   :  { %5476 = sst [smem:[#allocation21_spill]] %s5438_s16 }
   0xc   :  { %5477 = sst [smem:[#allocation22_spill]] %s5439_s17 }
   0xd   :  { %5478 = sst [smem:[#allocation23_spill]] %s5440_s18 }
   0xe   :  { %5479 = sst [smem:[#allocation24_spill]] %s5442_s20 }
   0xf   :  { %5480 = sst [smem:[#allocation25_spill]] %s5444_s22 }
  0x10   :  { %5481 = sst [smem:[#allocation26_spill]] %s5445_s23 }
  0x11   :  { %5482 = sst [smem:[#allocation27_spill]] %s5446_s24 }
  0x12   :  { %30 = vsyncpa [#allocation4], 0  ;;  %s4396_s29 = smov 0   ;;  %s4398_s2 = smov 0  }
  0x13   :  { %s4400_s6 = smov 0   ;;  %s4402_s30 = smov 0  }
  0x14   :  { %s4404_s7 = smov 0  }
  0x15 LB: > { %5483 = sst [smem:[#allocation6_spill]] %s4244_s6  ;;  %s3348_s3 = sadd.s32 4294967295, %s4252_s7   ;;  %s4252_s7 = sphi %s4404_s7, %s36_s7   ;;  %s4248_s30 = sphi %s4402_s30, %s5521_s30   ;;  %s4244_s6 = sphi %s4400_s6, %s5520_s6   ;;  %s4240_s2 = sphi %s4398_s2, %s5519_s2   ;;  %s4236_s29 = sphi %s4396_s29, %s5518_s29  }
  0x16   : > { %5484 = sst [smem:[#allocation7_spill]] %s4248_s30  ;;  %s45_s26 = sadd.s32 1, %s4244_s6 }
  0x17   : > { %5485 = sst [smem:[#allocation8_spill]] %s4252_s7  ;;  %p46_p0 = scmp.ge.s32.totalorder %s45_s26, 4 }
  0x18   : > { %s48_s1 = sadd.s32 1, %s4248_s30  ;;  %p3350_p1 = scmp.ge.s32.totalorder %s4252_s7, 1 }
  0x19   : > { %p625_p2 = scmp.lt.s32.totalorder %s4252_s7, 9  ;;  %s5523_s26 = smov (%p46_p0, %s45_s26), 0 }
  0x1a   : > { %5486 = sst [smem:[#allocation9_spill]] %s5523_s26  ;;  %s5525_s1 = smov (!%p46_p0, %s48_s1), %s4248_s30 }
  0x1b   : > { %p4429_p3 = pnand %p3350_p1, %p625_p2  ;;  %p50_p4 = scmp.ge.s32.totalorder %s5525_s1, 2 }
  0x1c   : > { %p4433_p5 = scmp.eq.s32.totalorder %s3348_s3, 0  ;;  %s5489_s9 = sld [smem:[#allocation17_spill]] }
  0x1d   : > { %p4077_p6 = pneg %p4429_p3  ;;  %s5527_s1 = smov (%p50_p4, %s5525_s1), 0 }
  0x1e   : > { %5490 = sst [smem:[#allocation10_spill]] %s5527_s1 }
  0x1f   : > { %p4078_p7 = pnand %p4433_p5, %p4077_p6 }
  0x21   : > { %p4197_p9 = pneg %p4078_p7 }
  0x22   : > { %s647_s5 = sshll.u32 %s5489_s9, 4  ;;  %s648_s5 = int_to_ptr.vmem [resolvable:$true] %s647_s5 }
  0x23   : > { %s4195_s0 = scalar_lea.vmem %s648_s5, 32  ;;  %p4203_p12 = scmp.lt.s32.totalorder %s648_s5, %s648_s5 }
  0x24   : > { %p4196_p8 = scmp.ne.s32.totalorder %s648_s5, %s4195_s0  ;;  %p4204_p13 = scmp.lt.s32.totalorder %s4195_s0, %s4195_s0 }
  0x26   : > { %p4198_p10 = pnand %p4197_p9, %p4196_p8  ;;  %p4205_p0 = por %p4204_p13, %p4203_p12 }
  0x28   : > { %p4199_p11 = pneg %p4198_p10 }
  0x2a   : > { %p4206_p1 = pnand %p4205_p0, %p4199_p11 }
  0x2c   : > { %4209 = shalt.err (!%p4206_p1)
}
  0x2d   : > { %s4254_s3 = smov [#allocation3]   ;;  %746 = sbr.rel (%p4429_p3) target bundleno = 3786 (0xeca), region = 120 }
  0x2e   : > { %4080 = dma.vmem_to_smem (!%p4078_p7), %s648_s5, 32, %s4254_s3, [#allocation4]  }
  0x34   : > { %4231 = dma.done.wait (%p4433_p5), [#allocation4], 32  }
  0x35   : > { %4233 = vsyncadd (%p4433_p5), [#allocation4], 4294967264 }
  0x36   : > { %752 = sfence }
  0x37   : > { %p837_p2 = scmp.lt.s32.totalorder %s4236_s29, 3  ;;  %p839_p4 = scmp.lt.s32.totalorder %s4240_s2, 1 }
  0x38   : > { %s5491_s1 = sld [smem:[#allocation13_spill]]  ;;  %s5492_s7 = sld [smem:[#allocation11_spill]] }
  0x39   : > { %s838_s4 = scalar_select %p837_p2, %s4236_s29, 3 }
  0x3a   : > { %s5529_s2 = smov (!%p839_p4, %s4240_s2), 1  ;;  %s5493_s22 = sld [smem:[#allocation12_spill]] }
  0x3b   : > { %s3356_s28 = sshll.u32 %s838_s4, 2  ;;  %s3355_s9 = sshll.u32 %s5529_s2, 1 }
  0x3c   : > { %s3434_s5 = sshll.u32 %s5529_s2, 4  ;;  %s843_s8 = sadd.s32 %s3356_s28, %s3355_s9 }
  0x3d   : > { %s3357_s30 = sshll.u32 %s843_s8, 3  ;;  %p3366_p3 = scmp.ne.s32.totalorder %s4236_s29, 0 }
  0x3e   : > { %s859_s26 = scalar_lea.vmem %s5491_s1, %s3434_s5  ;;  %s845_s17 = scalar_lea.vmem %s5492_s7, %s3357_s30  ;;  %vm875_vm0 = vcmask (!%p3366_p3), 261120  }
  0x3f   : > { %s4470_s4 = scalar_lea.vmem %s5447_s25, %s3357_s30  ;;  %872 = sbr.rel (%p3366_p3) target bundleno = 70 (0x46), region = 128  ;;  %v873_v0 = vld [vmem:[%s859_s26] sm:$0xff] (!%p3366_p3)  ;;  %v874_v1 = vld [vmem:[%s859_s26 + $0x8] sm:$0xff] (!%p3366_p3) }
  0x40   : > { %s4465_s16 = scalar_lea.vmem %s5493_s22, %s3357_s30  ;;  %876 = vst.msk [vmem:[#allocation2] sm:$0xff] (!%p3366_p3), %vm875_vm0, %v873_v0  ;;  %877 = vst.msk [vmem:[#allocation2 + $0x8] sm:$0xff] (!%p3366_p3), %vm875_vm0, %v874_v1 }
  0x46 PF: > { %vm1091_vm1 = vcmask 130048   ;;  %s4255_s18 = smov 2   ;;  %s5494_s23 = sld [smem:[#allocation14_spill]]  ;;  %vm1088_vm2 = vcmask 15360   ;;  %v4495_v7 = vld [vmem:[%s845_s17] sm:$0xff]  ;;  %v4497_v8 = vld [vmem:[%s845_s17 + $0x8] sm:$0xff] }
  0x47   : > { %v4473_v2 = vld [vmem:[#allocation2] sm:$0xff]  ;;  %s5495_s2 = sld [smem:[#allocation15_spill]]  ;;  %v4487_v5 = vld [vmem:[#allocation2 + $0x8] sm:$0xff]  ;;  %v975_v16 = vld [vmem:[%s5432_s10 + $0x10] sm:$0xff]  ;;  %vm1267_vm3 = vcmask 1041408   ;;  %vm1260_vm4 = vcmask 277504  }
  0x48   : > { %1082 = vrot.lane.b32.xlu0 %v4473_v2, %s4255_s18  ;;  %v973_v9 = vld [vmem:[%s5432_s10] sm:$0xff]  ;;  %v974_v10 = vld [vmem:[%s5432_s10 + $0x8] sm:$0xff]  ;;  %v976_v17 = vld [vmem:[%s5432_s10 + $0x18] sm:$0xff]  ;;  %s4256_s24 = smov 34   ;;  %s4257_s8 = smov 8   ;;  %vm1466_vm5 = vcmask 64512  }
  0x49   : > { %v3853_v15 = vpack.c.bf16 %v974_v10, %v973_v9  ;;  %v3857_v20 = vpack.c.bf16 %v976_v17, %v975_v16  ;;  %v977_v21 = vld [vmem:[%s5432_s10 + $0x20] sm:$0x3]  ;;  %v980_v27 = vld [vmem:[%s5434_s12 + $0x8] sm:$0xff]  ;;  %v981_v29 = vld [vmem:[%s5434_s12 + $0x10] sm:$0xff]  ;;  %s4258_s0 = smov 68   ;;  %s4259_s3 = smov 76  }
  0x4a   : > { %v979_v26 = vld [vmem:[%s5434_s12] sm:$0xff]  ;;  %v982_v30 = vld [vmem:[%s5434_s12 + $0x18] sm:$0xff]  ;;  %s4260_s27 = smov 92   ;;  %s5462_s22 = smov 84   ;;  %vm1700_vm6 = vcmask 621568   ;;  %vm1695_vm7 = vcmask 556032   ;;  %vm4796_vm9 = vmpackc.low %vm1466_vm5, %vm1466_vm5 }
  0x4b   : > { %v3861_v28 = vpack.c.bf16 %v980_v27, %v979_v26  ;;  %v3865_v31 = vpack.c.bf16 %v982_v30, %v981_v29  ;;  %v983_v32 = vld [vmem:[%s5434_s12 + $0x20] sm:$0x3]  ;;  %s5464_s20 = smov 24   ;;  %s5460_s29 = smov 16   ;;  %vm1724_vm8 = vcmask 261120   ;;  %vm1708_vm10 = vcmask 195584  }
  0x4c   : > { %v4480_v3 = vld [vmem:[%s5494_s23] sm:$0xff]  ;;  %1084 = vrot.lane.b32.xlu0 %v4487_v5, %s4255_s18  ;;  %v4524_v18 = vld [vmem:[%s5494_s23 + $0x8] sm:$0xff]  ;;  %s5497_s28 = sld [smem:[#allocation18_spill]]  ;;  %vm1711_vm11 = vcmask 752640   ;;  %vm1705_vm12 = vcmask 687104   ;;  %s5501_s6 = sld [smem:[#allocation20_spill]] }
  0x4d   : > { %s5496_s1 = smov %s5495_s2  ;;  %v4485_v4 = vld [vmem:[%s5495_s2] sm:$0xff]  ;;  %3683 = vmatprep.mubr.msk.f32.mxu0 %vm1091_vm1, %v4480_v3  ;;  %s3367_s2 = sld [smem:[#allocation3 + $0x1]] }
  0x4e   : > { %3690 = vmatprep.mubr.msk.f32.mxu1 %vm1091_vm1, %v4485_v4  ;;  %v4529_v19 = vld [vmem:[%s5496_s1 + $0x8] sm:$0xff]  ;;  %v3374_v37 = vld [vmem:[%s5433_s11] ss:$0 sm:$0xff]  ;;  %s5507_s9 = sld [smem:[#allocation24_spill]]  ;;  %s5509_s30 = sld [smem:[#allocation21_spill]] }
  0x4f   : > { %v985_v50 = vld [vmem:[%s5436_s14] sm:$0xff]  ;;  %s5515_s7 = sld [smem:[#allocation22_spill]] }
  0x50   : > { %v3380_v54 = vld [vmem:[%s5435_s13] ss:$0 sm:$0xff] }
  0x52   : > { %v914_v51 = vld [vmem:[%s5497_s28 + $0x80] sm:$0xff]  ;;  %v915_v52 = vld [vmem:[%s5497_s28 + $0x88] sm:$0xff]  ;;  %s5502_s26 = smov %s5501_s6 }
  0x53   : > { %v3875_v53 = vpack.c.bf16 %v915_v52, %v914_v51  ;;  %v898_v10 = vld [vmem:[%s5497_s28] sm:$0xff]  ;;  %v908_v51 = vld [vmem:[%s5497_s28 + $0x50] sm:$0xff]  ;;  %v909_v52 = vld [vmem:[%s5497_s28 + $0x58] sm:$0xff] }
  0x54   : > { %v918_v27 = vld [vmem:[%s5497_s28 + $0xa0] sm:$0xff]  ;;  %s5510_s17 = smov %s5509_s30 }
  0xba   : > { %v1083_v6 = vpop.permute.xlu0 %1082 }
  0xbb   : > { %v1089_v12 = vsel %vm1088_vm2, %v4495_v7, %v1083_v6 }
  0xbe   : > { %v1085_v11 = vpop.permute.xlu0 %1084 }
  0xbf   : > { %v1090_v13 = vsel %vm1088_vm2, %v4497_v8, %v1085_v11  ;;  %v899_v11 = vld [vmem:[%s5497_s28 + $0x8] sm:$0xff] }
  0xc0   : > { %v4509_v14 = vpack.c.bf16 %v1090_v13, %v1089_v12 }
  0xc2   : > { %3846 = vmatprep.subr.bf16.mxu0 %v4509_v14  ;;  %3850 = vmatprep.subr.bf16.mxu1 %v4509_v14 }
  0xc3   : > { %3848 = vmatpush3.bf16.msra.mxu0 %v4509_v14  ;;  %3852 = vmatpush3.bf16.msra.mxu1 %v4509_v14 }
  0xc4   : > { %3854 = vmatprep.subr.bf16.mxu0 %v3853_v15  ;;  %3862 = vmatprep.subr.bf16.mxu1 %v3861_v28 }
  0xc6   : > { %3684 = vmatmul.mubr.msk.f32.vlgmr.msra.gmra.mrb[0].mxu0 %vm1091_vm1, %v4524_v18  ;;  %3691 = vmatmul.mubr.msk.f32.vlgmr.msra.gmra.mrb[0].mxu1 %vm1091_vm1, %v4529_v19 }
  0xc7   : > { %3856 = vmatpush3.bf16.msra.mxu0 %v3853_v15  ;;  %3864 = vmatpush3.bf16.msra.mxu1 %v3861_v28  ;;  %v917_v15 = vld [vmem:[%s5497_s28 + $0x98] sm:$0xff]  ;;  %v919_v28 = vld [vmem:[%s5497_s28 + $0xa8] sm:$0xff] }
  0xc8   : > { %3858 = vmatprep.subr.bf16.mxu0 %v3857_v20  ;;  %3866 = vmatprep.subr.bf16.mxu1 %v3865_v31  ;;  %v3883_v30 = vpack.c.bf16 %v919_v28, %v918_v27 }
  0xcb   : > { %3860 = vmatpush3.bf16.msra.mxu0 %v3857_v20  ;;  %3868 = vmatpush3.bf16.msra.mxu1 %v3865_v31  ;;  %v3877_v20 = vpack.c.bf16 %v899_v11, %v898_v10  ;;  %v902_v31 = vld [vmem:[%s5497_s28 + $0x20] sm:$0xff]  ;;  %v913_v10 = vld [vmem:[%s5497_s28 + $0x78] sm:$0xff] }
  0xcc   : > { %3701 = vmatprep.subr.msk.mxu0 %vm1267_vm3, %v977_v21  ;;  %3714 = vmatprep.subr.msk.mxu1 %vm1267_vm3, %v983_v32  ;;  %v962_v11 = vld [vmem:[%s5497_s28 + $0x200] sm:$0xff] }
  0xcf   : > { %3702 = vmatpush3.msk.msra.mxu0 %vm1267_vm3, %v977_v21  ;;  %3715 = vmatpush3.msk.msra.mxu1 %vm1267_vm3, %v983_v32  ;;  %v903_v32 = vld [vmem:[%s5497_s28 + $0x28] sm:$0xff] }
  0xd0   : > { %3719 = vmatprep.subr.mxu0 %v985_v50 }
 0x199   : > { %v3685_v22 = vpop.f32.mrb[0].mxu0  ;;  %v3692_v23 = vpop.f32.mrb[0].mxu1 }
 0x19a   : > { %v1164_v24 = vpop.f32.mrb[1].mxu0  ;;  %v1245_v25 = vpop.f32.mrb[1].mxu1 }
 0x19b   : > { %1643 = vrot.lane.b32.xlu1 %v1245_v25, %s4256_s24  ;;  %3703 = vmatprep.mubr.msk.f32.mxu0 %vm1260_vm4, %v1164_v24  ;;  %v901_v24 = vld [vmem:[%s5497_s28 + $0x18] sm:$0xff] }
 0x19c   : > { %3704 = vmatmul.mubr.msk.f32.vlgmr.msra.gmra.mrb[2].mxu0 %vm1260_vm4, %v3685_v22 }
 0x19d   : > { %3720 = vmatpush3.msra.mxu0 %v985_v50 }
 0x19e   : > { %3876 = vmatprep.subr.bf16.mxu0 %v3875_v53  ;;  %v926_v53 = vld [vmem:[%s5497_s28 + $0xe0] sm:$0xff] }
 0x19f   : > { %1645 = vrot.lane.b32.xlu1 %v3692_v23, %s4256_s24  ;;  %v900_v23 = vld [vmem:[%s5497_s28 + $0x10] sm:$0xff] }
 0x1a0   : > { %v3881_v29 = vpack.c.bf16 %v901_v24, %v900_v23  ;;  %v964_v23 = vld [vmem:[%s5497_s28 + $0x210] sm:$0xff]  ;;  %v965_v24 = vld [vmem:[%s5497_s28 + $0x218] sm:$0xff] }
 0x20d   : > { %v1644_v33 = vpop.permute.xlu1 %1643 }
 0x20e   : > { %v4562_v34 = vsel %vm1260_vm4, %v1089_v12, %v1644_v33  ;;  %v920_v33 = vld [vmem:[%s5497_s28 + $0xb0] sm:$0xff] }
 0x20f   : > { %1659 = vrot.lane.b32.xlu1 %v4562_v34, %s4257_s8  ;;  %1653 = vrot.lane.b32.xlu0 %v4562_v34, %s4258_s0 }
 0x211   : > { %v1646_v35 = vpop.permute.xlu1 %1645 }
 0x212   : > { %v4569_v36 = vsel %vm1260_vm4, %v1090_v13, %v1646_v35  ;;  %v916_v13 = vld [vmem:[%s5497_s28 + $0x90] sm:$0xff]  ;;  %v921_v35 = vld [vmem:[%s5497_s28 + $0xb8] sm:$0xff] }
 0x213   : > { %1665 = vrot.lane.b32.xlu0 %v4562_v34, %s4259_s3  ;;  %1655 = vrot.lane.b32.xlu1 %v4569_v36, %s4258_s0  ;;  %v3879_v22 = vpack.c.bf16 %v917_v15, %v916_v13 }
 0x217   : > { %1661 = vrot.lane.b32.xlu0 %v4569_v36, %s4257_s8  ;;  %1667 = vrot.lane.b32.xlu1 %v4569_v36, %s4259_s3 }
 0x21b   : > { %1689 = vrot.lane.b32.xlu0 %v4562_v34, %s4260_s27  ;;  %1691 = vrot.lane.b32.xlu1 %v4569_v36, %s4260_s27 }
 0x21f   : > { %1677 = vrot.lane.b32.xlu0 %v4562_v34, %s5462_s22  ;;  %1683 = vrot.lane.b32.xlu1 %v4562_v34, %s5464_s20 }
 0x223   : > { %1671 = vrot.lane.b32.xlu0 %v4562_v34, %s5460_s29  ;;  %1679 = vrot.lane.b32.xlu1 %v4569_v36, %s5462_s22  ;;  %s5504_s22 = smov 24  }
 0x227   : > { %1685 = vrot.lane.b32.xlu0 %v4569_v36, %s5464_s20  ;;  %1673 = vrot.lane.b32.xlu1 %v4569_v36, %s5460_s29  ;;  %s5498_s20 = sld [smem:[#allocation16_spill]]  ;;  %s5505_s29 = smov 84  }
 0x22d   : > { %v4633_v16 = vld [vmem:[%s5498_s20 + $0x8] sm:$0xff] }
 0x26f   : > { %v3705_v38 = vpop.f32.mrb[2].mxu0 }
 0x270   : > { %v1343_v39 = vadd.f32 %v3705_v38, %v3374_v37  ;;  %v1337_v40 = vpop.f32.mrb[3].mxu0  ;;  %v3887_v38 = vpack.c.bf16 %v921_v35, %v920_v33 }
 0x271   : > { %v1338_v41 = vadd.f32 %v3374_v37, %v1337_v40  ;;  %v3885_v37 = vpack.c.bf16 %v903_v32, %v902_v31  ;;  %v905_v40 = vld [vmem:[%s5497_s28 + $0x38] sm:$0xff] }
 0x272   : > { %v3379_v42 = vmul.f32 -1.442695, %v1343_v39  ;;  %v904_v39 = vld [vmem:[%s5497_s28 + $0x30] sm:$0xff] }
 0x273   : > { %v3378_v43 = vmul.f32 -1.442695, %v1338_v41  ;;  %v922_v41 = vld [vmem:[%s5497_s28 + $0xc0] sm:$0xff] }
 0x274   : > { %4135 = vpow2.f32 %v3379_v42  ;;  %v923_v42 = vld [vmem:[%s5497_s28 + $0xc8] sm:$0xff] }
 0x275   : > { %4137 = vpow2.f32 %v3378_v43  ;;  %v3889_v43 = vpack.c.bf16 %v905_v40, %v904_v39  ;;  %v880_v39 = vld [vmem:[%s4465_s16] sm:$0xff] }
 0x276   : > { %v3386_v40 = vld [vmem:[%s5437_s15] ss:$0 sm:$0xff] }
 0x27e   : > { %v4136_v44 = vpop.eup %4135 }
 0x27f   : > { %v4138_v45 = vpop.eup %4137  ;;  %v1353_v46 = vadd.f32 1.0, %v4136_v44  ;;  %v3891_v44 = vpack.c.bf16 %v923_v42, %v922_v41 }
 0x280   : > { %v1352_v47 = vadd.f32 1.0, %v4138_v45  ;;  %v906_v45 = vld [vmem:[%s5497_s28 + $0x40] sm:$0xff] }
 0x281   : > { %v4612_v1 = vpop.permute.xlu0 %1653  ;;  %v1660_v6 = vpop.permute.xlu1 %1659 }
 0x282   : > { %4139 = vrcp.f32 %v1352_v47  ;;  %v1698_v12 = vsel %vm1466_vm5, %v4612_v1, %v1660_v6  ;;  %v924_v47 = vld [vmem:[%s5497_s28 + $0xd0] sm:$0xff] }
 0x283   : > { %4141 = vrcp.f32 %v1353_v46  ;;  %v907_v46 = vld [vmem:[%s5497_s28 + $0x48] sm:$0xff]  ;;  %v912_v6 = vld [vmem:[%s5497_s28 + $0x70] sm:$0xff] }
 0x285   : > { %v4614_v9 = vpop.permute.xlu0 %1665 }
 0x286   : > { %v1701_v17 = vsel %vm1700_vm6, %v1698_v12, %v4614_v9  ;;  %v963_v12 = vld [vmem:[%s5497_s28 + $0x208] sm:$0xff] }
 0x287   : > { %v1715_v26 = vmul.f32 %v1701_v17, %v4633_v16  ;;  %v3905_v17 = vpack.c.bf16 %v913_v10, %v912_v6  ;;  %v932_v10 = vld [vmem:[%s5497_s28 + $0x110] sm:$0xff] }
 0x28c   : > { %v4140_v48 = vpop.eup %4139 }
 0x28d   : > { %v4142_v49 = vpop.eup %4141  ;;  %3716 = vmatprep.mubr.msk.f32.mxu1 %vm1260_vm4, %v4140_v48  ;;  %v925_v48 = vld [vmem:[%s5497_s28 + $0xd8] sm:$0xff] }
 0x28e   : > { %3717 = vmatmul.mubr.msk.f32.vlgmr.msra.gmra.mrb[2].mxu1 %vm1260_vm4, %v4142_v49  ;;  %v3893_v49 = vpack.c.bf16 %v907_v46, %v906_v45  ;;  %v3895_v50 = vpack.c.bf16 %v925_v48, %v924_v47 }
 0x361   : > { %v3718_v55 = vpop.f32.mrb[2].mxu1 }
 0x362   : > { %v1445_v56 = vadd.f32 %v3718_v55, %v3380_v54  ;;  %v1439_v57 = vpop.f32.mrb[3].mxu1  ;;  %v3897_v55 = vpack.c.bf16 %v909_v52, %v908_v51 }
 0x363   : > { %v1440_v58 = vadd.f32 %v3380_v54, %v1439_v57  ;;  %v927_v54 = vld [vmem:[%s5497_s28 + $0xe8] sm:$0xff]  ;;  %v910_v57 = vld [vmem:[%s5497_s28 + $0x60] sm:$0xff] }
 0x364   : > { %v3385_v59 = vmul.f32 -1.442695, %v1445_v56  ;;  %v3899_v56 = vpack.c.bf16 %v927_v54, %v926_v53 }
 0x365   : > { %v3384_v60 = vmul.f32 -1.442695, %v1440_v58  ;;  %v911_v58 = vld [vmem:[%s5497_s28 + $0x68] sm:$0xff] }
 0x366   : > { %4143 = vpow2.f32 %v3385_v59  ;;  %v1656_v59 = vpop.permute.xlu1 %1655 }
 0x367   : > { %4145 = vpow2.f32 %v3384_v60  ;;  %v928_v60 = vld [vmem:[%s5497_s28 + $0xf0] sm:$0xff]  ;;  %v1697_v28 = vsel %vm1695_vm7, %v4569_v36, %v1656_v59  ;;  %v4767_v36 = vld [vmem:[%s5498_s20 + $0x48] sm:$0xff] }
 0x36a   : > { %v4725_v15 = vpop.permute.xlu1 %1667 }
 0x36e   : > { %v4769_v35 = vpop.permute.xlu1 %1691 }
 0x370   : > { %v4144_v61 = vpop.eup %4143 }
 0x371   : > { %v4146_v62 = vpop.eup %4145  ;;  %v1455_v63 = vadd.f32 1.0, %v4144_v61  ;;  %v929_v61 = vld [vmem:[%s5497_s28 + $0xf8] sm:$0xff] }
 0x372   : > { %v1454_v0 = vadd.f32 1.0, %v4146_v62  ;;  %v3901_v62 = vpack.c.bf16 %v911_v58, %v910_v57  ;;  %v1684_v54 = vpop.permute.xlu1 %1683  ;;  %v930_v58 = vld [vmem:[%s5497_s28 + $0x100] sm:$0xff] }
 0x374   : > { %4147 = vrcp.f32 %v1454_v0  ;;  %v3903_v0 = vpack.c.bf16 %v929_v61, %v928_v60  ;;  %v948_v60 = vld [vmem:[%s5497_s28 + $0x190] sm:$0xff]  ;;  %v949_v61 = vld [vmem:[%s5497_s28 + $0x198] sm:$0xff] }
 0x375   : > { %4149 = vrcp.f32 %v1455_v63  ;;  %v1662_v63 = vpop.permute.xlu0 %1661  ;;  %v3911_v6 = vpack.c.bf16 %v949_v61, %v948_v60 }
 0x376   : > { %v1699_v13 = vsel %vm1466_vm5, %v1656_v59, %v1662_v63  ;;  %v931_v59 = vld [vmem:[%s5497_s28 + $0x108] sm:$0xff]  ;;  %v4825_v63 = vld [vmem:[%s5498_s20 + $0x18] sm:$0xff] }
 0x379   : > { %v1690_v31 = vpop.permute.xlu0 %1689 }
 0x37d   : > { %v4800_v53 = vpop.permute.xlu0 %1677 }
 0x37e   : > { %v4148_v21 = vpop.eup %4147  ;;  %v1709_v57 = vsel %vm1708_vm10, %v4800_v53, %v1684_v54 }
 0x37f   : > { %v4150_v25 = vpop.eup %4149  ;;  %3721 = vmatprep.mubr.msk.f32.mxu0 %vm1466_vm5, %v4148_v21  ;;  %v4730_v21 = vld [vmem:[%s5498_s20] sm:$0xff] }
 0x380   : > { %3722 = vmatmul.mubr.msk.f32.vlgmr.msra.gmra.mrb[4].mxu0 %vm1466_vm5, %v4150_v25  ;;  %v4744_v25 = vld [vmem:[%s5498_s20 + $0x30] sm:$0xff] }
 0x381   : > { %3878 = vmatpush3.bf16.msra.mxu0 %v3877_v20  ;;  %1795 = vmatprep.mubr.f32.mxu0 %v1715_v26  ;;  %v3939_v20 = vpack.c.bf16 %v963_v12, %v962_v11  ;;  %v1702_v26 = vsel %vm1700_vm6, %v1699_v13, %v4725_v15  ;;  %v933_v11 = vld [vmem:[%s5497_s28 + $0x118] sm:$0xff]  ;;  %v950_v13 = vld [vmem:[%s5497_s28 + $0x1a0] sm:$0xff]  ;;  %v1672_v60 = vpop.permute.xlu0 %1671 }
 0x382   : > { %3880 = vmatprep.subr.bf16.mxu0 %v3879_v22  ;;  %v1696_v22 = vsel %vm1695_vm7, %v4562_v34, %v4612_v1  ;;  %v3943_v34 = vpack.c.bf16 %v965_v24, %v964_v23  ;;  %v4752_v1 = vld [vmem:[%s5498_s20 + $0x28] sm:$0xff]  ;;  %v934_v23 = vld [vmem:[%s5497_s28 + $0x120] sm:$0xff] }
 0x383   : > { %v1714_v27 = vmul.f32 %v1696_v22, %v4730_v21  ;;  %v1719_v32 = vmul.f32 %v1697_v28, %v4752_v1  ;;  %v935_v24 = vld [vmem:[%s5497_s28 + $0x128] sm:$0xff] }
 0x384   : > { %v3917_v28 = vpack.c.bf16 %v935_v24, %v934_v23  ;;  %v945_v23 = vld [vmem:[%s5497_s28 + $0x178] sm:$0xff]  ;;  %v1703_v24 = vsel %vm1091_vm1, %v4614_v9, %v1672_v60 }
 0x385   : > { %3882 = vmatpush3.bf16.msra.mxu0 %v3881_v29  ;;  %v1720_v29 = vmul.f32 %v1702_v26, %v4744_v25  ;;  %v952_v26 = vld [vmem:[%s5497_s28 + $0x1b0] sm:$0xff] }
 0x386   : > { %3884 = vmatprep.subr.bf16.mxu0 %v3883_v30  ;;  %v4760_v30 = vld [vmem:[%s5498_s20 + $0x20] sm:$0xff] }
 0x387   : > { %v1718_v33 = vmul.f32 %v1690_v31, %v4760_v30 }
 0x389   : > { %3886 = vmatpush3.bf16.msra.mxu0 %v3885_v37  ;;  %v1723_v37 = vmul.f32 %v4769_v35, %v4767_v36 }
 0x38a   : > { %3888 = vmatprep.subr.bf16.mxu0 %v3887_v38  ;;  %v881_v38 = vld [vmem:[%s4465_s16 + $0x8] sm:$0xff]  ;;  %s5503_s16 = sld [smem:[#allocation19_spill]] }
 0x38b   : > { %v4782_v41 = vmul.f32 3.0, %v881_v38  ;;  %v954_v38 = vld [vmem:[%s5497_s28 + $0x1c0] sm:$0xff] }
 0x38d   : > { %3890 = vmatpush3.bf16.msra.mxu0 %v3889_v43  ;;  %v4784_v43 = vmul.f32 3.0, %v880_v39  ;;  %v955_v39 = vld [vmem:[%s5497_s28 + $0x1c8] sm:$0xff] }
 0x38e   : > { %3892 = vmatprep.subr.bf16.mxu0 %v3891_v44 }
 0x391   : > { %3894 = vmatpush3.bf16.msra.mxu0 %v3893_v49  ;;  %v947_v49 = vld [vmem:[%s5497_s28 + $0x188] sm:$0xff] }
 0x392   : > { %3896 = vmatprep.subr.bf16.mxu0 %v3895_v50 }
 0x395   : > { %3898 = vmatpush3.bf16.msra.mxu0 %v3897_v55 }
 0x396   : > { %3900 = vmatprep.subr.bf16.mxu0 %v3899_v56 }
 0x399   : > { %3902 = vmatpush3.bf16.msra.mxu0 %v3901_v62  ;;  %v1712_v62 = vsel %vm1711_vm11, %v1709_v57, %v1690_v31  ;;  %v941_v57 = vld [vmem:[%s5497_s28 + $0x158] sm:$0xff] }
 0x39a   : > { %3904 = vmatprep.subr.bf16.mxu0 %v3903_v0  ;;  %v3909_v0 = vpack.c.bf16 %v931_v59, %v930_v58  ;;  %v1717_v12 = vmul.f32 %v1712_v62, %v4825_v63  ;;  %v958_v58 = vld [vmem:[%s5497_s28 + $0x1e0] sm:$0xff]  ;;  %v959_v59 = vld [vmem:[%s5497_s28 + $0x1e8] sm:$0xff] }
 0x39b   : > { %v3931_v62 = vpack.c.bf16 %v959_v59, %v958_v58 }
 0x39d   : > { %3906 = vmatpush3.bf16.msra.mxu0 %v3905_v17  ;;  %v951_v17 = vld [vmem:[%s5497_s28 + $0x1a8] sm:$0xff] }
 0x39e   : > { %3940 = vmatprep.subr.bf16.mxu0 %v3939_v20  ;;  %v3915_v22 = vpack.c.bf16 %v951_v17, %v950_v13  ;;  %v1686_v17 = vpop.permute.xlu0 %1685 }
 0x3a0   : > { %1796 = vmatmul.mubr.f32.vlgmr.msra.gmra.mrb[6].mxu0 %v1714_v27  ;;  %v953_v27 = vld [vmem:[%s5497_s28 + $0x1b8] sm:$0xff] }
 0x3a1   : > { %1800 = vmatprep.mubr.f32.mxu0 %v1720_v29  ;;  %3942 = vmatpush3.bf16.msra.mxu0 %v3939_v20  ;;  %v3913_v20 = vpack.c.bf16 %v933_v11, %v932_v10  ;;  %v3919_v31 = vpack.c.bf16 %v953_v27, %v952_v26  ;;  %v1680_v10 = vpop.permute.xlu1 %1679  ;;  %v960_v11 = vld [vmem:[%s5497_s28 + $0x1f0] sm:$0xff] }
 0x3a2   : > { %3944 = vmatprep.subr.bf16.mxu0 %v3943_v34  ;;  %v1710_v26 = vsel %vm1708_vm10, %v1680_v10, %v1686_v17  ;;  %v972_v17 = vld [vmem:[%s5502_s26 + $0x20] sm:$0x3] }
 0x3a4   : > { %1801 = vmatmul.mubr.f32.gmra.mrb[8].mxu0 %v1719_v32  ;;  %v936_v32 = vld [vmem:[%s5497_s28 + $0x130] sm:$0xff] }
 0x3a5   : > { %3946 = vmatpush3.bf16.msra.mxu0 %v3943_v34  ;;  %3739 = vmatprep.mubr.msk.f32.mxu0 %vm1724_vm8, %v1718_v33  ;;  %v937_v33 = vld [vmem:[%s5497_s28 + $0x138] sm:$0xff]  ;;  %v1674_v27 = vpop.permute.xlu1 %1673 }
 0x3a6   : > { %3948 = vmatprep.subr.bf16.mxu0 %v4509_v14  ;;  %v1704_v9 = vsel %vm1091_vm1, %v4725_v15, %v1674_v27 }
 0x3a8   : > { %3740 = vmatmul.mubr.msk.f32.vlgmr.msra.gmra.mrb[10].mxu0 %vm1724_vm8, %v1723_v37 }
 0x3a9   : > { %3950 = vmatpush3.bf16.msra.mxu0 %v4509_v14  ;;  %v946_v14 = vld [vmem:[%s5497_s28 + $0x180] sm:$0xff] }
 0x3aa   : > { %v3907_v56 = vpack.c.bf16 %v947_v49, %v946_v14  ;;  %v956_v14 = vld [vmem:[%s5497_s28 + $0x1d0] sm:$0xff]  ;;  %v957_v49 = vld [vmem:[%s5497_s28 + $0x1d8] sm:$0xff] }
 0x453   : > { %v3723_v42 = vpop.f32.mrb[4].mxu0 }
 0x454   : > { %v1545_v44 = vadd.f32 %v3723_v42, %v3386_v40  ;;  %v1539_v45 = vpop.f32.mrb[5].mxu0  ;;  %v3921_v42 = vpack.c.bf16 %v937_v33, %v936_v32  ;;  %v4932_v32 = vld [vmem:[%s5498_s20 + $0x40] sm:$0xff] }
 0x455   : > { %v1540_v46 = vadd.f32 %v3386_v40, %v1539_v45  ;;  %v3923_v45 = vpack.c.bf16 %v955_v39, %v954_v38  ;;  %v1707_v38 = vsel %vm1705_vm12, %v1704_v9, %v1680_v10 }
 0x456   : > { %v1551_v47 = vmul.f32 %v4782_v41, %v1545_v44 }
 0x457   : > { %v1550_v48 = vmul.f32 %v4784_v43, %v1540_v46  ;;  %v938_v46 = vld [vmem:[%s5497_s28 + $0x140] sm:$0xff] }
 0x458   : > { %4151 = vtanh.f32 %v1551_v47  ;;  %v939_v47 = vld [vmem:[%s5497_s28 + $0x148] sm:$0xff] }
 0x459   : > { %4153 = vtanh.f32 %v1550_v48 }
 0x462   : > { %v4152_v50 = vpop.eup %4151 }
 0x463   : > { %v4154_v51 = vpop.eup %4153 }
 0x464   : > { %3728 = vmatprep.mubr.msk.f32.mxu1 %vm1466_vm5, %v4154_v51  ;;  %v3869_v55 = vpack.c.bf16 %v4152_v50, %v4154_v51  ;;  %v3925_v51 = vpack.c.bf16 %v939_v47, %v938_v46 }
 0x466   : > { %3871 = vmatprep.subr.msk.bf16.mxu1 %vm4796_vm9, %v3869_v55 }
 0x467   : > { %3874 = vmatpush3.bf16.xpose.msk.msra.mxu1 %vm4796_vm9, %v3869_v55  ;;  %v3927_v55 = vpack.c.bf16 %v957_v49, %v956_v14 }
 0x468   : > { %3908 = vmatprep.subr.bf16.mxu1 %v3907_v56  ;;  %v940_v56 = vld [vmem:[%s5497_s28 + $0x150] sm:$0xff] }
 0x469   : > { %v3929_v61 = vpack.c.bf16 %v941_v57, %v940_v56 }
 0x46e   : > { %3729 = vmatmul.mubr.msk.f32.vlgmr.msra.gmra.mrb[4].mxu1 %vm1466_vm5, %v4152_v50 }
 0x46f   : > { %3910 = vmatpush3.bf16.msra.mxu1 %v3909_v0  ;;  %1870 = vmatprep.mubr.f32.mxu1 %v1717_v12  ;;  %v942_v0 = vld [vmem:[%s5497_s28 + $0x160] sm:$0xff]  ;;  %v961_v12 = vld [vmem:[%s5497_s28 + $0x1f8] sm:$0xff] }
 0x470   : > { %3912 = vmatprep.subr.bf16.mxu1 %v3911_v6  ;;  %v943_v6 = vld [vmem:[%s5497_s28 + $0x168] sm:$0xff] }
 0x471   : > { %v3933_v13 = vpack.c.bf16 %v943_v6, %v942_v0 }
 0x473   : > { %v3496_v34 = vpop.f32.mrb[6].mxu0  ;;  %3914 = vmatpush3.bf16.msra.mxu1 %v3913_v20  ;;  %v3935_v20 = vpack.c.bf16 %v961_v12, %v960_v11 }
 0x474   : > { %v3497_v29 = vpop.f32.mrb[7].mxu0  ;;  %3916 = vmatprep.subr.bf16.mxu1 %v3915_v22  ;;  %v944_v22 = vld [vmem:[%s5497_s28 + $0x170] sm:$0xff] }
 0x475   : > { %v4859_v37 = vadd.f32 %v3497_v29, %v3496_v34  ;;  %v3937_v34 = vpack.c.bf16 %v945_v23, %v944_v22  ;;  %v1706_v29 = vsel %vm1705_vm12, %v1703_v24, %v4800_v53  ;;  %v4940_v53 = vld [vmem:[%s5498_s20 + $0x38] sm:$0xff] }
 0x476   : > { %v1721_v15 = vmul.f32 %v1707_v38, %v4940_v53 }
 0x477   : > { %v3499_v40 = vpop.f32.mrb[8].mxu0  ;;  %3918 = vmatpush3.bf16.msra.mxu1 %v3917_v28  ;;  %v4921_v28 = vld [vmem:[%s5498_s20 + $0x10] sm:$0xff] }
 0x478   : > { %v3500_v44 = vpop.f32.mrb[9].mxu0  ;;  %3920 = vmatprep.subr.bf16.mxu1 %v3919_v31  ;;  %v1713_v31 = vsel %vm1711_vm11, %v1710_v26, %v4769_v35  ;;  %v1716_v33 = vmul.f32 %v1706_v29, %v4921_v28  ;;  %v968_v35 = vld [vmem:[%s5501_s6] sm:$0xff]  ;;  %s1076_s6 = sld [smem:[#allocation3]] }
 0x479   : > { %v4873_v48 = vadd.f32 %v3500_v44, %v3499_v40  ;;  %v1722_v39 = vmul.f32 %v1713_v31, %v4932_v32  ;;  %v969_v40 = vld [vmem:[%s5502_s26 + $0x8] sm:$0xff] }
 0x47a   : > { %v3951_v44 = vpack.c.bf16 %v969_v40, %v968_v35 }
 0x47b   : > { %v4881_v50 = vpop.f32.mrb[10].mxu0  ;;  %3922 = vmatpush3.bf16.msra.mxu1 %v3921_v42  ;;  %v970_v42 = vld [vmem:[%s5502_s26 + $0x10] sm:$0xff] }
 0x47c   : > { %v4883_v54 = vpop.f32.mrb[11].mxu0  ;;  %3924 = vmatprep.subr.bf16.mxu1 %v3923_v45  ;;  %v971_v45 = vld [vmem:[%s5502_s26 + $0x18] sm:$0xff] }
 0x47d   : > { %v3955_v46 = vpack.c.bf16 %v971_v45, %v970_v42 }
 0x47e   : > { %v2123_v23 = vstv %s1076_s6  ;;  %s5512_s6 = sld [smem:[#allocation27_spill]] }
 0x47f   : > { %3926 = vmatpush3.bf16.msra.mxu1 %v3925_v51 }
 0x480   : > { %3928 = vmatprep.subr.bf16.mxu1 %v3927_v55 }
 0x483   : > { %3930 = vmatpush3.bf16.msra.mxu1 %v3929_v61 }
 0x484   : > { %3932 = vmatprep.subr.bf16.mxu1 %v3931_v62 }
 0x487   : > { %3934 = vmatpush3.bf16.msra.mxu1 %v3933_v13 }
 0x488   : > { %3936 = vmatprep.subr.bf16.mxu1 %v3935_v20 }
 0x48b   : > { %3938 = vmatpush3.bf16.msra.mxu1 %v3937_v34 }
 0x48c   : > { %3952 = vmatprep.subr.bf16.mxu1 %v3951_v44 }
 0x48e   : > { %1871 = vmatmul.mubr.f32.vlgmr.msra.gmra.mrb[6].mxu1 %v1716_v33 }
 0x48f   : > { %1875 = vmatprep.mubr.f32.mxu1 %v1722_v39  ;;  %3954 = vmatpush3.bf16.msra.mxu1 %v3951_v44 }
 0x490   : > { %3956 = vmatprep.subr.bf16.mxu1 %v3955_v46 }
 0x492   : > { %1876 = vmatmul.mubr.f32.gmra.mrb[8].mxu1 %v1721_v15 }
 0x493   : > { %3958 = vmatpush3.bf16.msra.mxu1 %v3955_v46 }
 0x494   : > { %3757 = vmatprep.subr.msk.mxu1 %vm1267_vm3, %v972_v17 }
 0x497   : > { %3758 = vmatpush3.msk.msra.mxu1 %vm1267_vm3, %v972_v17  ;;  %v1072_v17 = vld [vmem:[%s5443_s21 + $0x20] sm:$0x3] }
 0x541   : > { %v3730_v47 = vpop.f32.mrb[4].mxu1 }
 0x542   : > { %v1636_v14 = vmul.f32 3.0, %v3730_v47  ;;  %v1626_v49 = vpop.f32.mrb[5].mxu1 }
 0x543   : > { %v1635_v51 = vmul.f32 3.0, %v1626_v49  ;;  %v1063_v49 = vld [vmem:[%s5441_s19 + $0x8] sm:$0xff] }
 0x544   : > { %4155 = vtanh.f32 %v1636_v14  ;;  %v1062_v14 = vld [vmem:[%s5441_s19] sm:$0xff] }
 0x545   : > { %4157 = vtanh.f32 %v1635_v51 }
 0x54e   : > { %v4156_v55 = vpop.eup %4155 }
 0x54f   : > { %v4158_v56 = vpop.eup %4157  ;;  %v1640_v58 = vmax.f32 %v4156_v55, 0.0 }
 0x550   : > { %v1639_v57 = vmax.f32 %v4158_v56, 0.0 }
 0x552   : > { %3746 = vmatprep.mubr.msk.f32.mxu0 %vm1091_vm1, %v1639_v57 }
 0x553   : > { %3747 = vmatmul.mubr.msk.f32.vlgmr.msra.gmra.mrb[12].mxu0 %vm1091_vm1, %v1640_v58  ;;  %v3967_v58 = vpack.c.bf16 %v1063_v49, %v1062_v14 }
 0x554   : > { %3766 = vmatprep.mubr.msk.f32.mxu0 %vm1091_vm1, %v4480_v3 }
 0x561   : > { %v3534_v59 = vpop.f32.mrb[6].mxu1 }
 0x562   : > { %v3535_v60 = vpop.f32.mrb[7].mxu1 }
 0x563   : > { %v3536_v61 = vadd.f32 %v3535_v60, %v3534_v59  ;;  %v1064_v59 = vld [vmem:[%s5441_s19 + $0x10] sm:$0xff]  ;;  %v1065_v60 = vld [vmem:[%s5441_s19 + $0x18] sm:$0xff] }
 0x565   : > { %v1873_v62 = vadd.f32 %v3536_v61, %v4859_v37  ;;  %v3537_v0 = vpop.f32.mrb[8].mxu1  ;;  %v967_v37 = vld [vmem:[%s5503_s16 + $0x8] sm:$0xff] }
 0x566   : > { %v3538_v6 = vpop.f32.mrb[9].mxu1 }
 0x567   : > { %v1948_v10 = vadd.f32 %v4883_v54, %v1873_v62  ;;  %v3539_v11 = vadd.f32 %v3538_v6, %v3537_v0  ;;  %v2126_v54 = vstv %s3367_s2  ;;  %v1069_v6 = vld [vmem:[%s5443_s21 + $0x8] sm:$0xff] }
 0x569   : > { %v1878_v12 = vadd.f32 %v3539_v11, %v4873_v48  ;;  %v966_v48 = vld [vmem:[%s5503_s16] sm:$0xff]  ;;  %v1070_v11 = vld [vmem:[%s5443_s21 + $0x10] sm:$0xff] }
 0x56a   : > { %v1956_v22 = vadd.f32 %v1948_v10, %v966_v48 }
 0x56b   : > { %v1953_v13 = vadd.f32 %v4881_v50, %v1878_v12  ;;  %v1071_v12 = vld [vmem:[%s5443_s21 + $0x18] sm:$0xff] }
 0x56c   : > { %v2124_v29 = vmul.f32 %v2123_v23, %v1956_v22 }
 0x56d   : > { %v1957_v50 = vadd.f32 %v1953_v13, %v967_v37  ;;  %v3979_v13 = vpack.c.bf16 %v1071_v12, %v1070_v11  ;;  %v989_v11 = vld [vmem:[%s5510_s17 + $0x10] sm:$0xff]  ;;  %v990_v12 = vld [vmem:[%s5510_s17 + $0x18] sm:$0xff] }
 0x56f   : > { %v2125_v26 = vmul.f32 %v2123_v23, %v1957_v50  ;;  %v3406_v50 = vld [vmem:[%s5507_s9] ss:$0 sm:$0xff] }
 0x626   : > { %v3748_v3 = vpop.f32.mrb[12].mxu0 }
 0x627   : > { %v2030_v20 = vpop.f32.mrb[13].mxu0 }
 0x628   : > { %3759 = vmatprep.mubr.msk.f32.mxu1 %vm1260_vm4, %v2030_v20 }
 0x629   : > { %3760 = vmatmul.mubr.msk.f32.vlgmr.msra.gmra.mrb[10].mxu1 %vm1260_vm4, %v3748_v3 }
 0x62a   : > { %3773 = vmatprep.mubr.msk.f32.mxu1 %vm1091_vm1, %v4485_v4 }
 0x6fc   : > { %v3761_v24 = vpop.f32.mrb[10].mxu1 }
 0x6fd   : > { %v2128_v27 = vmul.f32 %v3761_v24, %v2126_v54  ;;  %v2114_v34 = vpop.f32.mrb[11].mxu1 }
 0x6fe   : > { %v2127_v4 = vmul.f32 %v2126_v54, %v2114_v34 }
 0x6ff   : > { %v2130_v31 = vadd.f32 %v2128_v27, %v2125_v26 }
 0x700   : > { %v2129_v9 = vadd.f32 %v2127_v4, %v2124_v29 }
 0x701   : > { %v3401_v33 = vmul.f32 -1.442695, %v2130_v31 }
 0x702   : > { %v3400_v38 = vmul.f32 -1.442695, %v2129_v9 }
 0x703   : > { %4159 = vpow2.f32 %v3401_v33  ;;  %v1003_v33 = vld [vmem:[%s5509_s30 + $0x80] sm:$0xff]  ;;  %s5513_s30 = sld [smem:[#allocation23_spill]] }
 0x704   : > { %4161 = vpow2.f32 %v3400_v38  ;;  %v1004_v38 = vld [vmem:[%s5510_s17 + $0x88] sm:$0xff] }
 0x70d   : > { %v4160_v39 = vpop.eup %4159 }
 0x70e   : > { %v4162_v15 = vpop.eup %4161  ;;  %v2138_v35 = vadd.f32 1.0, %v4160_v39  ;;  %v3989_v39 = vpack.c.bf16 %v1004_v38, %v1003_v33  ;;  %v996_v33 = vld [vmem:[%s5510_s17 + $0x48] sm:$0xff]  ;;  %v1013_v38 = vld [vmem:[%s5510_s17 + $0xd0] sm:$0xff] }
 0x70f   : > { %v2137_v40 = vadd.f32 1.0, %v4162_v15 }
 0x710   : > { %4163 = vrcp.f32 %v2138_v35 }
 0x711   : > { %4165 = vrcp.f32 %v2137_v40 }
 0x71a   : > { %v4978_v42 = vpop.eup %4163 }
 0x71b   : > { %v4980_v44 = vpop.eup %4165  ;;  %v2144_v45 = vmul.f32 %v4978_v42, %v4487_v5 }
 0x71c   : > { %v2143_v46 = vmul.f32 %v4980_v44, %v4473_v2 }
 0x71d   : > { %2149 = vrot.lane.b32.xlu1 %v2144_v45, %s4255_s18 }
 0x71e   : > { %2147 = vrot.lane.b32.xlu0 %v2143_v46, %s4255_s18  ;;  %s5508_s18 = sld [smem:[#allocation26_spill]] }
 0x724   : > { %v1074_v9 = vld [vmem:[%s5508_s18] sm:$0xff]  ;;  %s3369_s18 = sld [smem:[#allocation3 + $0x81]] }
 0x78f   : > { %v2150_v47 = vpop.permute.xlu1 %2149 }
 0x790   : > { %v2154_v51 = vsel %vm1088_vm2, %v4497_v8, %v2150_v47  ;;  %v2148_v55 = vpop.permute.xlu0 %2147  ;;  %v1066_v8 = vld [vmem:[%s5441_s19 + $0x20] sm:$0x3] }
 0x791   : > { %v2153_v56 = vsel %vm1088_vm2, %v4495_v7, %v2148_v55  ;;  %v3971_v7 = vpack.c.bf16 %v1065_v60, %v1064_v59 }
 0x792   : > { %v4998_v57 = vpack.c.bf16 %v2154_v51, %v2153_v56 }
 0x794   : > { %3960 = vmatprep.subr.bf16.mxu0 %v4998_v57  ;;  %3964 = vmatprep.subr.bf16.mxu1 %v4998_v57 }
 0x795   : > { %3962 = vmatpush3.bf16.msra.mxu0 %v4998_v57  ;;  %3966 = vmatpush3.bf16.msra.mxu1 %v4998_v57 }
 0x796   : > { %3968 = vmatprep.subr.bf16.mxu0 %v3967_v58 }
 0x798   : > { %3767 = vmatmul.mubr.msk.f32.vlgmr.msra.gmra.mrb[14].mxu0 %vm1091_vm1, %v4524_v18  ;;  %3774 = vmatmul.mubr.msk.f32.vlgmr.msra.gmra.mrb[12].mxu1 %vm1091_vm1, %v4529_v19  ;;  %v1068_v19 = vld [vmem:[%s5443_s21] sm:$0xff] }
 0x799   : > { %3970 = vmatpush3.bf16.msra.mxu0 %v3967_v58  ;;  %v3975_v10 = vpack.c.bf16 %v1069_v6, %v1068_v19 }
 0x79a   : > { %3972 = vmatprep.subr.bf16.mxu0 %v3971_v7 }
 0x79b   : > { %3976 = vmatprep.subr.bf16.mxu1 %v3975_v10 }
 0x79c   : > { %3978 = vmatpush3.bf16.msra.mxu1 %v3975_v10 }
 0x79d   : > { %3974 = vmatpush3.bf16.msra.mxu0 %v3971_v7  ;;  %3980 = vmatprep.subr.bf16.mxu1 %v3979_v13  ;;  %v987_v7 = vld [vmem:[%s5510_s17] sm:$0xff] }
 0x79e   : > { %3784 = vmatprep.subr.msk.mxu0 %vm1267_vm3, %v1066_v8 }
 0x7a0   : > { %3982 = vmatpush3.bf16.msra.mxu1 %v3979_v13 }
 0x7a1   : > { %3785 = vmatpush3.msk.msra.mxu0 %vm1267_vm3, %v1066_v8  ;;  %3797 = vmatprep.subr.msk.mxu1 %vm1267_vm3, %v1072_v17  ;;  %v988_v8 = vld [vmem:[%s5510_s17 + $0x8] sm:$0xff] }
 0x7a2   : > { %3802 = vmatprep.subr.mxu0 %v1074_v9  ;;  %v3991_v19 = vpack.c.bf16 %v988_v8, %v987_v7  ;;  %v1018_v7 = vld [vmem:[%s5510_s17 + $0xf8] sm:$0xff] }
 0x7a4   : > { %3798 = vmatpush3.msk.msra.mxu1 %vm1267_vm3, %v1072_v17 }
 0x86b   : > { %v3768_v61 = vpop.f32.mrb[14].mxu0  ;;  %v3775_v62 = vpop.f32.mrb[12].mxu1 }
 0x86c   : > { %2691 = vrot.lane.b32.xlu1 %v3775_v62, %s4256_s24  ;;  %v2221_v0 = vpop.f32.mrb[15].mxu0  ;;  %v2296_v18 = vpop.f32.mrb[13].mxu1  ;;  %v1005_v62 = vld [vmem:[%s5510_s17 + $0x90] sm:$0xff] }
 0x86d   : > { %2689 = vrot.lane.b32.xlu0 %v2296_v18, %s4256_s24  ;;  %3786 = vmatprep.mubr.msk.f32.mxu0 %vm1260_vm4, %v2221_v0  ;;  %v1006_v0 = vld [vmem:[%s5510_s17 + $0x98] sm:$0xff] }
 0x86e   : > { %3787 = vmatmul.mubr.msk.f32.vlgmr.msra.gmra.mrb[16].mxu0 %vm1260_vm4, %v3768_v61  ;;  %v3993_v10 = vpack.c.bf16 %v1006_v0, %v1005_v62  ;;  %v1001_v0 = vld [vmem:[%s5510_s17 + $0x70] sm:$0xff] }
 0x86f   : > { %3803 = vmatpush3.msra.mxu0 %v1074_v9  ;;  %v995_v9 = vld [vmem:[%s5510_s17 + $0x40] sm:$0xff] }
 0x870   : > { %3990 = vmatprep.subr.bf16.mxu0 %v3989_v39  ;;  %v1014_v39 = vld [vmem:[%s5510_s17 + $0xd8] sm:$0xff] }
 0x8de   : > { %v2692_v37 = vpop.permute.xlu1 %2691 }
 0x8df   : > { %v2690_v3 = vpop.permute.xlu0 %2689  ;;  %v5048_v48 = vsel %vm1260_vm4, %v2154_v51, %v2692_v37  ;;  %v1008_v37 = vld [vmem:[%s5510_s17 + $0xa8] sm:$0xff] }
 0x8e0   : > { %v5040_v20 = vsel %vm1260_vm4, %v2153_v56, %v2690_v3  ;;  %v1007_v3 = vld [vmem:[%s5510_s17 + $0xa0] sm:$0xff] }
 0x8e1   : > { %2705 = vrot.lane.b32.xlu1 %v5040_v20, %s4257_s8  ;;  %2699 = vrot.lane.b32.xlu0 %v5040_v20, %s4258_s0 }
 0x8e5   : > { %2701 = vrot.lane.b32.xlu1 %v5048_v48, %s4258_s0  ;;  %2711 = vrot.lane.b32.xlu0 %v5040_v20, %s4259_s3  ;;  %s5506_s0 = smov 16  }
 0x8e9   : > { %2713 = vrot.lane.b32.xlu1 %v5048_v48, %s4259_s3  ;;  %2707 = vrot.lane.b32.xlu0 %v5048_v48, %s4257_s8  ;;  %s4264_s8 = smov 32   ;;  %s5511_s3 = sld [smem:[#allocation25_spill]] }
 0x8ed   : > { %2737 = vrot.lane.b32.xlu1 %v5048_v48, %s4260_s27  ;;  %2735 = vrot.lane.b32.xlu0 %v5040_v20, %s4260_s27  ;;  %s4265_s27 = smov 96  }
 0x8ef   : > { %v3412_v15 = vld [vmem:[%s5511_s3] ss:$0 sm:$0xff] }
 0x8f1   : > { %2729 = vrot.lane.b32.xlu1 %v5040_v20, %s5504_s22  ;;  %2723 = vrot.lane.b32.xlu0 %v5040_v20, %s5505_s29 }
 0x8f5   : > { %2725 = vrot.lane.b32.xlu1 %v5048_v48, %s5505_s29  ;;  %2717 = vrot.lane.b32.xlu0 %v5040_v20, %s5506_s0 }
 0x8f9   : > { %2719 = vrot.lane.b32.xlu1 %v5048_v48, %s5506_s0  ;;  %2731 = vrot.lane.b32.xlu0 %v5048_v48, %s5504_s22  ;;  %s5514_s22 = smov %s5513_s30  ;;  %s5516_s0 = smov %s5515_s7 }
 0x8fd   : > { %3175 = vrot.lane.b32.xlu1 %v4487_v5, %s4264_s8  ;;  %3173 = vrot.lane.b32.xlu0 %v4473_v2, %s4264_s8 }
 0x941   : > { %v3788_v54 = vpop.f32.mrb[16].mxu0 }
 0x942   : > { %v2392_v22 = vadd.f32 %v3788_v54, %v3406_v50  ;;  %v2386_v23 = vpop.f32.mrb[17].mxu0  ;;  %v3997_v54 = vpack.c.bf16 %v1008_v37, %v1007_v3  ;;  %v1053_v3 = vld [vmem:[%s5510_s17 + $0x210] sm:$0xff]  ;;  %v1054_v37 = vld [vmem:[%s5510_s17 + $0x218] sm:$0xff] }
 0x943   : > { %v2387_v24 = vadd.f32 %v3406_v50, %v2386_v23  ;;  %v3995_v50 = vpack.c.bf16 %v990_v12, %v989_v11  ;;  %v1009_v23 = vld [vmem:[%s5510_s17 + $0xb0] sm:$0xff] }
 0x944   : > { %v3411_v26 = vmul.f32 -1.442695, %v2392_v22  ;;  %v992_v22 = vld [vmem:[%s5510_s17 + $0x28] sm:$0xff] }
 0x945   : > { %v3410_v27 = vmul.f32 -1.442695, %v2387_v24  ;;  %v1010_v24 = vld [vmem:[%s5510_s17 + $0xb8] sm:$0xff] }
 0x946   : > { %4167 = vpow2.f32 %v3411_v26 }
 0x947   : > { %4169 = vpow2.f32 %v3410_v27  ;;  %v4001_v27 = vpack.c.bf16 %v1010_v24, %v1009_v23 }
 0x950   : > { %v4168_v34 = vpop.eup %4167 }
 0x951   : > { %v4170_v29 = vpop.eup %4169  ;;  %v2402_v4 = vadd.f32 1.0, %v4168_v34  ;;  %v993_v34 = vld [vmem:[%s5510_s17 + $0x30] sm:$0xff] }
 0x952   : > { %v2401_v31 = vadd.f32 1.0, %v4170_v29  ;;  %v994_v29 = vld [vmem:[%s5510_s17 + $0x38] sm:$0xff] }
 0x953   : > { %v5095_v58 = vpop.permute.xlu0 %2699  ;;  %v2706_v59 = vpop.permute.xlu1 %2705 }
 0x954   : > { %4171 = vrcp.f32 %v2401_v31  ;;  %v2743_v61 = vsel %vm1466_vm5, %v5095_v58, %v2706_v59  ;;  %v1012_v31 = vld [vmem:[%s5510_s17 + $0xc8] sm:$0xff]  ;;  %v1017_v59 = vld [vmem:[%s5510_s17 + $0xf0] sm:$0xff] }
 0x955   : > { %4173 = vrcp.f32 %v2402_v4  ;;  %v1011_v4 = vld [vmem:[%s5510_s17 + $0xc0] sm:$0xff]  ;;  %v4017_v62 = vpack.c.bf16 %v1018_v7, %v1017_v59  ;;  %v1041_v59 = vld [vmem:[%s5510_s17 + $0x1b0] sm:$0xff]  ;;  %v1042_v7 = vld [vmem:[%s5510_s17 + $0x1b8] sm:$0xff] }
 0x957   : > { %v5097_v60 = vpop.permute.xlu0 %2711 }
 0x958   : > { %v2745_v18 = vsel %vm1700_vm6, %v2743_v61, %v5097_v60 }
 0x959   : > { %v2756_v17 = vmul.f32 %v2745_v18, %v4633_v16  ;;  %v991_v16 = vld [vmem:[%s5510_s17 + $0x20] sm:$0xff]  ;;  %v1002_v18 = vld [vmem:[%s5510_s17 + $0x78] sm:$0xff] }
 0x95a   : > { %v3999_v26 = vpack.c.bf16 %v992_v22, %v991_v16  ;;  %v4019_v12 = vpack.c.bf16 %v1002_v18, %v1001_v0  ;;  %v4057_v16 = vpack.c.bf16 %v1054_v37, %v1053_v3  ;;  %v4033_v0 = vpack.c.bf16 %v1042_v7, %v1041_v59  ;;  %v1025_v18 = vld [vmem:[%s5510_s17 + $0x130] sm:$0xff] }
 0x95b   : > { %v2708_v61 = vpop.permute.xlu0 %2707 }
 0x95e   : > { %v4172_v5 = vpop.eup %4171 }
 0x95f   : > { %v4174_v2 = vpop.eup %4173  ;;  %3799 = vmatprep.mubr.msk.f32.mxu1 %vm1260_vm4, %v4172_v5  ;;  %v4003_v5 = vpack.c.bf16 %v994_v29, %v993_v34 }
 0x960   : > { %3800 = vmatmul.mubr.msk.f32.vlgmr.msra.gmra.mrb[14].mxu1 %vm1260_vm4, %v4174_v2  ;;  %v4005_v2 = vpack.c.bf16 %v1012_v31, %v1011_v4 }
 0xa33   : > { %v3801_v35 = vpop.f32.mrb[14].mxu1 }
 0xa34   : > { %v2494_v40 = vadd.f32 %v3801_v35, %v3412_v15  ;;  %v2488_v45 = vpop.f32.mrb[15].mxu1  ;;  %v4009_v35 = vpack.c.bf16 %v1014_v39, %v1013_v38  ;;  %v1020_v38 = vld [vmem:[%s5510_s17 + $0x108] sm:$0xff]  ;;  %v1037_v39 = vld [vmem:[%s5510_s17 + $0x190] sm:$0xff] }
 0xa35   : > { %v2489_v46 = vadd.f32 %v3412_v15, %v2488_v45  ;;  %v4007_v15 = vpack.c.bf16 %v996_v33, %v995_v9  ;;  %v998_v45 = vld [vmem:[%s5510_s17 + $0x58] sm:$0xff]  ;;  %v1019_v33 = vld [vmem:[%s5510_s17 + $0x100] sm:$0xff] }
 0xa36   : > { %v3417_v47 = vmul.f32 -1.442695, %v2494_v40  ;;  %v997_v40 = vld [vmem:[%s5510_s17 + $0x50] sm:$0xff] }
 0xa37   : > { %v3416_v14 = vmul.f32 -1.442695, %v2489_v46  ;;  %v1015_v46 = vld [vmem:[%s5510_s17 + $0xe0] sm:$0xff] }
 0xa38   : > { %4175 = vpow2.f32 %v3417_v47  ;;  %v1016_v47 = vld [vmem:[%s5510_s17 + $0xe8] sm:$0xff] }
 0xa39   : > { %4177 = vpow2.f32 %v3416_v14  ;;  %v4011_v14 = vpack.c.bf16 %v998_v45, %v997_v40  ;;  %v1021_v45 = vld [vmem:[%s5510_s17 + $0x110] sm:$0xff] }
 0xa42   : > { %v4176_v49 = vpop.eup %4175 }
 0xa43   : > { %v4178_v51 = vpop.eup %4177  ;;  %v2504_v55 = vadd.f32 1.0, %v4176_v49  ;;  %v4013_v49 = vpack.c.bf16 %v1016_v47, %v1015_v46  ;;  %v1022_v46 = vld [vmem:[%s5510_s17 + $0x118] sm:$0xff] }
 0xa44   : > { %v2503_v56 = vadd.f32 1.0, %v4178_v51  ;;  %v999_v51 = vld [vmem:[%s5510_s17 + $0x60] sm:$0xff] }
 0xa46   : > { %4179 = vrcp.f32 %v2503_v56  ;;  %v2702_v56 = vpop.permute.xlu1 %2701 }
 0xa47   : > { %4181 = vrcp.f32 %v2504_v55  ;;  %v1000_v55 = vld [vmem:[%s5510_s17 + $0x68] sm:$0xff]  ;;  %v2744_v11 = vsel %vm1466_vm5, %v2702_v56, %v2708_v61  ;;  %v2742_v22 = vsel %vm1695_vm7, %v5048_v48, %v2702_v56  ;;  %v1023_v56 = vld [vmem:[%s5510_s17 + $0x120] sm:$0xff] }
 0xa48   : > { %v4015_v8 = vpack.c.bf16 %v1000_v55, %v999_v51  ;;  %v2760_v23 = vmul.f32 %v2742_v22, %v4752_v1  ;;  %v4027_v51 = vpack.c.bf16 %v1022_v46, %v1021_v45  ;;  %v1045_v22 = vld [vmem:[%s5510_s17 + $0x1d0] sm:$0xff] }
 0xa50   : > { %v4180_v6 = vpop.eup %4179 }
 0xa51   : > { %v4182_v13 = vpop.eup %4181  ;;  %3804 = vmatprep.mubr.msk.f32.mxu0 %vm1466_vm5, %v4180_v6  ;;  %v1052_v6 = vld [vmem:[%s5510_s17 + $0x208] sm:$0xff] }
 0xa52   : > { %3805 = vmatmul.mubr.msk.f32.vlgmr.msra.gmra.mrb[18].mxu0 %vm1466_vm5, %v4182_v13 }
 0xa53   : > { %3992 = vmatpush3.bf16.msra.mxu0 %v3991_v19  ;;  %2835 = vmatprep.mubr.f32.mxu0 %v2756_v17  ;;  %v1051_v19 = vld [vmem:[%s5510_s17 + $0x200] sm:$0xff]  ;;  %v2741_v17 = vsel %vm1695_vm7, %v5040_v20, %v5095_v58  ;;  %v2736_v58 = vpop.permute.xlu0 %2735 }
 0xa54   : > { %3994 = vmatprep.subr.bf16.mxu0 %v3993_v10  ;;  %v5202_v10 = vpop.permute.xlu1 %2713  ;;  %v4053_v13 = vpack.c.bf16 %v1052_v6, %v1051_v19  ;;  %v1026_v19 = vld [vmem:[%s5510_s17 + $0x138] sm:$0xff] }
 0xa57   : > { %3996 = vmatpush3.bf16.msra.mxu0 %v3995_v50  ;;  %v2746_v50 = vsel %vm1700_vm6, %v2744_v11, %v5202_v10  ;;  %v1043_v11 = vld [vmem:[%s5510_s17 + $0x1c0] sm:$0xff] }
 0xa58   : > { %3998 = vmatprep.subr.bf16.mxu0 %v3997_v54  ;;  %v2755_v54 = vmul.f32 %v2741_v17, %v4730_v21  ;;  %v2761_v20 = vmul.f32 %v2746_v50, %v4744_v25  ;;  %v5221_v24 = vpop.permute.xlu1 %2737  ;;  %v3418_v25 = vld [vmem:[%s5512_s6] ss:$0 sm:$0xff]  ;;  %v4035_v17 = vpack.c.bf16 %v1026_v19, %v1025_v18  ;;  %s3368_s6 = sld [smem:[#allocation3 + $0x80]] }
 0xa59   : > { %v2764_v21 = vmul.f32 %v5221_v24, %v4767_v36  ;;  %v1035_v36 = vld [vmem:[%s5510_s17 + $0x180] sm:$0xff] }
 0xa5a   : > { %v1027_v50 = vld [vmem:[%s5510_s17 + $0x140] sm:$0xff] }
 0xa5b   : > { %4000 = vmatpush3.bf16.msra.mxu0 %v3999_v26  ;;  %v2759_v26 = vmul.f32 %v2736_v58, %v4760_v30 }
 0xa5c   : > { %4002 = vmatprep.subr.bf16.mxu0 %v4001_v27 }
 0xa5f   : > { %4004 = vmatpush3.bf16.msra.mxu0 %v4003_v5  ;;  %v2730_v5 = vpop.permute.xlu1 %2729 }
 0xa60   : > { %4006 = vmatprep.subr.bf16.mxu0 %v4005_v2  ;;  %v5241_v2 = vpop.permute.xlu0 %2723 }
 0xa63   : > { %4008 = vmatpush3.bf16.msra.mxu0 %v4007_v15  ;;  %v1038_v15 = vld [vmem:[%s5510_s17 + $0x198] sm:$0xff] }
 0xa64   : > { %4010 = vmatprep.subr.bf16.mxu0 %v4009_v35  ;;  %v4023_v35 = vpack.c.bf16 %v1020_v38, %v1019_v33  ;;  %v4025_v40 = vpack.c.bf16 %v1038_v15, %v1037_v39  ;;  %v1033_v33 = vld [vmem:[%s5510_s17 + $0x170] sm:$0xff]  ;;  %v1034_v38 = vld [vmem:[%s5510_s17 + $0x178] sm:$0xff] }
 0xa67   : > { %4012 = vmatpush3.bf16.msra.mxu0 %v4011_v14  ;;  %v1039_v14 = vld [vmem:[%s5510_s17 + $0x1a0] sm:$0xff] }
 0xa68   : > { %4014 = vmatprep.subr.bf16.mxu0 %v4013_v49  ;;  %v1040_v49 = vld [vmem:[%s5510_s17 + $0x1a8] sm:$0xff] }
 0xa69   : > { %v4029_v55 = vpack.c.bf16 %v1040_v49, %v1039_v14 }
 0xa6b   : > { %4016 = vmatpush3.bf16.msra.mxu0 %v4015_v8 }
 0xa6c   : > { %4018 = vmatprep.subr.bf16.mxu0 %v4017_v62 }
 0xa6f   : > { %4020 = vmatpush3.bf16.msra.mxu0 %v4019_v12  ;;  %v1044_v12 = vld [vmem:[%s5510_s17 + $0x1c8] sm:$0xff] }
 0xa70   : > { %4054 = vmatprep.subr.bf16.mxu0 %v4053_v13  ;;  %v4037_v37 = vpack.c.bf16 %v1044_v12, %v1043_v11 }
 0xa72   : > { %2836 = vmatmul.mubr.f32.vlgmr.msra.gmra.mrb[20].mxu0 %v2755_v54  ;;  %v1028_v54 = vld [vmem:[%s5510_s17 + $0x148] sm:$0xff] }
 0xa73   : > { %2840 = vmatprep.mubr.f32.mxu0 %v2761_v20  ;;  %4056 = vmatpush3.bf16.msra.mxu0 %v4053_v13  ;;  %v1046_v20 = vld [vmem:[%s5510_s17 + $0x1d8] sm:$0xff] }
 0xa74   : > { %4058 = vmatprep.subr.bf16.mxu0 %v4057_v16 }
 0xa76   : > { %2841 = vmatmul.mubr.f32.gmra.mrb[22].mxu0 %v2760_v23  ;;  %v4039_v23 = vpack.c.bf16 %v1028_v54, %v1027_v50  ;;  %v1061_v50 = vld [vmem:[%s5514_s22 + $0x20] sm:$0x3] }
 0xa77   : > { %4060 = vmatpush3.bf16.msra.mxu0 %v4057_v16  ;;  %3822 = vmatprep.mubr.msk.f32.mxu0 %vm1724_vm8, %v2759_v26 }
 0xa78   : > { %4062 = vmatprep.subr.bf16.mxu0 %v4998_v57 }
 0xa7a   : > { %3823 = vmatmul.mubr.msk.f32.vlgmr.msra.gmra.mrb[24].mxu0 %vm1724_vm8, %v2764_v21  ;;  %v4041_v21 = vpack.c.bf16 %v1046_v20, %v1045_v22 }
 0xa7b   : > { %4064 = vmatpush3.bf16.msra.mxu0 %v4998_v57  ;;  %v1036_v57 = vld [vmem:[%s5510_s17 + $0x188] sm:$0xff] }
 0xa7c   : > { %v4021_v9 = vpack.c.bf16 %v1036_v57, %v1035_v36  ;;  %v1031_v36 = vld [vmem:[%s5510_s17 + $0x160] sm:$0xff]  ;;  %v1032_v57 = vld [vmem:[%s5510_s17 + $0x168] sm:$0xff] }
 0xb25   : > { %v3806_v1 = vpop.f32.mrb[18].mxu0 }
 0xb26   : > { %v2593_v48 = vadd.f32 %v3806_v1, %v3418_v25  ;;  %v2587_v30 = vpop.f32.mrb[19].mxu0  ;;  %v1030_v1 = vld [vmem:[%s5510_s17 + $0x158] sm:$0xff] }
 0xb27   : > { %v2588_v27 = vadd.f32 %v3418_v25, %v2587_v30  ;;  %v1029_v25 = vld [vmem:[%s5510_s17 + $0x150] sm:$0xff]  ;;  %v1048_v30 = vld [vmem:[%s5510_s17 + $0x1e8] sm:$0xff] }
 0xb28   : > { %v2597_v34 = vmul.f32 %v2593_v48, %v4782_v41  ;;  %v1047_v48 = vld [vmem:[%s5510_s17 + $0x1e0] sm:$0xff] }
 0xb29   : > { %v2596_v29 = vmul.f32 %v2588_v27, %v4784_v43  ;;  %v2751_v43 = vsel %vm1708_vm10, %v5241_v2, %v2730_v5  ;;  %v2718_v27 = vpop.permute.xlu0 %2717  ;;  %v1050_v5 = vld [vmem:[%s5510_s17 + $0x1f8] sm:$0xff] }
 0xb2a   : > { %4183 = vtanh.f32 %v2597_v34  ;;  %v2753_v52 = vsel %vm1711_vm11, %v2751_v43, %v2736_v58  ;;  %v4043_v34 = vpack.c.bf16 %v1030_v1, %v1029_v25  ;;  %v2747_v39 = vsel %vm1091_vm1, %v5097_v60, %v2718_v27 }
 0xb2b   : > { %4185 = vtanh.f32 %v2596_v29  ;;  %v2758_v47 = vmul.f32 %v2753_v52, %v4825_v63  ;;  %v1024_v63 = vld [vmem:[%s5510_s17 + $0x128] sm:$0xff]  ;;  %v4045_v29 = vpack.c.bf16 %v1048_v30, %v1047_v48 }
 0xb2c   : > { %v4031_v61 = vpack.c.bf16 %v1024_v63, %v1023_v56 }
 0xb34   : > { %v4184_v4 = vpop.eup %4183 }
 0xb35   : > { %v4186_v31 = vpop.eup %4185 }
 0xb36   : > { %3811 = vmatprep.mubr.msk.f32.mxu1 %vm1466_vm5, %v4186_v31  ;;  %v3983_v41 = vpack.c.bf16 %v4184_v4, %v4186_v31  ;;  %v1049_v31 = vld [vmem:[%s5510_s17 + $0x1f0] sm:$0xff] }
 0xb37   : > { %v4049_v43 = vpack.c.bf16 %v1050_v5, %v1049_v31  ;;  %v3182_v5 = vsub.f32 1.0, %v4978_v42 }
 0xb38   : > { %3985 = vmatprep.subr.msk.bf16.mxu1 %vm4796_vm9, %v3983_v41 }
 0xb39   : > { %3988 = vmatpush3.bf16.xpose.msk.msra.mxu1 %vm4796_vm9, %v3983_v41  ;;  %v4047_v41 = vpack.c.bf16 %v1032_v57, %v1031_v36 }
 0xb3a   : > { %4022 = vmatprep.subr.bf16.mxu1 %v4021_v9  ;;  %v2732_v9 = vpop.permute.xlu0 %2731 }
 0xb3e   : > { %v3174_v31 = vpop.permute.xlu0 %3173 }
 0xb40   : > { %3812 = vmatmul.mubr.msk.f32.vlgmr.msra.gmra.mrb[16].mxu1 %vm1466_vm5, %v4184_v4  ;;  %v2726_v4 = vpop.permute.xlu1 %2725 }
 0xb41   : > { %4024 = vmatpush3.bf16.msra.mxu1 %v4023_v35  ;;  %2910 = vmatprep.mubr.f32.mxu1 %v2758_v47  ;;  %v2752_v52 = vsel %vm1708_vm10, %v2726_v4, %v2732_v9  ;;  %v4051_v35 = vpack.c.bf16 %v1034_v38, %v1033_v33  ;;  %v3181_v9 = vsub.f32 1.0, %v4980_v44 }
 0xb42   : > { %4026 = vmatprep.subr.bf16.mxu1 %v4025_v40  ;;  %v2749_v40 = vsel %vm1705_vm12, %v2747_v39, %v5241_v2  ;;  %v2754_v46 = vsel %vm1711_vm11, %v2752_v52, %v5221_v24  ;;  %v1057_v2 = vld [vmem:[%s5513_s30] sm:$0xff]  ;;  %v3179_v39 = vmul.f32 %v4980_v44, %v3174_v31 }
 0xb43   : > { %v2757_v47 = vmul.f32 %v2749_v40, %v4921_v28  ;;  %v2763_v14 = vmul.f32 %v2754_v46, %v4932_v32  ;;  %v1059_v28 = vld [vmem:[%s5514_s22 + $0x10] sm:$0xff]  ;;  %v1060_v32 = vld [vmem:[%s5514_s22 + $0x18] sm:$0xff] }
 0xb44   : > { %v2720_v15 = vpop.permute.xlu1 %2719 }
 0xb45   : > { %v3618_v8 = vpop.f32.mrb[20].mxu0  ;;  %4028 = vmatpush3.bf16.msra.mxu1 %v4027_v51  ;;  %v2748_v45 = vsel %vm1091_vm1, %v5202_v10, %v2720_v15  ;;  %v1058_v10 = vld [vmem:[%s5514_s22 + $0x8] sm:$0xff]  ;;  %v4069_v51 = vpack.c.bf16 %v1060_v32, %v1059_v28 }
 0xb46   : > { %v3619_v62 = vpop.f32.mrb[21].mxu0  ;;  %4030 = vmatprep.subr.bf16.mxu1 %v4029_v55  ;;  %v2750_v60 = vsel %vm1705_vm12, %v2748_v45, %v2726_v4  ;;  %v4065_v24 = vpack.c.bf16 %v1058_v10, %v1057_v2 }
 0xb47   : > { %v5295_v6 = vadd.f32 %v3619_v62, %v3618_v8  ;;  %v2762_v49 = vmul.f32 %v2750_v60, %v4940_v53 }
 0xb48   : > { %v3176_v4 = vpop.permute.xlu1 %3175 }
 0xb49   : > { %v3621_v13 = vpop.f32.mrb[22].mxu0  ;;  %4032 = vmatpush3.bf16.msra.mxu1 %v4031_v61 }
 0xb4a   : > { %v3622_v3 = vpop.f32.mrb[23].mxu0  ;;  %4034 = vmatprep.subr.bf16.mxu1 %v4033_v0 }
 0xb4b   : > { %v5309_v16 = vadd.f32 %v3622_v3, %v3621_v13 }
 0xb4d   : > { %v5317_v58 = vpop.f32.mrb[24].mxu0  ;;  %4036 = vmatpush3.bf16.msra.mxu1 %v4035_v17 }
 0xb4e   : > { %v5319_v26 = vpop.f32.mrb[25].mxu0  ;;  %4038 = vmatprep.subr.bf16.mxu1 %v4037_v37 }
 0xb51   : > { %4040 = vmatpush3.bf16.msra.mxu1 %v4039_v23 }
 0xb52   : > { %4042 = vmatprep.subr.bf16.mxu1 %v4041_v21 }
 0xb55   : > { %4044 = vmatpush3.bf16.msra.mxu1 %v4043_v34 }
 0xb56   : > { %4046 = vmatprep.subr.bf16.mxu1 %v4045_v29 }
 0xb59   : > { %4048 = vmatpush3.bf16.msra.mxu1 %v4047_v41 }
 0xb5a   : > { %4050 = vmatprep.subr.bf16.mxu1 %v4049_v43  ;;  %v3180_v43 = vmul.f32 %v4978_v42, %v3176_v4 }
 0xb5d   : > { %4052 = vmatpush3.bf16.msra.mxu1 %v4051_v35 }
 0xb5e   : > { %4066 = vmatprep.subr.bf16.mxu1 %v4065_v24 }
 0xb60   : > { %2911 = vmatmul.mubr.f32.vlgmr.msra.gmra.mrb[18].mxu1 %v2757_v47 }
 0xb61   : > { %2915 = vmatprep.mubr.f32.mxu1 %v2763_v14  ;;  %4068 = vmatpush3.bf16.msra.mxu1 %v4065_v24 }
 0xb62   : > { %4070 = vmatprep.subr.bf16.mxu1 %v4069_v51 }
 0xb64   : > { %2916 = vmatmul.mubr.f32.gmra.mrb[20].mxu1 %v2762_v49 }
 0xb65   : > { %4072 = vmatpush3.bf16.msra.mxu1 %v4069_v51 }
 0xb66   : > { %3840 = vmatprep.subr.msk.mxu1 %vm1267_vm3, %v1061_v50 }
 0xb69   : > { %3841 = vmatpush3.msk.msra.mxu1 %vm1267_vm3, %v1061_v50 }
 0xc13   : > { %v3813_v53 = vpop.f32.mrb[16].mxu1 }
 0xc14   : > { %v2682_v55 = vmul.f32 3.0, %v3813_v53  ;;  %v2672_v56 = vpop.f32.mrb[17].mxu1 }
 0xc15   : > { %v2681_v63 = vmul.f32 3.0, %v2672_v56 }
 0xc16   : > { %4187 = vtanh.f32 %v2682_v55 }
 0xc17   : > { %4189 = vtanh.f32 %v2681_v63 }
 0xc20   : > { %v4188_v59 = vpop.eup %4187 }
 0xc21   : > { %v4190_v7 = vpop.eup %4189  ;;  %v2686_v61 = vmax.f32 %v4188_v59, 0.0 }
 0xc22   : > { %v2685_v8 = vmax.f32 %v4190_v7, 0.0 }
 0xc24   : > { %3829 = vmatprep.mubr.msk.f32.mxu0 %vm1091_vm1, %v2685_v8 }
 0xc25   : > { %3830 = vmatmul.mubr.msk.f32.vlgmr.msra.gmra.mrb[26].mxu0 %vm1091_vm1, %v2686_v61 }
 0xc33   : > { %v3656_v62 = vpop.f32.mrb[18].mxu1 }
 0xc34   : > { %v3657_v0 = vpop.f32.mrb[19].mxu1 }
 0xc35   : > { %v3658_v18 = vadd.f32 %v3657_v0, %v3656_v62 }
 0xc37   : > { %v2913_v19 = vadd.f32 %v3658_v18, %v5295_v6  ;;  %v3659_v11 = vpop.f32.mrb[20].mxu1  ;;  %v1056_v6 = vld [vmem:[%s5515_s7 + $0x8] sm:$0xff] }
 0xc38   : > { %v3660_v12 = vpop.f32.mrb[21].mxu1 }
 0xc39   : > { %v2988_v13 = vadd.f32 %v5319_v26, %v2913_v19  ;;  %v3661_v17 = vadd.f32 %v3660_v12, %v3659_v11  ;;  %v3163_v26 = vstv %s3368_s6 }
 0xc3b   : > { %v2918_v3 = vadd.f32 %v3661_v17, %v5309_v16  ;;  %v1055_v16 = vld [vmem:[%s5516_s0] sm:$0xff] }
 0xc3c   : > { %v2996_v23 = vadd.f32 %v2988_v13, %v1055_v16 }
 0xc3d   : > { %v2993_v37 = vadd.f32 %v5317_v58, %v2918_v3  ;;  %v3166_v58 = vstv %s3369_s18 }
 0xc3e   : > { %v3164_v30 = vmul.f32 %v3163_v26, %v2996_v23 }
 0xc3f   : > { %v2997_v20 = vadd.f32 %v2993_v37, %v1056_v6 }
 0xc41   : > { %v3165_v25 = vmul.f32 %v3163_v26, %v2997_v20 }
 0xcf8   : > { %v3831_v54 = vpop.f32.mrb[26].mxu0 }
 0xcf9   : > { %v3070_v22 = vpop.f32.mrb[27].mxu0 }
 0xcfa   : > { %3842 = vmatprep.mubr.msk.f32.mxu1 %vm1260_vm4, %v3070_v22 }
 0xcfb   : > { %3843 = vmatmul.mubr.msk.f32.vlgmr.msra.gmra.mrb[22].mxu1 %vm1260_vm4, %v3831_v54 }
 0xdce   : > { %v3844_v21 = vpop.f32.mrb[22].mxu1 }
 0xdcf   : > { %v3168_v1 = vmul.f32 %v3844_v21, %v3166_v58  ;;  %v3154_v48 = vpop.f32.mrb[23].mxu1 }
 0xdd0   : > { %v3167_v27 = vmul.f32 %v3166_v58, %v3154_v48 }
 0xdd1   : > { %v3170_v34 = vadd.f32 %v3168_v1, %v3165_v25 }
 0xdd2   : > { %v3169_v29 = vadd.f32 %v3167_v27, %v3164_v30 }
 0xdd3   : > { %4191 = vtanh.f32 %v3170_v34 }
 0xdd4   : > { %4193 = vtanh.f32 %v3169_v29 }
 0xddd   : > { %v4192_v36 = vpop.eup %4191 }
 0xdde   : > { %v4194_v57 = vpop.eup %4193  ;;  %3187 = vrot.lane.b32.xlu1 %v4192_v36, %s4264_s8 }
 0xddf   : > { %3185 = vrot.lane.b32.xlu0 %v4194_v57, %s4264_s8 }
 0xe50   : > { %v3188_v41 = vpop.permute.xlu1 %3187 }
 0xe51   : > { %v3192_v33 = vmul.f32 %v3188_v41, %v3182_v5  ;;  %v3186_v38 = vpop.permute.xlu0 %3185 }
 0xe52   : > { %v3191_v15 = vmul.f32 %v3186_v38, %v3181_v9 }
 0xe53   : > { %v3194_v52 = vadd.f32 %v3192_v33, %v3180_v43 }
 0xe54   : > { %v3193_v35 = vadd.f32 %v3191_v15, %v3179_v39 }
 0xe55   : > { %3199 = vrot.lane.b32.xlu1 %v3194_v52, %s4265_s27 }
 0xe56   : > { %3197 = vrot.lane.b32.xlu0 %v3193_v35, %s4265_s27 }
 0xec7   : > { %v3200_v40 = vpop.permute.xlu1 %3199 }
 0xec8   : > { %3204 = vst.msk [vmem:[#allocation2 + $0x8] sm:$0xff] %vm1724_vm8, %v3200_v40  ;;  %3206 = vst.msk [vmem:[%s4470_s4 + $0x8] sm:$0xff] %vm1724_vm8, %v3200_v40  ;;  %v3198_v45 = vpop.permute.xlu0 %3197 }
 0xec9   : > { %3203 = vst.msk [vmem:[#allocation2] sm:$0xff] %vm1724_vm8, %v3198_v45  ;;  %3205 = vst.msk [vmem:[%s4470_s4] sm:$0xff] %vm1724_vm8, %v3198_v45 }
 0xeca PF: > { %s5517_s8 = sld [smem:[#allocation8_spill]]  ;;  %s5518_s29 = sld [smem:[#allocation6_spill]] }
 0xecb   : > { %s5519_s2 = sld [smem:[#allocation7_spill]]  ;;  %s5520_s6 = sld [smem:[#allocation9_spill]] }
 0xecc   : > { %s5521_s30 = sld [smem:[#allocation10_spill]] }
 0xed0   : > { %s36_s7 = sadd.s32 1, %s5517_s8  }
 0xed1   : > { %p33_p5 = scmp.ge.s32.totalorder %s36_s7, 10  }
 0xed3   :  { %35 = sbr.rel (!%p33_p5) target bundleno = 21 (0x15), region = 165 }
 0xeda   :  { %3236 = vsyncpa [#allocation4], 1 }
 0xedb   :  { %3238 = vsyncpa [#allocation4 + $0x1], 1 }

// kernel: adcrnn_encoder_forward.3
= control target key start
LH: loop header
LB: loop body
LE: loop exit
PB: predicated region body
PF: predicated region fallthrough
CT: control target
= control target key end

     0   :  { %s6233_s0 = inlined_call_operand.vmem [shape: f32[4,2,16,32], index: 0, kind: input, shape index: {}]   ;;  %s6234_s1 = inlined_call_operand.vmem [shape: f32[4,2,16,8], index: 1, kind: input, shape index: {}]   ;;  %s6235_s2 = inlined_call_operand.vmem [shape: f32[2,16,32], index: 2, kind: input, shape index: {}]   ;;  %s6236_s3 = inlined_call_operand.vmem [shape: f32[16,16], index: 3, kind: input, shape index: {}]   ;;  %s6237_s4 = inlined_call_operand.vmem [shape: f32[16,16], index: 4, kind: input, shape index: {}]   ;;  %s6238_s5 = inlined_call_operand.vmem [shape: f32[16,1024], index: 5, kind: input, shape index: {}]   ;;  %s6239_s6 = inlined_call_operand.vmem [shape: f32[2,2], index: 6, kind: input, shape index: {}]   ;;  %s6240_s7 = inlined_call_operand.vmem [shape: f32[1024,64], index: 7, kind: input, shape index: {}]   ;;  %s6241_s8 = inlined_call_operand.vmem [shape: f32[16,64], index: 8, kind: input, shape index: {}]   ;;  %s6242_s9 = inlined_call_operand.vmem [shape: f32[64,64], index: 9, kind: input, shape index: {}]   ;;  %s6243_s10 = inlined_call_operand.vmem [shape: f32[64,64], index: 10, kind: input, shape index: {}]   ;;  %s6244_s11 = inlined_call_operand.vmem [shape: f32[1,64], index: 11, kind: input, shape index: {}]   ;;  %s6245_s12 = inlined_call_operand.vmem [shape: f32[64,8], index: 12, kind: input, shape index: {}]   ;;  %s6246_s13 = inlined_call_operand.vmem [shape: f32[1,8], index: 13, kind: input, shape index: {}]   ;;  %s6247_s14 = inlined_call_operand.vmem [shape: f32[8,8], index: 14, kind: input, shape index: {}]   ;;  %s6248_s15 = inlined_call_operand.vmem [shape: f32[1,8], index: 15, kind: input, shape index: {}]   ;;  %s6249_s16 = inlined_call_operand.vmem [shape: f32[1024,32], index: 16, kind: input, shape index: {}]   ;;  %s6250_s17 = inlined_call_operand.vmem [shape: f32[16,32], index: 17, kind: input, shape index: {}]   ;;  %s6251_s18 = inlined_call_operand.vmem [shape: f32[64,32], index: 18, kind: input, shape index: {}]   ;;  %s6252_s19 = inlined_call_operand.vmem [shape: f32[64,64], index: 19, kind: input, shape index: {}]   ;;  %s6253_s20 = inlined_call_operand.vmem [shape: f32[1,64], index: 20, kind: input, shape index: {}]   ;;  %s6254_s21 = inlined_call_operand.vmem [shape: f32[64,8], index: 21, kind: input, shape index: {}]   ;;  %s6255_s22 = inlined_call_operand.vmem [shape: f32[1,8], index: 22, kind: input, shape index: {}]   ;;  %s6256_s23 = inlined_call_operand.vmem [shape: f32[8,8], index: 23, kind: input, shape index: {}]   ;;  %s6257_s24 = inlined_call_operand.vmem [shape: f32[1,8], index: 24, kind: input, shape index: {}]   ;;  %s6258_s25 = inlined_call_operand.vmem [shape: f32[4,2,16,32], index: 25, kind: output, shape index: {}]  }
   0x1   :  { %6271 = sst [smem:[#allocation11_spill]] %s6233_s0 }
   0x2   :  { %6272 = sst [smem:[#allocation12_spill]] %s6234_s1 }
   0x3   :  { %6273 = sst [smem:[#allocation13_spill]] %s6235_s2 }
   0x4   :  { %6274 = sst [smem:[#allocation14_spill]] %s6236_s3 }
   0x5   :  { %6275 = sst [smem:[#allocation15_spill]] %s6237_s4 }
   0x6   :  { %6276 = sst [smem:[#allocation16_spill]] %s6238_s5 }
   0x7   :  { %6277 = sst [smem:[#allocation17_spill]] %s6239_s6 }
   0x8   :  { %6278 = sst [smem:[#allocation18_spill]] %s6240_s7 }
   0x9   :  { %6279 = sst [smem:[#allocation19_spill]] %s6241_s8 }
   0xa   :  { %6280 = sst [smem:[#allocation20_spill]] %s6242_s9 }
   0xb   :  { %6281 = sst [smem:[#allocation21_spill]] %s6249_s16 }
   0xc   :  { %6282 = sst [smem:[#allocation22_spill]] %s6250_s17 }
   0xd   :  { %6283 = sst [smem:[#allocation23_spill]] %s6251_s18 }
   0xe   :  { %6284 = sst [smem:[#allocation24_spill]] %s6255_s22 }
   0xf   :  { %6285 = sst [smem:[#allocation25_spill]] %s6256_s23 }
  0x10   :  { %6286 = sst [smem:[#allocation26_spill]] %s6257_s24 }
  0x11   :  { %30 = vsyncpa [#allocation4], 0  ;;  %s4864_s29 = smov 0   ;;  %s4866_s2 = smov 0  }
  0x12   :  { %s4868_s6 = smov 0   ;;  %s4870_s30 = smov 0  }
  0x13   :  { %s4872_s7 = smov 0  }
  0x14 LB: > { %6287 = sst [smem:[#allocation6_spill]] %s4720_s6  ;;  %s3495_s3 = sadd.s32 4294967295, %s4728_s7   ;;  %s4728_s7 = sphi %s4872_s7, %s36_s7   ;;  %s4724_s30 = sphi %s4870_s30, %s6320_s30   ;;  %s4720_s6 = sphi %s4868_s6, %s6319_s6   ;;  %s4716_s2 = sphi %s4866_s2, %s6318_s2   ;;  %s4712_s29 = sphi %s4864_s29, %s6317_s29  }
  0x15   : > { %6288 = sst [smem:[#allocation7_spill]] %s4724_s30  ;;  %s45_s26 = sadd.s32 1, %s4720_s6 }
  0x16   : > { %6289 = sst [smem:[#allocation8_spill]] %s4728_s7  ;;  %p46_p0 = scmp.ge.s32.totalorder %s45_s26, 4 }
  0x17   : > { %s48_s1 = sadd.s32 1, %s4724_s30  ;;  %p3497_p1 = scmp.ge.s32.totalorder %s4728_s7, 1 }
  0x18   : > { %p625_p2 = scmp.lt.s32.totalorder %s4728_s7, 9  ;;  %s6322_s26 = smov (%p46_p0, %s45_s26), 0 }
  0x19   : > { %6290 = sst [smem:[#allocation9_spill]] %s6322_s26  ;;  %s6324_s1 = smov (!%p46_p0, %s48_s1), %s4724_s30 }
  0x1a   : > { %p4897_p3 = pnand %p3497_p1, %p625_p2  ;;  %p50_p4 = scmp.ge.s32.totalorder %s6324_s1, 2 }
  0x1b   : > { %p4901_p5 = scmp.eq.s32.totalorder %s3495_s3, 0  ;;  %s6293_s9 = sld [smem:[#allocation17_spill]] }
  0x1c   : > { %p4546_p6 = pneg %p4897_p3  ;;  %s6326_s1 = smov (%p50_p4, %s6324_s1), 0 }
  0x1d   : > { %6294 = sst [smem:[#allocation10_spill]] %s6326_s1 }
  0x1e   : > { %p4547_p7 = pnand %p4901_p5, %p4546_p6 }
  0x20   : > { %p4673_p9 = pneg %p4547_p7 }
  0x21   : > { %s647_s5 = sshll.u32 %s6293_s9, 4  ;;  %s648_s5 = int_to_ptr.vmem [resolvable:$true] %s647_s5 }
  0x22   : > { %s4671_s0 = scalar_lea.vmem %s648_s5, 32  ;;  %p4679_p12 = scmp.lt.s32.totalorder %s648_s5, %s648_s5 }
  0x23   : > { %p4672_p8 = scmp.ne.s32.totalorder %s648_s5, %s4671_s0  ;;  %p4680_p13 = scmp.lt.s32.totalorder %s4671_s0, %s4671_s0 }
  0x25   : > { %p4674_p10 = pnand %p4673_p9, %p4672_p8  ;;  %p4681_p0 = por %p4680_p13, %p4679_p12 }
  0x27   : > { %p4675_p11 = pneg %p4674_p10 }
  0x29   : > { %p4682_p1 = pnand %p4681_p0, %p4675_p11 }
  0x2b   : > { %4685 = shalt.err (!%p4682_p1)
}
  0x2c   : > { %s4730_s3 = smov [#allocation3]   ;;  %746 = sbr.rel (%p4897_p3) target bundleno = 3785 (0xec9), region = 120 }
  0x2d   : > { %4549 = dma.vmem_to_smem (!%p4547_p7), %s648_s5, 32, %s4730_s3, [#allocation4]  }
  0x33   : > { %4707 = dma.done.wait (%p4901_p5), [#allocation4], 32  }
  0x34   : > { %4709 = vsyncadd (%p4901_p5), [#allocation4], 4294967264 }
  0x35   : > { %752 = sfence }
  0x36   : > { %p837_p2 = scmp.lt.s32.totalorder %s4712_s29, 3  ;;  %p839_p4 = scmp.lt.s32.totalorder %s4716_s2, 1 }
  0x37   : > { %s6295_s1 = sld [smem:[#allocation13_spill]]  ;;  %s6296_s7 = sld [smem:[#allocation11_spill]] }
  0x38   : > { %s838_s4 = scalar_select %p837_p2, %s4712_s29, 3 }
  0x39   : > { %s6328_s2 = smov (!%p839_p4, %s4716_s2), 1  ;;  %s6297_s22 = sld [smem:[#allocation12_spill]] }
  0x3a   : > { %s3503_s28 = sshll.u32 %s838_s4, 2  ;;  %s3502_s9 = sshll.u32 %s6328_s2, 1 }
  0x3b   : > { %s3571_s5 = sshll.u32 %s6328_s2, 4  ;;  %s843_s8 = sadd.s32 %s3503_s28, %s3502_s9 }
  0x3c   : > { %s3504_s30 = sshll.u32 %s843_s8, 3  ;;  %p3513_p3 = scmp.ne.s32.totalorder %s4712_s29, 0 }
  0x3d   : > { %s859_s26 = scalar_lea.vmem %s6295_s1, %s3571_s5  ;;  %s4930_s17 = scalar_lea.vmem %s6296_s7, %s3504_s30  ;;  %vm875_vm0 = vcmask (!%p3513_p3), 261120  }
  0x3e   : > { %s4940_s2 = scalar_lea.vmem %s6258_s25, %s3504_s30  ;;  %872 = sbr.rel (%p3513_p3) target bundleno = 69 (0x45), region = 128  ;;  %v873_v0 = vld [vmem:[%s859_s26] sm:$0xff] (!%p3513_p3)  ;;  %v874_v1 = vld [vmem:[%s859_s26 + $0x8] sm:$0xff] (!%p3513_p3) }
  0x3f   : > { %s4935_s16 = scalar_lea.vmem %s6297_s22, %s3504_s30  ;;  %876 = vst.msk [vmem:[#allocation2] sm:$0xff] (!%p3513_p3), %vm875_vm0, %v873_v0  ;;  %877 = vst.msk [vmem:[#allocation2 + $0x8] sm:$0xff] (!%p3513_p3), %vm875_vm0, %v874_v1 }
  0x45 PF: > { %vm1235_vm1 = vcmask 130048   ;;  %s4731_s18 = smov 32   ;;  %s6298_s24 = sld [smem:[#allocation14_spill]]  ;;  %vm1232_vm2 = vcmask 261120   ;;  %v878_v7 = vld [vmem:[%s4930_s17] sm:$0xff]  ;;  %v879_v8 = vld [vmem:[%s4930_s17 + $0x8] sm:$0xff] }
  0x46   : > { %v882_v2 = vld [vmem:[#allocation2] sm:$0xff]  ;;  %s6299_s30 = sld [smem:[#allocation15_spill]]  ;;  %v883_v5 = vld [vmem:[#allocation2 + $0x8] sm:$0xff]  ;;  %v1044_v16 = vld [vmem:[%s6243_s10 + $0x10] sm:$0xff]  ;;  %vm1404_vm3 = vcmask 523264   ;;  %s4732_s8 = smov 64  }
  0x47   : > { %1226 = vrot.lane.b32.xlu0 %v882_v2, %s4731_s18  ;;  %v1042_v9 = vld [vmem:[%s6243_s10] sm:$0xff]  ;;  %v1043_v10 = vld [vmem:[%s6243_s10 + $0x8] sm:$0xff]  ;;  %v1045_v17 = vld [vmem:[%s6243_s10 + $0x18] sm:$0xff]  ;;  %vm1603_vm4 = vcmask 64512   ;;  %s6303_s28 = sld [smem:[#allocation16_spill]]  ;;  %s6306_s0 = sld [smem:[#allocation20_spill]] }
  0x48   : > { %v4162_v15 = vpack.c.bf16 %v1043_v10, %v1042_v9  ;;  %v4166_v20 = vpack.c.bf16 %v1045_v17, %v1044_v16  ;;  %v1046_v21 = vld [vmem:[%s6243_s10 + $0x20] sm:$0xff]  ;;  %v1047_v22 = vld [vmem:[%s6243_s10 + $0x28] sm:$0xff]  ;;  %v1048_v24 = vld [vmem:[%s6243_s10 + $0x30] sm:$0xff]  ;;  %s3514_s4 = sld [smem:[#allocation3 + $0x1]]  ;;  %s1220_s22 = sld [smem:[#allocation3]] }
  0x49   : > { %v4170_v23 = vpack.c.bf16 %v1047_v22, %v1046_v21  ;;  %v1049_v25 = vld [vmem:[%s6243_s10 + $0x38] sm:$0xff]  ;;  %v1051_v31 = vld [vmem:[%s6245_s12] sm:$0xff]  ;;  %v1052_v32 = vld [vmem:[%s6245_s12 + $0x8] sm:$0xff]  ;;  %s6307_s6 = sld [smem:[#allocation19_spill]]  ;;  %s6310_s23 = sld [smem:[#allocation21_spill]] }
  0x4a   : > { %v4174_v26 = vpack.c.bf16 %v1049_v25, %v1048_v24  ;;  %v4178_v33 = vpack.c.bf16 %v1052_v32, %v1051_v31  ;;  %v1053_v34 = vld [vmem:[%s6245_s12 + $0x10] sm:$0xff]  ;;  %v1054_v35 = vld [vmem:[%s6245_s12 + $0x18] sm:$0xff]  ;;  %v1055_v37 = vld [vmem:[%s6245_s12 + $0x20] sm:$0xff]  ;;  %s3516_s27 = sld [smem:[#allocation3 + $0x81]] }
  0x4b   : > { %v4947_v3 = vld [vmem:[%s6298_s24] sm:$0xff]  ;;  %1228 = vrot.lane.b32.xlu0 %v883_v5, %s4731_s18  ;;  %v885_v18 = vld [vmem:[%s6298_s24 + $0x8] sm:$0xff]  ;;  %v4182_v36 = vpack.c.bf16 %v1054_v35, %v1053_v34  ;;  %v1057_v39 = vld [vmem:[%s6245_s12 + $0x30] sm:$0xff] }
  0x4c   : > { %s6300_s1 = smov %s6299_s30  ;;  %v886_v4 = vld [vmem:[%s6299_s30] sm:$0xff]  ;;  %3978 = vmatprep.mubr.msk.f32.mxu0 %vm1235_vm1, %v4947_v3  ;;  %v1056_v38 = vld [vmem:[%s6245_s12 + $0x28] sm:$0xff]  ;;  %v1058_v41 = vld [vmem:[%s6245_s12 + $0x38] sm:$0xff]  ;;  %s6301_s30 = sld [smem:[#allocation18_spill]] }
  0x4d   : > { %3985 = vmatprep.mubr.msk.f32.mxu1 %vm1235_vm1, %v886_v4  ;;  %v887_v19 = vld [vmem:[%s6300_s1 + $0x8] sm:$0xff]  ;;  %v4186_v40 = vpack.c.bf16 %v1056_v38, %v1055_v37  ;;  %v4190_v42 = vpack.c.bf16 %v1058_v41, %v1057_v39  ;;  %v3521_v43 = vld [vmem:[%s6244_s11] ss:$0 sm:$0xff]  ;;  %vm5304_vm5 = vmpackc.low %vm1603_vm4, %vm1603_vm4 }
  0x4e   : > { %v1060_v56 = vld [vmem:[%s6247_s14] sm:$0xff] }
  0x4f   : > { %v3526_v60 = vld [vmem:[%s6246_s13] ss:$0 sm:$0xff]  ;;  %s6308_s9 = smov %s6307_s6 }
  0x52   : > { %s6302_s26 = smov %s6301_s30  ;;  %v920_v57 = vld [vmem:[%s6301_s30 + $0x80] sm:$0xff]  ;;  %s6313_s30 = sld [smem:[#allocation23_spill]] }
  0x53   : > { %v921_v58 = vld [vmem:[%s6302_s26 + $0x88] sm:$0xff]  ;;  %v904_v10 = vld [vmem:[%s6302_s26] sm:$0xff]  ;;  %v922_v16 = vld [vmem:[%s6302_s26 + $0x90] sm:$0xff] }
  0x54   : > { %v4200_v59 = vpack.c.bf16 %v921_v58, %v920_v57  ;;  %v923_v17 = vld [vmem:[%s6302_s26 + $0x98] sm:$0xff]  ;;  %v909_v31 = vld [vmem:[%s6302_s26 + $0x28] sm:$0xff]  ;;  %v926_v32 = vld [vmem:[%s6302_s26 + $0xb0] sm:$0xff] }
  0x55   : > { %v4204_v22 = vpack.c.bf16 %v923_v17, %v922_v16  ;;  %v907_v24 = vld [vmem:[%s6302_s26 + $0x18] sm:$0xff]  ;;  %v928_v38 = vld [vmem:[%s6302_s26 + $0xc0] sm:$0xff]  ;;  %v929_v39 = vld [vmem:[%s6302_s26 + $0xc8] sm:$0xff] }
  0x56   : > { %v911_v37 = vld [vmem:[%s6302_s26 + $0x38] sm:$0xff]  ;;  %v4216_v41 = vpack.c.bf16 %v929_v39, %v928_v38  ;;  %v993_v38 = vld [vmem:[%s6302_s26 + $0x2c8] sm:$0xff] }
  0x57   : > { %v935_v57 = vld [vmem:[%s6302_s26 + $0xf8] sm:$0xff] }
  0xb9   : > { %v4956_v6 = vpop.permute.xlu0 %1226 }
  0xba   : > { %v4970_v12 = vsel %vm1232_vm2, %v878_v7, %v4956_v6 }
  0xbd   : > { %v4966_v11 = vpop.permute.xlu0 %1228 }
  0xbe   : > { %v4974_v13 = vsel %vm1232_vm2, %v879_v8, %v4966_v11 }
  0xbf   : > { %v4978_v14 = vpack.c.bf16 %v4974_v13, %v4970_v12 }
  0xc1   : > { %4155 = vmatprep.subr.bf16.mxu0 %v4978_v14  ;;  %4159 = vmatprep.subr.bf16.mxu1 %v4978_v14 }
  0xc2   : > { %4157 = vmatpush3.bf16.msra.mxu0 %v4978_v14  ;;  %4161 = vmatpush3.bf16.msra.mxu1 %v4978_v14 }
  0xc3   : > { %4163 = vmatprep.subr.bf16.mxu0 %v4162_v15  ;;  %4179 = vmatprep.subr.bf16.mxu1 %v4178_v33 }
  0xc5   : > { %3979 = vmatmul.mubr.msk.f32.vlgmr.msra.gmra.mrb[0].mxu0 %vm1235_vm1, %v885_v18  ;;  %3986 = vmatmul.mubr.msk.f32.vlgmr.msra.gmra.mrb[0].mxu1 %vm1235_vm1, %v887_v19  ;;  %v889_v19 = vld [vmem:[%s6303_s28 + $0x8] sm:$0xff] }
  0xc6   : > { %4165 = vmatpush3.bf16.msra.mxu0 %v4162_v15  ;;  %4181 = vmatpush3.bf16.msra.mxu1 %v4178_v33  ;;  %v905_v15 = vld [vmem:[%s6302_s26 + $0x8] sm:$0xff]  ;;  %v927_v33 = vld [vmem:[%s6302_s26 + $0xb8] sm:$0xff] }
  0xc7   : > { %4167 = vmatprep.subr.bf16.mxu0 %v4166_v20  ;;  %4183 = vmatprep.subr.bf16.mxu1 %v4182_v36  ;;  %v4212_v35 = vpack.c.bf16 %v927_v33, %v926_v32  ;;  %v991_v32 = vld [vmem:[%s6302_s26 + $0x2b8] sm:$0xff] }
  0xca   : > { %4169 = vmatpush3.bf16.msra.mxu0 %v4166_v20  ;;  %4185 = vmatpush3.bf16.msra.mxu1 %v4182_v36  ;;  %v4202_v20 = vpack.c.bf16 %v905_v15, %v904_v10  ;;  %v910_v36 = vld [vmem:[%s6302_s26 + $0x30] sm:$0xff]  ;;  %v897_v15 = vld [vmem:[%s6303_s28 + $0x48] sm:$0xff] }
  0xcb   : > { %4171 = vmatprep.subr.bf16.mxu0 %v4170_v23  ;;  %4187 = vmatprep.subr.bf16.mxu1 %v4186_v40 }
  0xce   : > { %4173 = vmatpush3.bf16.msra.mxu0 %v4170_v23  ;;  %4189 = vmatpush3.bf16.msra.mxu1 %v4186_v40  ;;  %v906_v23 = vld [vmem:[%s6302_s26 + $0x10] sm:$0xff]  ;;  %v4214_v40 = vpack.c.bf16 %v911_v37, %v910_v36  ;;  %v975_v36 = vld [vmem:[%s6302_s26 + $0x238] sm:$0xff]  ;;  %v992_v37 = vld [vmem:[%s6302_s26 + $0x2c0] sm:$0xff] }
  0xcf   : > { %4175 = vmatprep.subr.bf16.mxu0 %v4174_v26  ;;  %4191 = vmatprep.subr.bf16.mxu1 %v4190_v42 }
  0xd2   : > { %4177 = vmatpush3.bf16.msra.mxu0 %v4174_v26  ;;  %4193 = vmatpush3.bf16.msra.mxu1 %v4190_v42  ;;  %v924_v26 = vld [vmem:[%s6302_s26 + $0xa0] sm:$0xff] }
  0xd3   : > { %4026 = vmatprep.subr.mxu0 %v1060_v56  ;;  %v912_v42 = vld [vmem:[%s6302_s26 + $0x40] sm:$0xff] }
 0x198   : > { %v3980_v27 = vpop.f32.mrb[0].mxu0  ;;  %v3987_v28 = vpop.f32.mrb[0].mxu1 }
 0x199   : > { %v1308_v29 = vpop.f32.mrb[1].mxu0  ;;  %v1389_v30 = vpop.f32.mrb[1].mxu1 }
 0x19a   : > { %1780 = vrot.lane.b32.xlu1 %v1389_v30, %s4732_s8  ;;  %4004 = vmatprep.mubr.msk.f32.mxu0 %vm1404_vm3, %v1308_v29  ;;  %v908_v30 = vld [vmem:[%s6302_s26 + $0x20] sm:$0xff] }
 0x19b   : > { %4005 = vmatmul.mubr.msk.f32.vlgmr.msra.gmra.mrb[2].mxu0 %vm1404_vm3, %v3980_v27  ;;  %v925_v27 = vld [vmem:[%s6302_s26 + $0xa8] sm:$0xff]  ;;  %v4210_v34 = vpack.c.bf16 %v909_v31, %v908_v30  ;;  %v990_v31 = vld [vmem:[%s6302_s26 + $0x2b0] sm:$0xff] }
 0x19c   : > { %4027 = vmatpush3.msra.mxu0 %v1060_v56  ;;  %v4208_v29 = vpack.c.bf16 %v925_v27, %v924_v26  ;;  %v934_v56 = vld [vmem:[%s6302_s26 + $0xf0] sm:$0xff] }
 0x19d   : > { %4201 = vmatprep.subr.bf16.mxu0 %v4200_v59  ;;  %v4228_v59 = vpack.c.bf16 %v935_v57, %v934_v56  ;;  %v999_v56 = vld [vmem:[%s6302_s26 + $0x2f8] sm:$0xff] }
 0x19e   : > { %1782 = vrot.lane.b32.xlu1 %v3987_v28, %s4732_s8  ;;  %v4206_v28 = vpack.c.bf16 %v907_v24, %v906_v23  ;;  %v988_v23 = vld [vmem:[%s6302_s26 + $0x2a0] sm:$0xff]  ;;  %v989_v24 = vld [vmem:[%s6302_s26 + $0x2a8] sm:$0xff] }
 0x19f   : > { %v4272_v27 = vpack.c.bf16 %v989_v24, %v988_v23 }
 0x20c   : > { %v1781_v9 = vpop.permute.xlu1 %1780 }
 0x20d   : > { %v5069_v18 = vsel %vm1404_vm3, %v4970_v12, %v1781_v9  ;;  %v987_v9 = vld [vmem:[%s6302_s26 + $0x298] sm:$0xff] }
 0x20e   : > { %v1789_v12 = vmul.f32 %v5069_v18, %v889_v19 }
 0x26e   : > { %v4006_v44 = vpop.f32.mrb[2].mxu0 }
 0x26f   : > { %v1483_v45 = vadd.f32 %v4006_v44, %v3521_v43  ;;  %v1477_v46 = vpop.f32.mrb[3].mxu0  ;;  %v930_v44 = vld [vmem:[%s6302_s26 + $0xd0] sm:$0xff] }
 0x270   : > { %v1478_v47 = vadd.f32 %v3521_v43, %v1477_v46  ;;  %v913_v43 = vld [vmem:[%s6302_s26 + $0x48] sm:$0xff] }
 0x271   : > { %v3525_v48 = vmul.f32 -1.442695, %v1483_v45  ;;  %v931_v45 = vld [vmem:[%s6302_s26 + $0xd8] sm:$0xff]  ;;  %v4218_v46 = vpack.c.bf16 %v913_v43, %v912_v42  ;;  %v977_v42 = vld [vmem:[%s6302_s26 + $0x248] sm:$0xff]  ;;  %v994_v43 = vld [vmem:[%s6302_s26 + $0x2d0] sm:$0xff] }
 0x272   : > { %v3524_v49 = vmul.f32 -1.442695, %v1478_v47  ;;  %v4220_v47 = vpack.c.bf16 %v931_v45, %v930_v44  ;;  %v995_v44 = vld [vmem:[%s6302_s26 + $0x2d8] sm:$0xff] }
 0x273   : > { %4596 = vpow2.f32 %v3525_v48  ;;  %v914_v48 = vld [vmem:[%s6302_s26 + $0x50] sm:$0xff] }
 0x274   : > { %4598 = vpow2.f32 %v3524_v49  ;;  %v915_v49 = vld [vmem:[%s6302_s26 + $0x58] sm:$0xff] }
 0x27d   : > { %v4597_v50 = vpop.eup %4596 }
 0x27e   : > { %v4599_v51 = vpop.eup %4598  ;;  %v1493_v52 = vadd.f32 1.0, %v4597_v50  ;;  %v932_v50 = vld [vmem:[%s6302_s26 + $0xe0] sm:$0xff] }
 0x27f   : > { %v1492_v53 = vadd.f32 1.0, %v4599_v51  ;;  %v933_v51 = vld [vmem:[%s6302_s26 + $0xe8] sm:$0xff] }
 0x281   : > { %4600 = vrcp.f32 %v1492_v53  ;;  %v4224_v53 = vpack.c.bf16 %v933_v51, %v932_v50  ;;  %v997_v50 = vld [vmem:[%s6302_s26 + $0x2e8] sm:$0xff] }
 0x282   : > { %4602 = vrcp.f32 %v1493_v52  ;;  %v4222_v52 = vpack.c.bf16 %v915_v49, %v914_v48  ;;  %v979_v48 = vld [vmem:[%s6302_s26 + $0x258] sm:$0xff]  ;;  %v996_v49 = vld [vmem:[%s6302_s26 + $0x2e0] sm:$0xff] }
 0x28b   : > { %v4601_v54 = vpop.eup %4600 }
 0x28c   : > { %v4603_v55 = vpop.eup %4602  ;;  %4023 = vmatprep.mubr.msk.f32.mxu1 %vm1404_vm3, %v4601_v54  ;;  %v916_v54 = vld [vmem:[%s6302_s26 + $0x60] sm:$0xff] }
 0x28d   : > { %4024 = vmatmul.mubr.msk.f32.vlgmr.msra.gmra.mrb[2].mxu1 %vm1404_vm3, %v4603_v55  ;;  %v917_v55 = vld [vmem:[%s6302_s26 + $0x68] sm:$0xff] }
 0x28e   : > { %v4226_v58 = vpack.c.bf16 %v917_v55, %v916_v54  ;;  %v981_v54 = vld [vmem:[%s6302_s26 + $0x268] sm:$0xff]  ;;  %v998_v55 = vld [vmem:[%s6302_s26 + $0x2f0] sm:$0xff] }
 0x360   : > { %v4025_v61 = vpop.f32.mrb[2].mxu1 }
 0x361   : > { %v1582_v62 = vadd.f32 %v4025_v61, %v3526_v60  ;;  %v1576_v63 = vpop.f32.mrb[3].mxu1  ;;  %v919_v61 = vld [vmem:[%s6302_s26 + $0x78] sm:$0xff] }
 0x362   : > { %v1577_v0 = vadd.f32 %v3526_v60, %v1576_v63  ;;  %v918_v60 = vld [vmem:[%s6302_s26 + $0x70] sm:$0xff]  ;;  %v985_v63 = vld [vmem:[%s6302_s26 + $0x288] sm:$0xff] }
 0x363   : > { %v3530_v1 = vmul.f32 -1.442695, %v1582_v62  ;;  %v984_v62 = vld [vmem:[%s6302_s26 + $0x280] sm:$0xff] }
 0x364   : > { %v3529_v2 = vmul.f32 -1.442695, %v1577_v0  ;;  %v1783_v0 = vpop.permute.xlu1 %1782 }
 0x365   : > { %4604 = vpow2.f32 %v3530_v1  ;;  %v4230_v1 = vpack.c.bf16 %v919_v61, %v918_v60  ;;  %v5178_v10 = vsel %vm1404_vm3, %v4974_v13, %v1783_v0  ;;  %v983_v60 = vld [vmem:[%s6302_s26 + $0x278] sm:$0xff] }
 0x366   : > { %4606 = vpow2.f32 %v3529_v2  ;;  %v4264_v2 = vpack.c.bf16 %v985_v63, %v984_v62  ;;  %v1797_v13 = vmul.f32 %v5178_v10, %v897_v15  ;;  %v892_v62 = vld [vmem:[%s6303_s28 + $0x20] sm:$0xff]  ;;  %v901_v63 = vld [vmem:[%s6303_s28 + $0x68] sm:$0xff] }
 0x367   : > { %v1792_v0 = vmul.f32 %v5069_v18, %v892_v62  ;;  %v963_v62 = vld [vmem:[%s6302_s26 + $0x1d8] sm:$0xff] }
 0x36f   : > { %v4605_v4 = vpop.eup %4604 }
 0x370   : > { %v4607_v5 = vpop.eup %4606  ;;  %v1592_v7 = vadd.f32 1.0, %v4605_v4  ;;  %v968_v4 = vld [vmem:[%s6302_s26 + $0x200] sm:$0xff] }
 0x371   : > { %v1591_v8 = vadd.f32 1.0, %v4607_v5  ;;  %v969_v5 = vld [vmem:[%s6302_s26 + $0x208] sm:$0xff] }
 0x372   : > { %v4266_v16 = vpack.c.bf16 %v969_v5, %v968_v4  ;;  %v881_v5 = vld [vmem:[%s4935_s16 + $0x8] sm:$0xff] }
 0x373   : > { %4608 = vrcp.f32 %v1591_v8  ;;  %v986_v8 = vld [vmem:[%s6302_s26 + $0x290] sm:$0xff] }
 0x374   : > { %4610 = vrcp.f32 %v1592_v7  ;;  %v888_v7 = vld [vmem:[%s6303_s28] sm:$0xff]  ;;  %v4268_v19 = vpack.c.bf16 %v987_v9, %v986_v8  ;;  %v5290_v9 = vmul.f32 3.0, %v881_v5  ;;  %v965_v5 = vld [vmem:[%s6302_s26 + $0x1e8] sm:$0xff] }
 0x375   : > { %v1788_v17 = vmul.f32 %v5069_v18, %v888_v7  ;;  %v880_v7 = vld [vmem:[%s4935_s16] sm:$0xff]  ;;  %s6311_s16 = sld [smem:[#allocation24_spill]] }
 0x376   : > { %v3531_v8 = vld [vmem:[%s6248_s15] ss:$0 sm:$0xff] }
 0x37d   : > { %v4609_v21 = vpop.eup %4608 }
 0x37e   : > { %v4611_v25 = vpop.eup %4610  ;;  %4028 = vmatprep.mubr.msk.f32.mxu0 %vm1603_vm4, %v4609_v21  ;;  %v971_v21 = vld [vmem:[%s6302_s26 + $0x218] sm:$0xff] }
 0x37f   : > { %4029 = vmatmul.mubr.msk.f32.vlgmr.msra.gmra.mrb[4].mxu0 %vm1603_vm4, %v4611_v25  ;;  %v893_v25 = vld [vmem:[%s6303_s28 + $0x28] sm:$0xff] }
 0x380   : > { %4203 = vmatpush3.bf16.msra.mxu0 %v4202_v20  ;;  %1868 = vmatprep.mubr.f32.mxu0 %v1789_v12  ;;  %v970_v20 = vld [vmem:[%s6302_s26 + $0x210] sm:$0xff]  ;;  %v1793_v30 = vmul.f32 %v5069_v18, %v893_v25 }
 0x381   : > { %4205 = vmatprep.subr.bf16.mxu0 %v4204_v22  ;;  %v896_v22 = vld [vmem:[%s6303_s28 + $0x40] sm:$0xff]  ;;  %v4270_v12 = vpack.c.bf16 %v971_v21, %v970_v20 }
 0x382   : > { %v1796_v26 = vmul.f32 %v5178_v10, %v896_v22  ;;  %v953_v22 = vld [vmem:[%s6302_s26 + $0x188] sm:$0xff] }
 0x384   : > { %4207 = vmatpush3.bf16.msra.mxu0 %v4206_v28  ;;  %v972_v28 = vld [vmem:[%s6302_s26 + $0x220] sm:$0xff] }
 0x385   : > { %4209 = vmatprep.subr.bf16.mxu0 %v4208_v29  ;;  %v973_v29 = vld [vmem:[%s6302_s26 + $0x228] sm:$0xff] }
 0x386   : > { %v4274_v33 = vpack.c.bf16 %v973_v29, %v972_v28  ;;  %v937_v28 = vld [vmem:[%s6302_s26 + $0x108] sm:$0xff]  ;;  %v954_v29 = vld [vmem:[%s6302_s26 + $0x190] sm:$0xff] }
 0x388   : > { %4211 = vmatpush3.bf16.msra.mxu0 %v4210_v34  ;;  %v4276_v34 = vpack.c.bf16 %v991_v32, %v990_v31  ;;  %v5328_v31 = vld [vmem:[%s6303_s28 + $0x18] sm:$0xff] }
 0x389   : > { %4213 = vmatprep.subr.bf16.mxu0 %v4212_v35  ;;  %v974_v35 = vld [vmem:[%s6302_s26 + $0x230] sm:$0xff] }
 0x38a   : > { %v4278_v39 = vpack.c.bf16 %v975_v36, %v974_v35  ;;  %v939_v35 = vld [vmem:[%s6302_s26 + $0x118] sm:$0xff]  ;;  %v1791_v36 = vmul.f32 %v5069_v18, %v5328_v31 }
 0x38c   : > { %4215 = vmatpush3.bf16.msra.mxu0 %v4214_v40  ;;  %v4280_v40 = vpack.c.bf16 %v993_v38, %v992_v37  ;;  %v956_v37 = vld [vmem:[%s6302_s26 + $0x1a0] sm:$0xff]  ;;  %v957_v38 = vld [vmem:[%s6302_s26 + $0x1a8] sm:$0xff] }
 0x38d   : > { %4217 = vmatprep.subr.bf16.mxu0 %v4216_v41  ;;  %v976_v41 = vld [vmem:[%s6302_s26 + $0x240] sm:$0xff] }
 0x38e   : > { %v4282_v45 = vpack.c.bf16 %v977_v42, %v976_v41  ;;  %v940_v41 = vld [vmem:[%s6302_s26 + $0x120] sm:$0xff]  ;;  %v941_v42 = vld [vmem:[%s6302_s26 + $0x128] sm:$0xff] }
 0x390   : > { %4219 = vmatpush3.bf16.msra.mxu0 %v4218_v46  ;;  %v4284_v46 = vpack.c.bf16 %v995_v44, %v994_v43  ;;  %v958_v43 = vld [vmem:[%s6302_s26 + $0x1b0] sm:$0xff]  ;;  %v959_v44 = vld [vmem:[%s6302_s26 + $0x1b8] sm:$0xff] }
 0x391   : > { %4221 = vmatprep.subr.bf16.mxu0 %v4220_v47  ;;  %v978_v47 = vld [vmem:[%s6302_s26 + $0x250] sm:$0xff] }
 0x392   : > { %v4286_v51 = vpack.c.bf16 %v979_v48, %v978_v47  ;;  %v4244_v48 = vpack.c.bf16 %v959_v44, %v958_v43  ;;  %v5467_v43 = vld [vmem:[%s6303_s28 + $0x38] sm:$0xff] }
 0x394   : > { %4223 = vmatpush3.bf16.msra.mxu0 %v4222_v52  ;;  %v4288_v52 = vpack.c.bf16 %v997_v50, %v996_v49  ;;  %v942_v49 = vld [vmem:[%s6302_s26 + $0x130] sm:$0xff]  ;;  %v943_v50 = vld [vmem:[%s6302_s26 + $0x138] sm:$0xff] }
 0x395   : > { %4225 = vmatprep.subr.bf16.mxu0 %v4224_v53  ;;  %v980_v53 = vld [vmem:[%s6302_s26 + $0x260] sm:$0xff] }
 0x396   : > { %v4290_v57 = vpack.c.bf16 %v981_v54, %v980_v53  ;;  %v961_v53 = vld [vmem:[%s6302_s26 + $0x1c8] sm:$0xff] }
 0x398   : > { %4227 = vmatpush3.bf16.msra.mxu0 %v4226_v58  ;;  %v4292_v58 = vpack.c.bf16 %v999_v56, %v998_v55  ;;  %v4246_v55 = vpack.c.bf16 %v943_v50, %v942_v49  ;;  %v1795_v49 = vmul.f32 %v5069_v18, %v5467_v43  ;;  %v1022_v50 = vld [vmem:[%s6302_s26 + $0x3b0] sm:$0xff] }
 0x399   : > { %4229 = vmatprep.subr.bf16.mxu0 %v4228_v59  ;;  %v982_v59 = vld [vmem:[%s6302_s26 + $0x270] sm:$0xff] }
 0x39a   : > { %v4294_v61 = vpack.c.bf16 %v983_v60, %v982_v59  ;;  %v945_v59 = vld [vmem:[%s6302_s26 + $0x148] sm:$0xff] }
 0x39c   : > { %4231 = vmatpush3.bf16.msra.mxu0 %v4230_v1  ;;  %v1801_v1 = vmul.f32 %v5178_v10, %v901_v63 }
 0x39d   : > { %4265 = vmatprep.subr.bf16.mxu0 %v4264_v2  ;;  %v900_v2 = vld [vmem:[%s6303_s28 + $0x60] sm:$0xff] }
 0x39e   : > { %v1800_v4 = vmul.f32 %v5178_v10, %v900_v2  ;;  %v947_v2 = vld [vmem:[%s6302_s26 + $0x158] sm:$0xff] }
 0x39f   : > { %1869 = vmatmul.mubr.f32.vlgmr.msra.gmra.mrb[6].mxu0 %v1788_v17 }
 0x3a0   : > { %1873 = vmatprep.mubr.f32.mxu0 %v1797_v13  ;;  %4267 = vmatpush3.bf16.msra.mxu0 %v4266_v16  ;;  %v5292_v16 = vmul.f32 3.0, %v880_v7  ;;  %v952_v13 = vld [vmem:[%s6302_s26 + $0x180] sm:$0xff] }
 0x3a1   : > { %4269 = vmatprep.subr.bf16.mxu0 %v4268_v19 }
 0x3a3   : > { %1874 = vmatmul.mubr.f32.gmra.mrb[8].mxu0 %v1796_v26  ;;  %v4232_v26 = vpack.c.bf16 %v953_v22, %v952_v13  ;;  %v950_v13 = vld [vmem:[%s6302_s26 + $0x170] sm:$0xff]  ;;  %v951_v22 = vld [vmem:[%s6302_s26 + $0x178] sm:$0xff] }
 0x3a4   : > { %4271 = vmatpush3.bf16.msra.mxu0 %v4270_v12  ;;  %2018 = vmatprep.mubr.f32.mxu0 %v1793_v30  ;;  %v955_v30 = vld [vmem:[%s6302_s26 + $0x198] sm:$0xff] }
 0x3a5   : > { %4273 = vmatprep.subr.bf16.mxu0 %v4272_v27  ;;  %v936_v27 = vld [vmem:[%s6302_s26 + $0x100] sm:$0xff] }
 0x3a6   : > { %v4234_v32 = vpack.c.bf16 %v937_v28, %v936_v27  ;;  %v1000_v27 = vld [vmem:[%s6302_s26 + $0x300] sm:$0xff]  ;;  %v1001_v28 = vld [vmem:[%s6302_s26 + $0x308] sm:$0xff] }
 0x3a8   : > { %4275 = vmatpush3.bf16.msra.mxu0 %v4274_v33  ;;  %v4236_v33 = vpack.c.bf16 %v955_v30, %v954_v29  ;;  %v5430_v29 = vld [vmem:[%s6303_s28 + $0x10] sm:$0xff] }
 0x3a9   : > { %4277 = vmatprep.subr.bf16.mxu0 %v4276_v34  ;;  %v938_v34 = vld [vmem:[%s6302_s26 + $0x110] sm:$0xff] }
 0x3aa   : > { %v1018_v30 = vld [vmem:[%s6302_s26 + $0x390] sm:$0xff] }
 0x3ac   : > { %4279 = vmatpush3.bf16.msra.mxu0 %v4278_v39  ;;  %v4238_v39 = vpack.c.bf16 %v939_v35, %v938_v34  ;;  %v4298_v34 = vpack.c.bf16 %v1001_v28, %v1000_v27  ;;  %v1790_v35 = vmul.f32 %v5069_v18, %v5430_v29  ;;  %v1031_v27 = vld [vmem:[%s6302_s26 + $0x3f8] sm:$0xff] }
 0x3ad   : > { %4281 = vmatprep.subr.bf16.mxu0 %v4280_v40  ;;  %v4240_v40 = vpack.c.bf16 %v957_v38, %v956_v37  ;;  %v1002_v37 = vld [vmem:[%s6302_s26 + $0x310] sm:$0xff]  ;;  %v1003_v38 = vld [vmem:[%s6302_s26 + $0x318] sm:$0xff] }
 0x3ae   : > { %v4302_v44 = vpack.c.bf16 %v1003_v38, %v1002_v37  ;;  %v5551_v37 = vld [vmem:[%s6303_s28 + $0x78] sm:$0xff] }
 0x3b0   : > { %4283 = vmatpush3.bf16.msra.mxu0 %v4282_v45 }
 0x3b1   : > { %4285 = vmatprep.subr.bf16.mxu0 %v4284_v46  ;;  %v4242_v46 = vpack.c.bf16 %v941_v42, %v940_v41  ;;  %v1020_v41 = vld [vmem:[%s6302_s26 + $0x3a0] sm:$0xff]  ;;  %v1021_v42 = vld [vmem:[%s6302_s26 + $0x3a8] sm:$0xff] }
 0x3b4   : > { %4287 = vmatpush3.bf16.msra.mxu0 %v4286_v51 }
 0x3b5   : > { %4289 = vmatprep.subr.bf16.mxu0 %v4288_v52  ;;  %v960_v52 = vld [vmem:[%s6302_s26 + $0x1c0] sm:$0xff] }
 0x3b8   : > { %4291 = vmatpush3.bf16.msra.mxu0 %v4290_v57  ;;  %v4248_v57 = vpack.c.bf16 %v961_v53, %v960_v52  ;;  %v1023_v52 = vld [vmem:[%s6302_s26 + $0x3b8] sm:$0xff] }
 0x3b9   : > { %4293 = vmatprep.subr.bf16.mxu0 %v4292_v58  ;;  %v944_v58 = vld [vmem:[%s6302_s26 + $0x140] sm:$0xff] }
 0x3ba   : > { %v4250_v63 = vpack.c.bf16 %v945_v59, %v944_v58  ;;  %v1007_v58 = vld [vmem:[%s6302_s26 + $0x338] sm:$0xff] }
 0x3bc   : > { %4295 = vmatpush3.bf16.msra.mxu0 %v4294_v61  ;;  %v962_v61 = vld [vmem:[%s6302_s26 + $0x1d0] sm:$0xff] }
 0x3bd   : > { %4329 = vmatprep.subr.bf16.mxu0 %v4978_v14 }
 0x3bf   : > { %2019 = vmatmul.mubr.f32.vlgmr.msra.gmra.mrb[10].mxu0 %v1792_v0  ;;  %v4252_v0 = vpack.c.bf16 %v963_v62, %v962_v61  ;;  %v1024_v61 = vld [vmem:[%s6302_s26 + $0x3c0] sm:$0xff]  ;;  %v1025_v62 = vld [vmem:[%s6302_s26 + $0x3c8] sm:$0xff] }
 0x3c0   : > { %2023 = vmatprep.mubr.f32.mxu0 %v1801_v1  ;;  %4331 = vmatpush3.bf16.msra.mxu0 %v4978_v14  ;;  %v946_v1 = vld [vmem:[%s6302_s26 + $0x150] sm:$0xff] }
 0x3c1   : > { %v4254_v7 = vpack.c.bf16 %v947_v2, %v946_v1  ;;  %v4312_v2 = vpack.c.bf16 %v1025_v62, %v1024_v61 }
 0x3c3   : > { %2024 = vmatmul.mubr.f32.gmra.mrb[12].mxu0 %v1800_v4  ;;  %v964_v4 = vld [vmem:[%s6302_s26 + $0x1e0] sm:$0xff] }
 0x452   : > { %v4030_v15 = vpop.f32.mrb[4].mxu0 }
 0x453   : > { %v1682_v17 = vadd.f32 %v4030_v15, %v3531_v8  ;;  %v1676_v19 = vpop.f32.mrb[5].mxu0  ;;  %v948_v15 = vld [vmem:[%s6302_s26 + $0x160] sm:$0xff] }
 0x454   : > { %v1677_v20 = vadd.f32 %v3531_v8, %v1676_v19  ;;  %v4256_v8 = vpack.c.bf16 %v965_v5, %v964_v4  ;;  %v966_v19 = vld [vmem:[%s6302_s26 + $0x1f0] sm:$0xff]  ;;  %v1008_v4 = vld [vmem:[%s6302_s26 + $0x340] sm:$0xff]  ;;  %v1009_v5 = vld [vmem:[%s6302_s26 + $0x348] sm:$0xff] }
 0x455   : > { %v1688_v21 = vmul.f32 %v5290_v9, %v1682_v17  ;;  %v949_v17 = vld [vmem:[%s6302_s26 + $0x168] sm:$0xff] }
 0x456   : > { %v1687_v14 = vmul.f32 %v5292_v16, %v1677_v20  ;;  %v967_v20 = vld [vmem:[%s6302_s26 + $0x1f8] sm:$0xff] }
 0x457   : > { %4612 = vtanh.f32 %v1688_v21  ;;  %v4258_v21 = vpack.c.bf16 %v949_v17, %v948_v15  ;;  %v1027_v15 = vld [vmem:[%s6302_s26 + $0x3d8] sm:$0xff]  ;;  %v4314_v17 = vpack.c.bf16 %v1009_v5, %v1008_v4 }
 0x458   : > { %4614 = vtanh.f32 %v1687_v14  ;;  %v4260_v14 = vpack.c.bf16 %v967_v20, %v966_v19  ;;  %v1010_v20 = vld [vmem:[%s6302_s26 + $0x350] sm:$0xff] }
 0x461   : > { %v4613_v23 = vpop.eup %4612 }
 0x462   : > { %v4615_v24 = vpop.eup %4614 }
 0x463   : > { %4035 = vmatprep.mubr.msk.f32.mxu1 %vm1603_vm4, %v4615_v24  ;;  %v4194_v12 = vpack.c.bf16 %v4613_v23, %v4615_v24  ;;  %v1017_v24 = vld [vmem:[%s6302_s26 + $0x388] sm:$0xff] }
 0x465   : > { %4196 = vmatprep.subr.msk.bf16.mxu1 %vm5304_vm5, %v4194_v12 }
 0x466   : > { %4199 = vmatpush3.bf16.xpose.msk.msra.mxu1 %vm5304_vm5, %v4194_v12  ;;  %v4262_v12 = vpack.c.bf16 %v951_v22, %v950_v13  ;;  %v1029_v13 = vld [vmem:[%s6302_s26 + $0x3e8] sm:$0xff] }
 0x467   : > { %4233 = vmatprep.subr.bf16.mxu1 %v4232_v26 }
 0x46d   : > { %4036 = vmatmul.mubr.msk.f32.vlgmr.msra.gmra.mrb[4].mxu1 %vm1603_vm4, %v4613_v23  ;;  %v1016_v23 = vld [vmem:[%s6302_s26 + $0x380] sm:$0xff] }
 0x46e   : > { %4235 = vmatpush3.bf16.msra.mxu1 %v4234_v32  ;;  %1943 = vmatprep.mubr.f32.mxu1 %v1791_v36  ;;  %v4296_v26 = vpack.c.bf16 %v1017_v24, %v1016_v23  ;;  %v1019_v32 = vld [vmem:[%s6302_s26 + $0x398] sm:$0xff]  ;;  %v1012_v24 = vld [vmem:[%s6302_s26 + $0x360] sm:$0xff] }
 0x46f   : > { %4237 = vmatprep.subr.bf16.mxu1 %v4236_v33  ;;  %v5441_v33 = vld [vmem:[%s6303_s28 + $0x58] sm:$0xff]  ;;  %v4300_v36 = vpack.c.bf16 %v1019_v32, %v1018_v30  ;;  %v1014_v32 = vld [vmem:[%s6302_s26 + $0x370] sm:$0xff] }
 0x472   : > { %v3639_v45 = vpop.f32.mrb[6].mxu0  ;;  %4239 = vmatpush3.bf16.msra.mxu1 %v4238_v39  ;;  %v1799_v39 = vmul.f32 %v5178_v10, %v5441_v33 }
 0x473   : > { %v3640_v47 = vpop.f32.mrb[7].mxu0  ;;  %4241 = vmatprep.subr.bf16.mxu1 %v4240_v40  ;;  %v5456_v40 = vld [vmem:[%s6303_s28 + $0x50] sm:$0xff] }
 0x474   : > { %v5363_v51 = vadd.f32 %v3640_v47, %v3639_v45  ;;  %v1798_v45 = vmul.f32 %v5178_v10, %v5456_v40  ;;  %v1004_v47 = vld [vmem:[%s6302_s26 + $0x320] sm:$0xff] }
 0x476   : > { %v3642_v54 = vpop.f32.mrb[8].mxu0  ;;  %4243 = vmatpush3.bf16.msra.mxu1 %v4242_v46  ;;  %v4304_v46 = vpack.c.bf16 %v1021_v42, %v1020_v41  ;;  %v5560_v41 = vld [vmem:[%s6303_s28 + $0x70] sm:$0xff] }
 0x477   : > { %v3643_v56 = vpop.f32.mrb[9].mxu0  ;;  %4245 = vmatprep.subr.bf16.mxu1 %v4244_v48  ;;  %v1005_v48 = vld [vmem:[%s6302_s26 + $0x328] sm:$0xff]  ;;  %v1802_v42 = vmul.f32 %v5178_v10, %v5560_v41 }
 0x478   : > { %v5377_v60 = vadd.f32 %v3643_v56, %v3642_v54  ;;  %v4306_v54 = vpack.c.bf16 %v1005_v48, %v1004_v47  ;;  %v4308_v56 = vpack.c.bf16 %v1023_v52, %v1022_v50  ;;  %v1037_v47 = vld [vmem:[%s6306_s0 + $0x18] sm:$0xff]  ;;  %v1040_v52 = vld [vmem:[%s6306_s0 + $0x30] sm:$0xff] }
 0x47a   : > { %4247 = vmatpush3.bf16.msra.mxu1 %v4246_v55 }
 0x47b   : > { %4249 = vmatprep.subr.bf16.mxu1 %v4248_v57  ;;  %v1006_v57 = vld [vmem:[%s6302_s26 + $0x330] sm:$0xff] }
 0x47e   : > { %4251 = vmatpush3.bf16.msra.mxu1 %v4250_v63 }
 0x47f   : > { %4253 = vmatprep.subr.bf16.mxu1 %v4252_v0  ;;  %v4310_v0 = vpack.c.bf16 %v1007_v58, %v1006_v57 }
 0x482   : > { %4255 = vmatpush3.bf16.msra.mxu1 %v4254_v7 }
 0x483   : > { %4257 = vmatprep.subr.bf16.mxu1 %v4256_v8  ;;  %v1026_v8 = vld [vmem:[%s6302_s26 + $0x3d0] sm:$0xff] }
 0x484   : > { %v4316_v19 = vpack.c.bf16 %v1027_v15, %v1026_v8 }
 0x486   : > { %4259 = vmatpush3.bf16.msra.mxu1 %v4258_v21  ;;  %v1011_v21 = vld [vmem:[%s6302_s26 + $0x358] sm:$0xff] }
 0x487   : > { %4261 = vmatprep.subr.bf16.mxu1 %v4260_v14  ;;  %v1028_v14 = vld [vmem:[%s6302_s26 + $0x3e0] sm:$0xff]  ;;  %v4318_v22 = vpack.c.bf16 %v1011_v21, %v1010_v20 }
 0x488   : > { %v4320_v23 = vpack.c.bf16 %v1029_v13, %v1028_v14 }
 0x48a   : > { %4263 = vmatpush3.bf16.msra.mxu1 %v4262_v12  ;;  %v1013_v12 = vld [vmem:[%s6302_s26 + $0x368] sm:$0xff] }
 0x48b   : > { %4297 = vmatprep.subr.bf16.mxu1 %v4296_v26  ;;  %v1030_v26 = vld [vmem:[%s6302_s26 + $0x3f0] sm:$0xff]  ;;  %v4322_v28 = vpack.c.bf16 %v1013_v12, %v1012_v24 }
 0x48c   : > { %v4324_v30 = vpack.c.bf16 %v1031_v27, %v1030_v26 }
 0x48d   : > { %1944 = vmatmul.mubr.f32.vlgmr.msra.gmra.mrb[6].mxu1 %v1790_v35 }
 0x48e   : > { %1948 = vmatprep.mubr.f32.mxu1 %v1799_v39  ;;  %4299 = vmatpush3.bf16.msra.mxu1 %v4298_v34  ;;  %v1015_v34 = vld [vmem:[%s6302_s26 + $0x378] sm:$0xff]  ;;  %v1803_v39 = vmul.f32 %v5178_v10, %v5551_v37  ;;  %v1038_v10 = vld [vmem:[%s6306_s0 + $0x20] sm:$0xff] }
 0x48f   : > { %4301 = vmatprep.subr.bf16.mxu1 %v4300_v36  ;;  %v4326_v35 = vpack.c.bf16 %v1015_v34, %v1014_v32  ;;  %v5546_v36 = vld [vmem:[%s6303_s28 + $0x30] sm:$0xff]  ;;  %v2268_v32 = vstv %s1220_s22  ;;  %s6312_s22 = sld [smem:[#allocation26_spill]] }
 0x490   : > { %v1794_v38 = vmul.f32 %v5069_v18, %v5546_v36  ;;  %v1035_v18 = vld [vmem:[%s6306_s0 + $0x8] sm:$0xff] }
 0x491   : > { %1949 = vmatmul.mubr.f32.gmra.mrb[8].mxu1 %v1798_v45  ;;  %v1036_v45 = vld [vmem:[%s6306_s0 + $0x10] sm:$0xff] }
 0x492   : > { %v3715_v53 = vpop.f32.mrb[10].mxu0  ;;  %4303 = vmatpush3.bf16.msra.mxu1 %v4302_v44  ;;  %2093 = vmatprep.mubr.f32.mxu1 %v1795_v49  ;;  %v1034_v44 = vld [vmem:[%s6306_s0] sm:$0xff]  ;;  %v4336_v48 = vpack.c.bf16 %v1037_v47, %v1036_v45  ;;  %v1039_v49 = vld [vmem:[%s6306_s0 + $0x28] sm:$0xff] }
 0x493   : > { %v3716_v55 = vpop.f32.mrb[11].mxu0  ;;  %4305 = vmatprep.subr.bf16.mxu1 %v4304_v46  ;;  %v4332_v46 = vpack.c.bf16 %v1035_v18, %v1034_v44  ;;  %v4340_v50 = vpack.c.bf16 %v1039_v49, %v1038_v10 }
 0x494   : > { %v5491_v59 = vadd.f32 %v3716_v55, %v3715_v53  ;;  %v1041_v53 = vld [vmem:[%s6306_s0 + $0x38] sm:$0xff] }
 0x496   : > { %v3718_v63 = vpop.f32.mrb[12].mxu0  ;;  %4307 = vmatpush3.bf16.msra.mxu1 %v4306_v54  ;;  %v4344_v54 = vpack.c.bf16 %v1041_v53, %v1040_v52 }
 0x497   : > { %v3719_v1 = vpop.f32.mrb[13].mxu0  ;;  %4309 = vmatprep.subr.bf16.mxu1 %v4308_v56 }
 0x498   : > { %v5505_v7 = vadd.f32 %v3719_v1, %v3718_v63 }
 0x49a   : > { %4311 = vmatpush3.bf16.msra.mxu1 %v4310_v0 }
 0x49b   : > { %4313 = vmatprep.subr.bf16.mxu1 %v4312_v2 }
 0x49e   : > { %4315 = vmatpush3.bf16.msra.mxu1 %v4314_v17 }
 0x49f   : > { %4317 = vmatprep.subr.bf16.mxu1 %v4316_v19 }
 0x4a2   : > { %4319 = vmatpush3.bf16.msra.mxu1 %v4318_v22 }
 0x4a3   : > { %4321 = vmatprep.subr.bf16.mxu1 %v4320_v23 }
 0x4a6   : > { %4323 = vmatpush3.bf16.msra.mxu1 %v4322_v28 }
 0x4a7   : > { %4325 = vmatprep.subr.bf16.mxu1 %v4324_v30  ;;  %v2271_v30 = vstv %s3514_s4  ;;  %s6309_s4 = sld [smem:[#allocation25_spill]] }
 0x4aa   : > { %4327 = vmatpush3.bf16.msra.mxu1 %v4326_v35 }
 0x4ab   : > { %4333 = vmatprep.subr.bf16.mxu1 %v4332_v46 }
 0x4ad   : > { %2094 = vmatmul.mubr.f32.vlgmr.msra.gmra.mrb[10].mxu1 %v1794_v38 }
 0x4ae   : > { %2098 = vmatprep.mubr.f32.mxu1 %v1803_v39  ;;  %4335 = vmatpush3.bf16.msra.mxu1 %v4332_v46 }
 0x4af   : > { %4337 = vmatprep.subr.bf16.mxu1 %v4336_v48 }
 0x4b1   : > { %2099 = vmatmul.mubr.f32.gmra.mrb[12].mxu1 %v1802_v42 }
 0x4b2   : > { %4339 = vmatpush3.bf16.msra.mxu1 %v4336_v48 }
 0x4b3   : > { %4341 = vmatprep.subr.bf16.mxu1 %v4340_v50 }
 0x4b6   : > { %4343 = vmatpush3.bf16.msra.mxu1 %v4340_v50 }
 0x4b7   : > { %4345 = vmatprep.subr.bf16.mxu1 %v4344_v54 }
 0x4ba   : > { %4347 = vmatpush3.bf16.msra.mxu1 %v4344_v54  ;;  %v4656_v54 = vld [vmem:[#allocation2 + $0x8] sm:$0xff] }
 0x540   : > { %v4037_v55 = vpop.f32.mrb[4].mxu1 }
 0x541   : > { %v1773_v56 = vmul.f32 3.0, %v4037_v55  ;;  %v1763_v57 = vpop.f32.mrb[5].mxu1 }
 0x542   : > { %v1772_v58 = vmul.f32 3.0, %v1763_v57 }
 0x543   : > { %4616 = vtanh.f32 %v1773_v56  ;;  %v4657_v56 = vld [vmem:[#allocation2] sm:$0xff] }
 0x544   : > { %4618 = vtanh.f32 %v1772_v58 }
 0x54d   : > { %v4617_v61 = vpop.eup %4616 }
 0x54e   : > { %v4619_v62 = vpop.eup %4618  ;;  %v1777_v0 = vmax.f32 %v4617_v61, 0.0  ;;  %v4658_v61 = vld [vmem:[%s4930_s17 + $0x8] sm:$0xff] }
 0x54f   : > { %v1776_v63 = vmax.f32 %v4619_v62, 0.0 }
 0x551   : > { %4042 = vmatprep.mubr.msk.f32.mxu0 %vm1235_vm1, %v1776_v63 }
 0x552   : > { %4043 = vmatmul.mubr.msk.f32.vlgmr.msra.gmra.mrb[14].mxu0 %vm1235_vm1, %v1777_v0  ;;  %v4659_v0 = vld [vmem:[%s4930_s17] sm:$0xff]  ;;  %s3515_s17 = sld [smem:[#allocation3 + $0x80]] }
 0x553   : > { %4068 = vmatprep.mubr.msk.f32.mxu0 %vm1235_vm1, %v4947_v3 }
 0x560   : > { %v3677_v1 = vpop.f32.mrb[6].mxu1 }
 0x561   : > { %v3678_v2 = vpop.f32.mrb[7].mxu1 }
 0x562   : > { %v3679_v4 = vadd.f32 %v3678_v2, %v3677_v1 }
 0x564   : > { %v1946_v5 = vadd.f32 %v3679_v4, %v5363_v51  ;;  %v3680_v8 = vpop.f32.mrb[8].mxu1  ;;  %v1033_v51 = vld [vmem:[%s6307_s6 + $0x8] sm:$0xff]  ;;  %v1200_v4 = vld [vmem:[%s6252_s19] sm:$0xff] }
 0x565   : > { %v3681_v15 = vpop.f32.mrb[9].mxu1 }
 0x566   : > { %v3682_v17 = vadd.f32 %v3681_v15, %v3680_v8  ;;  %v2021_v19 = vadd.f32 %v5491_v59, %v1946_v5  ;;  %v1201_v5 = vld [vmem:[%s6252_s19 + $0x8] sm:$0xff]  ;;  %v1202_v15 = vld [vmem:[%s6252_s19 + $0x10] sm:$0xff] }
 0x567   : > { %v4356_v8 = vpack.c.bf16 %v1201_v5, %v1200_v4  ;;  %v1111_v4 = vld [vmem:[%s6310_s23 + $0x188] sm:$0xff] }
 0x568   : > { %v1951_v20 = vadd.f32 %v3682_v17, %v5377_v60  ;;  %v1032_v60 = vld [vmem:[%s6308_s9] sm:$0xff]  ;;  %v1203_v17 = vld [vmem:[%s6252_s19 + $0x18] sm:$0xff] }
 0x56a   : > { %v2026_v21 = vadd.f32 %v5505_v7, %v1951_v20  ;;  %v4661_v20 = vld [vmem:[%s6300_s1] sm:$0xff] }
 0x580   : > { %v3753_v14 = vpop.f32.mrb[10].mxu1 }
 0x581   : > { %v3754_v13 = vpop.f32.mrb[11].mxu1 }
 0x582   : > { %v3755_v22 = vadd.f32 %v3754_v13, %v3753_v14  ;;  %v1204_v14 = vld [vmem:[%s6252_s19 + $0x20] sm:$0xff]  ;;  %v1205_v13 = vld [vmem:[%s6252_s19 + $0x28] sm:$0xff] }
 0x584   : > { %v2096_v23 = vadd.f32 %v3755_v22, %v2021_v19  ;;  %v3756_v24 = vpop.f32.mrb[12].mxu1  ;;  %v4660_v19 = vld [vmem:[%s6298_s24 + $0x8] sm:$0xff] }
 0x585   : > { %v3757_v3 = vpop.f32.mrb[13].mxu1  ;;  %v4662_v22 = vld [vmem:[%s6300_s1 + $0x8] sm:$0xff] }
 0x586   : > { %v3758_v12 = vadd.f32 %v3757_v3, %v3756_v24  ;;  %v2104_v7 = vadd.f32 %v2096_v23, %v1032_v60  ;;  %v4364_v23 = vpack.c.bf16 %v1205_v13, %v1204_v14  ;;  %v1206_v24 = vld [vmem:[%s6252_s19 + $0x30] sm:$0xff]  ;;  %v1207_v3 = vld [vmem:[%s6252_s19 + $0x38] sm:$0xff]  ;;  %v1209_v60 = vld [vmem:[%s6254_s21] sm:$0xff] }
 0x588   : > { %v2101_v26 = vadd.f32 %v3758_v12, %v2026_v21  ;;  %v2269_v42 = vmul.f32 %v2268_v32, %v2104_v7  ;;  %v4360_v21 = vpack.c.bf16 %v1203_v17, %v1202_v15  ;;  %v4368_v12 = vpack.c.bf16 %v1207_v3, %v1206_v24 }
 0x58a   : > { %v2105_v59 = vadd.f32 %v2101_v26, %v1033_v51 }
 0x58c   : > { %v2270_v35 = vmul.f32 %v2268_v32, %v2105_v59  ;;  %v1210_v59 = vld [vmem:[%s6254_s21 + $0x8] sm:$0xff]  ;;  %v1212_v32 = vld [vmem:[%s6254_s21 + $0x18] sm:$0xff] }
 0x58d   : > { %v4372_v7 = vpack.c.bf16 %v1210_v59, %v1209_v60 }
 0x58f   : > { %4373 = vmatprep.subr.bf16.mxu1 %v4372_v7 }
 0x625   : > { %v4044_v27 = vpop.f32.mrb[14].mxu0 }
 0x626   : > { %v2178_v28 = vpop.f32.mrb[15].mxu0 }
 0x627   : > { %4061 = vmatprep.mubr.msk.f32.mxu1 %vm1404_vm3, %v2178_v28 }
 0x628   : > { %4062 = vmatmul.mubr.msk.f32.vlgmr.msra.gmra.mrb[14].mxu1 %vm1404_vm3, %v4044_v27 }
 0x629   : > { %4375 = vmatpush3.bf16.msra.mxu1 %v4372_v7 }
 0x6fb   : > { %v4063_v34 = vpop.f32.mrb[14].mxu1 }
 0x6fc   : > { %v2273_v38 = vmul.f32 %v4063_v34, %v2271_v30  ;;  %v2259_v39 = vpop.f32.mrb[15].mxu1 }
 0x6fd   : > { %v2272_v44 = vmul.f32 %v2271_v30, %v2259_v39  ;;  %v1211_v30 = vld [vmem:[%s6254_s21 + $0x10] sm:$0xff] }
 0x6fe   : > { %v2275_v18 = vadd.f32 %v2273_v38, %v2270_v35  ;;  %v4376_v34 = vpack.c.bf16 %v1212_v32, %v1211_v30  ;;  %v1213_v35 = vld [vmem:[%s6254_s21 + $0x20] sm:$0xff]  ;;  %v1214_v38 = vld [vmem:[%s6254_s21 + $0x28] sm:$0xff]  ;;  %v1215_v39 = vld [vmem:[%s6254_s21 + $0x30] sm:$0xff] }
 0x6ff   : > { %v2274_v45 = vadd.f32 %v2272_v44, %v2269_v42  ;;  %v4380_v42 = vpack.c.bf16 %v1214_v38, %v1213_v35  ;;  %v1216_v44 = vld [vmem:[%s6254_s21 + $0x38] sm:$0xff]  ;;  %v1096_v30 = vld [vmem:[%s6310_s23 + $0x110] sm:$0xff]  ;;  %v1115_v38 = vld [vmem:[%s6310_s23 + $0x1a8] sm:$0xff] }
 0x700   : > { %v3543_v46 = vmul.f32 -1.442695, %v2275_v18  ;;  %4377 = vmatprep.subr.bf16.mxu1 %v4376_v34  ;;  %v4384_v18 = vpack.c.bf16 %v1216_v44, %v1215_v39  ;;  %v1097_v32 = vld [vmem:[%s6310_s23 + $0x118] sm:$0xff]  ;;  %v1098_v44 = vld [vmem:[%s6310_s23 + $0x120] sm:$0xff] }
 0x701   : > { %v3542_v47 = vmul.f32 -1.442695, %v2274_v45  ;;  %4379 = vmatpush3.bf16.msra.mxu1 %v4376_v34  ;;  %v3548_v45 = vld [vmem:[%s6253_s20] ss:$0 sm:$0xff]  ;;  %v4432_v39 = vpack.c.bf16 %v1097_v32, %v1096_v30  ;;  %v1176_v30 = vld [vmem:[%s6310_s23 + $0x390] sm:$0xff]  ;;  %v1177_v32 = vld [vmem:[%s6310_s23 + $0x398] sm:$0xff] }
 0x702   : > { %4620 = vpow2.f32 %v3543_v46  ;;  %4381 = vmatprep.subr.bf16.mxu1 %v4380_v42 }
 0x703   : > { %4622 = vpow2.f32 %v3542_v47 }
 0x705   : > { %4383 = vmatpush3.bf16.msra.mxu1 %v4380_v42 }
 0x706   : > { %4385 = vmatprep.subr.bf16.mxu1 %v4384_v18 }
 0x709   : > { %4387 = vmatpush3.bf16.msra.mxu1 %v4384_v18  ;;  %v1116_v18 = vld [vmem:[%s6310_s23 + $0x1b0] sm:$0xff] }
 0x70c   : > { %v4621_v48 = vpop.eup %4620 }
 0x70d   : > { %v4623_v10 = vpop.eup %4622  ;;  %v2283_v49 = vadd.f32 1.0, %v4621_v48 }
 0x70e   : > { %v2282_v50 = vadd.f32 1.0, %v4623_v10 }
 0x70f   : > { %4624 = vrcp.f32 %v2283_v49 }
 0x710   : > { %4626 = vrcp.f32 %v2282_v50 }
 0x719   : > { %v5604_v52 = vpop.eup %4624 }
 0x71a   : > { %v5606_v53 = vpop.eup %4626  ;;  %v2289_v55 = vmul.f32 %v4656_v54, %v5604_v52 }
 0x71b   : > { %v2288_v57 = vmul.f32 %v4657_v56, %v5606_v53 }
 0x71c   : > { %2294 = vrot.lane.b32.xlu1 %v2289_v55, %s4731_s18 }
 0x71d   : > { %2292 = vrot.lane.b32.xlu0 %v2288_v57, %s4731_s18 }
 0x78e   : > { %v2295_v58 = vpop.permute.xlu1 %2294 }
 0x78f   : > { %v5614_v62 = vsel %vm1232_vm2, %v4658_v61, %v2295_v58  ;;  %v2293_v63 = vpop.permute.xlu0 %2292 }
 0x790   : > { %v5618_v1 = vsel %vm1232_vm2, %v4659_v0, %v2293_v63  ;;  %v1218_v63 = vld [vmem:[%s6309_s4] sm:$0xff] }
 0x791   : > { %v5622_v2 = vpack.c.bf16 %v5614_v62, %v5618_v1  ;;  %v1110_v0 = vld [vmem:[%s6310_s23 + $0x180] sm:$0xff] }
 0x792   : > { %v4426_v5 = vpack.c.bf16 %v1111_v4, %v1110_v0  ;;  %v1104_v4 = vld [vmem:[%s6310_s23 + $0x150] sm:$0xff] }
 0x793   : > { %4349 = vmatprep.subr.bf16.mxu0 %v5622_v2 }
 0x794   : > { %4351 = vmatpush3.bf16.msra.mxu0 %v5622_v2 }
 0x795   : > { %4353 = vmatprep.subr.bf16.mxu0 %v5622_v2 }
 0x797   : > { %4069 = vmatmul.mubr.msk.f32.vlgmr.msra.gmra.mrb[16].mxu0 %vm1235_vm1, %v4660_v19 }
 0x798   : > { %4355 = vmatpush3.bf16.msra.mxu0 %v5622_v2  ;;  %4075 = vmatprep.mubr.msk.f32.mxu0 %vm1235_vm1, %v4661_v20 }
 0x799   : > { %4357 = vmatprep.subr.bf16.mxu0 %v4356_v8 }
 0x79b   : > { %4076 = vmatmul.mubr.msk.f32.vlgmr.msra.gmra.mrb[18].mxu0 %vm1235_vm1, %v4662_v22 }
 0x79c   : > { %4359 = vmatpush3.bf16.msra.mxu0 %v4356_v8  ;;  %v3553_v8 = vld [vmem:[%s6311_s16] ss:$0 sm:$0xff]  ;;  %s6314_s16 = smov %s6313_s30 }
 0x79d   : > { %4361 = vmatprep.subr.bf16.mxu0 %v4360_v21 }
 0x7a0   : > { %4363 = vmatpush3.bf16.msra.mxu0 %v4360_v21 }
 0x7a1   : > { %4365 = vmatprep.subr.bf16.mxu0 %v4364_v23 }
 0x7a4   : > { %4367 = vmatpush3.bf16.msra.mxu0 %v4364_v23 }
 0x7a5   : > { %4369 = vmatprep.subr.bf16.mxu0 %v4368_v12 }
 0x7a8   : > { %4371 = vmatpush3.bf16.msra.mxu0 %v4368_v12  ;;  %v1094_v12 = vld [vmem:[%s6310_s23 + $0x100] sm:$0xff] }
 0x7a9   : > { %4116 = vmatprep.subr.mxu0 %v1218_v63 }
 0x86a   : > { %v4070_v26 = vpop.f32.mrb[16].mxu0 }
 0x86b   : > { %v2366_v27 = vpop.f32.mrb[17].mxu0 }
 0x86c   : > { %4094 = vmatprep.mubr.msk.f32.mxu0 %vm1404_vm3, %v2366_v27  ;;  %v1112_v27 = vld [vmem:[%s6310_s23 + $0x190] sm:$0xff] }
 0x86d   : > { %4095 = vmatmul.mubr.msk.f32.vlgmr.msra.gmra.mrb[20].mxu0 %vm1404_vm3, %v4070_v26  ;;  %v1095_v26 = vld [vmem:[%s6310_s23 + $0x108] sm:$0xff] }
 0x86e   : > { %v4077_v28 = vpop.f32.mrb[18].mxu0  ;;  %4117 = vmatpush3.msra.mxu0 %v1218_v63  ;;  %v4428_v60 = vpack.c.bf16 %v1095_v26, %v1094_v12  ;;  %v1174_v12 = vld [vmem:[%s6310_s23 + $0x380] sm:$0xff]  ;;  %v1175_v26 = vld [vmem:[%s6310_s23 + $0x388] sm:$0xff] }
 0x86f   : > { %2830 = vrot.lane.b32.xlu1 %v4077_v28, %s4732_s8  ;;  %v2441_v51 = vpop.f32.mrb[19].mxu0  ;;  %4427 = vmatprep.subr.bf16.mxu0 %v4426_v5  ;;  %v1113_v28 = vld [vmem:[%s6310_s23 + $0x198] sm:$0xff] }
 0x870   : > { %2828 = vrot.lane.b32.xlu0 %v2441_v51, %s4732_s8  ;;  %v4430_v7 = vpack.c.bf16 %v1113_v28, %v1112_v27  ;;  %v1105_v5 = vld [vmem:[%s6310_s23 + $0x158] sm:$0xff] }
 0x8e1   : > { %v2831_v27 = vpop.permute.xlu1 %2830 }
 0x8e2   : > { %v2829_v3 = vpop.permute.xlu0 %2828 }
 0x8e3   : > { %v5723_v51 = vsel %vm1404_vm3, %v5618_v1, %v2829_v3  ;;  %v1114_v1 = vld [vmem:[%s6310_s23 + $0x1a0] sm:$0xff]  ;;  %v1109_v3 = vld [vmem:[%s6310_s23 + $0x178] sm:$0xff] }
 0x8e4   : > { %v2839_v35 = vmul.f32 %v5723_v51, %v5328_v31  ;;  %v4434_v42 = vpack.c.bf16 %v1115_v38, %v1114_v1  ;;  %v1099_v31 = vld [vmem:[%s6310_s23 + $0x128] sm:$0xff]  ;;  %v2838_v1 = vmul.f32 %v5723_v51, %v5430_v29  ;;  %v4494_v38 = vpack.c.bf16 %v1177_v32, %v1176_v30 }
 0x8e5   : > { %v1179_v29 = vld [vmem:[%s6310_s23 + $0x3a8] sm:$0xff] }
 0x940   : > { %v4096_v46 = vpop.f32.mrb[20].mxu0 }
 0x941   : > { %v2534_v47 = vadd.f32 %v4096_v46, %v3548_v45  ;;  %v2528_v48 = vpop.f32.mrb[21].mxu0  ;;  %v4436_v46 = vpack.c.bf16 %v1099_v31, %v1098_v44 }
 0x942   : > { %v2529_v10 = vadd.f32 %v3548_v45, %v2528_v48  ;;  %v1117_v45 = vld [vmem:[%s6310_s23 + $0x1b8] sm:$0xff]  ;;  %v1100_v48 = vld [vmem:[%s6310_s23 + $0x130] sm:$0xff] }
 0x943   : > { %v3552_v49 = vmul.f32 -1.442695, %v2534_v47  ;;  %v4438_v47 = vpack.c.bf16 %v1117_v45, %v1116_v18 }
 0x944   : > { %v3551_v50 = vmul.f32 -1.442695, %v2529_v10  ;;  %v1101_v10 = vld [vmem:[%s6310_s23 + $0x138] sm:$0xff] }
 0x945   : > { %4628 = vpow2.f32 %v3552_v49  ;;  %v1118_v49 = vld [vmem:[%s6310_s23 + $0x1c0] sm:$0xff] }
 0x946   : > { %4630 = vpow2.f32 %v3551_v50  ;;  %v1119_v50 = vld [vmem:[%s6310_s23 + $0x1c8] sm:$0xff] }
 0x94f   : > { %v4629_v54 = vpop.eup %4628 }
 0x950   : > { %v4631_v55 = vpop.eup %4630  ;;  %v2544_v56 = vadd.f32 1.0, %v4629_v54  ;;  %v4440_v54 = vpack.c.bf16 %v1101_v10, %v1100_v48  ;;  %v1180_v48 = vld [vmem:[%s6310_s23 + $0x3b0] sm:$0xff] }
 0x951   : > { %v2543_v57 = vadd.f32 1.0, %v4631_v55  ;;  %v4442_v55 = vpack.c.bf16 %v1119_v50, %v1118_v49  ;;  %v1164_v50 = vld [vmem:[%s6310_s23 + $0x330] sm:$0xff] }
 0x953   : > { %4632 = vrcp.f32 %v2543_v57  ;;  %v1103_v57 = vld [vmem:[%s6310_s23 + $0x148] sm:$0xff] }
 0x954   : > { %4634 = vrcp.f32 %v2544_v56  ;;  %v1102_v56 = vld [vmem:[%s6310_s23 + $0x140] sm:$0xff] }
 0x955   : > { %v4444_v63 = vpack.c.bf16 %v1103_v57, %v1102_v56 }
 0x95d   : > { %v4633_v58 = vpop.eup %4632 }
 0x95e   : > { %v4635_v61 = vpop.eup %4634  ;;  %4113 = vmatprep.mubr.msk.f32.mxu1 %vm1404_vm3, %v4633_v58  ;;  %v1120_v58 = vld [vmem:[%s6310_s23 + $0x1d0] sm:$0xff] }
 0x95f   : > { %4114 = vmatmul.mubr.msk.f32.vlgmr.msra.gmra.mrb[16].mxu1 %vm1404_vm3, %v4635_v61  ;;  %v1121_v61 = vld [vmem:[%s6310_s23 + $0x1d8] sm:$0xff] }
 0x960   : > { %v4446_v0 = vpack.c.bf16 %v1121_v61, %v1120_v58  ;;  %v1166_v58 = vld [vmem:[%s6310_s23 + $0x340] sm:$0xff]  ;;  %v1167_v61 = vld [vmem:[%s6310_s23 + $0x348] sm:$0xff] }
 0xa32   : > { %v4115_v15 = vpop.f32.mrb[16].mxu1 }
 0xa33   : > { %v2633_v17 = vadd.f32 %v4115_v15, %v3553_v8  ;;  %v2627_v19 = vpop.f32.mrb[17].mxu1  ;;  %v1123_v15 = vld [vmem:[%s6310_s23 + $0x1e8] sm:$0xff] }
 0xa34   : > { %v2628_v20 = vadd.f32 %v3553_v8, %v2627_v19  ;;  %v1122_v8 = vld [vmem:[%s6310_s23 + $0x1e0] sm:$0xff] }
 0xa35   : > { %v3557_v21 = vmul.f32 -1.442695, %v2633_v17  ;;  %v4448_v17 = vpack.c.bf16 %v1105_v5, %v1104_v4  ;;  %v4450_v19 = vpack.c.bf16 %v1123_v15, %v1122_v8  ;;  %v4508_v4 = vpack.c.bf16 %v1167_v61, %v1166_v58  ;;  %v1168_v8 = vld [vmem:[%s6310_s23 + $0x350] sm:$0xff]  ;;  %v1169_v15 = vld [vmem:[%s6310_s23 + $0x358] sm:$0xff] }
 0xa36   : > { %v3556_v14 = vmul.f32 -1.442695, %v2628_v20  ;;  %v1106_v20 = vld [vmem:[%s6310_s23 + $0x160] sm:$0xff] }
 0xa37   : > { %4636 = vpow2.f32 %v3557_v21  ;;  %v1107_v21 = vld [vmem:[%s6310_s23 + $0x168] sm:$0xff] }
 0xa38   : > { %4638 = vpow2.f32 %v3556_v14  ;;  %v1124_v14 = vld [vmem:[%s6310_s23 + $0x1f0] sm:$0xff] }
 0xa41   : > { %v4637_v13 = vpop.eup %4636 }
 0xa42   : > { %v4639_v22 = vpop.eup %4638  ;;  %v2643_v23 = vadd.f32 1.0, %v4637_v13  ;;  %v1125_v13 = vld [vmem:[%s6310_s23 + $0x1f8] sm:$0xff] }
 0xa43   : > { %v2642_v24 = vadd.f32 1.0, %v4639_v22  ;;  %v4452_v22 = vpack.c.bf16 %v1107_v21, %v1106_v20  ;;  %v4512_v20 = vpack.c.bf16 %v1169_v15, %v1168_v8  ;;  %v1087_v8 = vld [vmem:[%s6310_s23 + $0xc8] sm:$0xff] }
 0xa45   : > { %4640 = vrcp.f32 %v2642_v24  ;;  %v1108_v24 = vld [vmem:[%s6310_s23 + $0x170] sm:$0xff] }
 0xa46   : > { %4642 = vrcp.f32 %v2643_v23  ;;  %v4454_v23 = vpack.c.bf16 %v1125_v13, %v1124_v14  ;;  %v4456_v28 = vpack.c.bf16 %v1109_v3, %v1108_v24  ;;  %v1170_v14 = vld [vmem:[%s6310_s23 + $0x360] sm:$0xff]  ;;  %v1171_v13 = vld [vmem:[%s6310_s23 + $0x368] sm:$0xff] }
 0xa47   : > { %v4516_v24 = vpack.c.bf16 %v1171_v13, %v1170_v14  ;;  %v1071_v14 = vld [vmem:[%s6310_s23 + $0x48] sm:$0xff] }
 0xa4f   : > { %v4641_v59 = vpop.eup %4640 }
 0xa50   : > { %v4643_v34 = vpop.eup %4642  ;;  %4118 = vmatprep.mubr.msk.f32.mxu0 %vm1603_vm4, %v4641_v59  ;;  %v1158_v59 = vld [vmem:[%s6310_s23 + $0x300] sm:$0xff] }
 0xa51   : > { %4119 = vmatmul.mubr.msk.f32.vlgmr.msra.gmra.mrb[22].mxu0 %vm1603_vm4, %v4643_v34  ;;  %v5827_v34 = vsel %vm1404_vm3, %v5614_v62, %v2831_v27  ;;  %v1178_v62 = vld [vmem:[%s6310_s23 + $0x3a0] sm:$0xff] }
 0xa52   : > { %4429 = vmatpush3.bf16.msra.mxu0 %v4428_v60  ;;  %2991 = vmatprep.mubr.f32.mxu0 %v2839_v35  ;;  %v4490_v60 = vpack.c.bf16 %v1175_v26, %v1174_v12  ;;  %v2847_v44 = vmul.f32 %v5827_v34, %v5441_v33  ;;  %v2846_v18 = vmul.f32 %v5827_v34, %v5456_v40  ;;  %v1162_v33 = vld [vmem:[%s6310_s23 + $0x320] sm:$0xff]  ;;  %v1181_v40 = vld [vmem:[%s6310_s23 + $0x3b8] sm:$0xff]  ;;  %v1172_v12 = vld [vmem:[%s6310_s23 + $0x370] sm:$0xff] }
 0xa53   : > { %4431 = vmatprep.subr.bf16.mxu0 %v4430_v7  ;;  %v1159_v7 = vld [vmem:[%s6310_s23 + $0x308] sm:$0xff]  ;;  %v4498_v45 = vpack.c.bf16 %v1179_v29, %v1178_v62  ;;  %v4502_v49 = vpack.c.bf16 %v1181_v40, %v1180_v48  ;;  %v1173_v26 = vld [vmem:[%s6310_s23 + $0x378] sm:$0xff]  ;;  %v1080_v29 = vld [vmem:[%s6310_s23 + $0x90] sm:$0xff] }
 0xa54   : > { %v4492_v35 = vpack.c.bf16 %v1159_v7, %v1158_v59  ;;  %v4520_v27 = vpack.c.bf16 %v1173_v26, %v1172_v12  ;;  %v2850_v59 = vmul.f32 %v5827_v34, %v5560_v41  ;;  %v3558_v7 = vld [vmem:[%s6312_s22] ss:$0 sm:$0xff]  ;;  %v1079_v41 = vld [vmem:[%s6310_s23 + $0x88] sm:$0xff]  ;;  %v1072_v12 = vld [vmem:[%s6310_s23 + $0x50] sm:$0xff]  ;;  %s6315_s22 = sld [smem:[#allocation22_spill]] }
 0xa55   : > { %v1082_v48 = vld [vmem:[%s6310_s23 + $0xa0] sm:$0xff]  ;;  %v1083_v40 = vld [vmem:[%s6310_s23 + $0xa8] sm:$0xff]  ;;  %v1073_v26 = vld [vmem:[%s6310_s23 + $0x58] sm:$0xff] }
 0xa56   : > { %4433 = vmatpush3.bf16.msra.mxu0 %v4432_v39  ;;  %v1160_v39 = vld [vmem:[%s6310_s23 + $0x310] sm:$0xff] }
 0xa57   : > { %4435 = vmatprep.subr.bf16.mxu0 %v4434_v42  ;;  %v1161_v42 = vld [vmem:[%s6310_s23 + $0x318] sm:$0xff] }
 0xa58   : > { %v4496_v31 = vpack.c.bf16 %v1161_v42, %v1160_v39 }
 0xa5a   : > { %4437 = vmatpush3.bf16.msra.mxu0 %v4436_v46  ;;  %v1163_v46 = vld [vmem:[%s6310_s23 + $0x328] sm:$0xff] }
 0xa5b   : > { %4439 = vmatprep.subr.bf16.mxu0 %v4438_v47  ;;  %v2843_v47 = vmul.f32 %v5723_v51, %v5467_v43  ;;  %v4500_v10 = vpack.c.bf16 %v1163_v46, %v1162_v33  ;;  %v1165_v43 = vld [vmem:[%s6310_s23 + $0x338] sm:$0xff]  ;;  %v4663_v46 = vld [vmem:[%s6303_s28 + $0x8] sm:$0xff] }
 0xa5c   : > { %v4504_v56 = vpack.c.bf16 %v1165_v43, %v1164_v50  ;;  %v1065_v33 = vld [vmem:[%s6310_s23 + $0x18] sm:$0xff]  ;;  %v1066_v50 = vld [vmem:[%s6310_s23 + $0x20] sm:$0xff]  ;;  %v1067_v43 = vld [vmem:[%s6310_s23 + $0x28] sm:$0xff] }
 0xa5e   : > { %4441 = vmatpush3.bf16.msra.mxu0 %v4440_v54  ;;  %v1182_v54 = vld [vmem:[%s6310_s23 + $0x3c0] sm:$0xff] }
 0xa5f   : > { %4443 = vmatprep.subr.bf16.mxu0 %v4442_v55  ;;  %v1183_v55 = vld [vmem:[%s6310_s23 + $0x3c8] sm:$0xff] }
 0xa60   : > { %v4506_v57 = vpack.c.bf16 %v1183_v55, %v1182_v54  ;;  %v1084_v54 = vld [vmem:[%s6310_s23 + $0xb0] sm:$0xff]  ;;  %v1085_v55 = vld [vmem:[%s6310_s23 + $0xb8] sm:$0xff] }
 0xa61   : > { %v4406_v61 = vpack.c.bf16 %v1085_v55, %v1084_v54  ;;  %v1130_v55 = vld [vmem:[%s6310_s23 + $0x220] sm:$0xff] }
 0xa62   : > { %4445 = vmatpush3.bf16.msra.mxu0 %v4444_v63  ;;  %v1184_v63 = vld [vmem:[%s6310_s23 + $0x3d0] sm:$0xff] }
 0xa63   : > { %4447 = vmatprep.subr.bf16.mxu0 %v4446_v0  ;;  %v1185_v0 = vld [vmem:[%s6310_s23 + $0x3d8] sm:$0xff] }
 0xa64   : > { %v4510_v5 = vpack.c.bf16 %v1185_v0, %v1184_v63  ;;  %v1068_v63 = vld [vmem:[%s6310_s23 + $0x30] sm:$0xff]  ;;  %v1069_v0 = vld [vmem:[%s6310_s23 + $0x38] sm:$0xff] }
 0xa66   : > { %4449 = vmatpush3.bf16.msra.mxu0 %v4448_v17  ;;  %v1186_v17 = vld [vmem:[%s6310_s23 + $0x3e0] sm:$0xff] }
 0xa67   : > { %4451 = vmatprep.subr.bf16.mxu0 %v4450_v19  ;;  %v1187_v19 = vld [vmem:[%s6310_s23 + $0x3e8] sm:$0xff] }
 0xa68   : > { %v4514_v21 = vpack.c.bf16 %v1187_v19, %v1186_v17  ;;  %v4408_v17 = vpack.c.bf16 %v1069_v0, %v1068_v63  ;;  %v1149_v63 = vld [vmem:[%s6310_s23 + $0x2b8] sm:$0xff] }
 0xa6a   : > { %4453 = vmatpush3.bf16.msra.mxu0 %v4452_v22  ;;  %v1188_v22 = vld [vmem:[%s6310_s23 + $0x3f0] sm:$0xff] }
 0xa6b   : > { %4455 = vmatprep.subr.bf16.mxu0 %v4454_v23  ;;  %v1189_v23 = vld [vmem:[%s6310_s23 + $0x3f8] sm:$0xff] }
 0xa6c   : > { %v4518_v3 = vpack.c.bf16 %v1189_v23, %v1188_v22  ;;  %v1088_v22 = vld [vmem:[%s6310_s23 + $0xd0] sm:$0xff]  ;;  %v1089_v23 = vld [vmem:[%s6310_s23 + $0xd8] sm:$0xff] }
 0xa6e   : > { %4457 = vmatpush3.bf16.msra.mxu0 %v4456_v28  ;;  %v2842_v28 = vmul.f32 %v5723_v51, %v5546_v36 }
 0xa6f   : > { %4491 = vmatprep.subr.bf16.mxu0 %v4490_v60  ;;  %v2851_v60 = vmul.f32 %v5827_v34, %v5551_v37  ;;  %v1078_v37 = vld [vmem:[%s6310_s23 + $0x80] sm:$0xff] }
 0xa70   : > { %v4394_v62 = vpack.c.bf16 %v1079_v41, %v1078_v37  ;;  %v1077_v37 = vld [vmem:[%s6310_s23 + $0x78] sm:$0xff]  ;;  %v1142_v41 = vld [vmem:[%s6310_s23 + $0x280] sm:$0xff] }
 0xa71   : > { %2992 = vmatmul.mubr.f32.vlgmr.msra.gmra.mrb[24].mxu0 %v2838_v1 }
 0xa72   : > { %2996 = vmatprep.mubr.f32.mxu0 %v2847_v44  ;;  %4493 = vmatpush3.bf16.msra.mxu0 %v4492_v35 }
 0xa73   : > { %4495 = vmatprep.subr.bf16.mxu0 %v4494_v38 }
 0xa75   : > { %2997 = vmatmul.mubr.f32.gmra.mrb[26].mxu0 %v2846_v18 }
 0xa76   : > { %4497 = vmatpush3.bf16.msra.mxu0 %v4496_v31  ;;  %3141 = vmatprep.mubr.f32.mxu0 %v2843_v47  ;;  %v1081_v31 = vld [vmem:[%s6310_s23 + $0x98] sm:$0xff]  ;;  %v2837_v47 = vmul.f32 %v4663_v46, %v5723_v51 }
 0xa77   : > { %4499 = vmatprep.subr.bf16.mxu0 %v4498_v45  ;;  %v4398_v25 = vpack.c.bf16 %v1081_v31, %v1080_v29  ;;  %v1064_v45 = vld [vmem:[%s6310_s23 + $0x10] sm:$0xff]  ;;  %v1145_v29 = vld [vmem:[%s6310_s23 + $0x298] sm:$0xff] }
 0xa78   : > { %v1129_v46 = vld [vmem:[%s6310_s23 + $0x218] sm:$0xff] }
 0xa7a   : > { %4501 = vmatpush3.bf16.msra.mxu0 %v4500_v10  ;;  %v4400_v10 = vpack.c.bf16 %v1065_v33, %v1064_v45  ;;  %v1128_v33 = vld [vmem:[%s6310_s23 + $0x210] sm:$0xff] }
 0xa7b   : > { %4503 = vmatprep.subr.bf16.mxu0 %v4502_v49  ;;  %v4402_v49 = vpack.c.bf16 %v1083_v40, %v1082_v48  ;;  %v1146_v40 = vld [vmem:[%s6310_s23 + $0x2a0] sm:$0xff] }
 0xa7e   : > { %4505 = vmatpush3.bf16.msra.mxu0 %v4504_v56 }
 0xa7f   : > { %4507 = vmatprep.subr.bf16.mxu0 %v4506_v57  ;;  %v4404_v57 = vpack.c.bf16 %v1067_v43, %v1066_v50  ;;  %v4666_v50 = vld [vmem:[%s6303_s28 + $0x40] sm:$0xff] }
 0xa80   : > { %v2844_v43 = vmul.f32 %v4666_v50, %v5827_v34 }
 0xa82   : > { %4509 = vmatpush3.bf16.msra.mxu0 %v4508_v4 }
 0xa83   : > { %4511 = vmatprep.subr.bf16.mxu0 %v4510_v5  ;;  %v1086_v5 = vld [vmem:[%s6310_s23 + $0xc0] sm:$0xff] }
 0xa86   : > { %4513 = vmatpush3.bf16.msra.mxu0 %v4512_v20  ;;  %v4410_v20 = vpack.c.bf16 %v1087_v8, %v1086_v5 }
 0xa87   : > { %4515 = vmatprep.subr.bf16.mxu0 %v4514_v21  ;;  %v1070_v21 = vld [vmem:[%s6310_s23 + $0x40] sm:$0xff] }
 0xa8a   : > { %4517 = vmatpush3.bf16.msra.mxu0 %v4516_v24  ;;  %v4412_v24 = vpack.c.bf16 %v1071_v14, %v1070_v21  ;;  %v1150_v21 = vld [vmem:[%s6310_s23 + $0x2c0] sm:$0xff]  ;;  %v1151_v14 = vld [vmem:[%s6310_s23 + $0x2c8] sm:$0xff] }
 0xa8b   : > { %4519 = vmatprep.subr.bf16.mxu0 %v4518_v3  ;;  %v4414_v3 = vpack.c.bf16 %v1089_v23, %v1088_v22 }
 0xa8e   : > { %4521 = vmatpush3.bf16.msra.mxu0 %v4520_v27  ;;  %v1090_v27 = vld [vmem:[%s6310_s23 + $0xe0] sm:$0xff] }
 0xa91   : > { %3142 = vmatmul.mubr.f32.vlgmr.msra.gmra.mrb[28].mxu0 %v2842_v28  ;;  %v1091_v28 = vld [vmem:[%s6310_s23 + $0xe8] sm:$0xff] }
 0xa92   : > { %3146 = vmatprep.mubr.f32.mxu0 %v2851_v60  ;;  %v4416_v60 = vpack.c.bf16 %v1073_v26, %v1072_v12  ;;  %v1134_v12 = vld [vmem:[%s6310_s23 + $0x240] sm:$0xff]  ;;  %v1135_v26 = vld [vmem:[%s6310_s23 + $0x248] sm:$0xff] }
 0xa95   : > { %3147 = vmatmul.mubr.f32.gmra.mrb[30].mxu0 %v2850_v59  ;;  %v4418_v59 = vpack.c.bf16 %v1091_v28, %v1090_v27  ;;  %v1152_v28 = vld [vmem:[%s6310_s23 + $0x2d0] sm:$0xff] }
 0xb24   : > { %v4120_v30 = vpop.f32.mrb[22].mxu0 }
 0xb25   : > { %v2732_v32 = vadd.f32 %v4120_v30, %v3558_v7  ;;  %v2726_v35 = vpop.f32.mrb[23].mxu0  ;;  %v1075_v30 = vld [vmem:[%s6310_s23 + $0x68] sm:$0xff] }
 0xb26   : > { %v2727_v1 = vadd.f32 %v3558_v7, %v2726_v35  ;;  %v1074_v7 = vld [vmem:[%s6310_s23 + $0x60] sm:$0xff]  ;;  %v1093_v35 = vld [vmem:[%s6310_s23 + $0xf8] sm:$0xff] }
 0xb27   : > { %v2736_v38 = vmul.f32 %v2732_v32, %v5290_v9  ;;  %v1062_v9 = vld [vmem:[%s6310_s23] sm:$0xff]  ;;  %v1092_v32 = vld [vmem:[%s6310_s23 + $0xf0] sm:$0xff] }
 0xb28   : > { %v2735_v36 = vmul.f32 %v2727_v1, %v5292_v16  ;;  %v1063_v16 = vld [vmem:[%s6310_s23 + $0x8] sm:$0xff]  ;;  %v4420_v1 = vpack.c.bf16 %v1075_v30, %v1074_v7  ;;  %v1136_v30 = vld [vmem:[%s6310_s23 + $0x250] sm:$0xff] }
 0xb29   : > { %4644 = vtanh.f32 %v2736_v38  ;;  %v4396_v18 = vpack.c.bf16 %v1063_v16, %v1062_v9  ;;  %v4422_v38 = vpack.c.bf16 %v1093_v35, %v1092_v32  ;;  %v1127_v9 = vld [vmem:[%s6310_s23 + $0x208] sm:$0xff]  ;;  %v1144_v16 = vld [vmem:[%s6310_s23 + $0x290] sm:$0xff]  ;;  %v1137_v32 = vld [vmem:[%s6310_s23 + $0x258] sm:$0xff] }
 0xb2a   : > { %4646 = vtanh.f32 %v2735_v36  ;;  %v1076_v36 = vld [vmem:[%s6310_s23 + $0x70] sm:$0xff]  ;;  %v4462_v45 = vpack.c.bf16 %v1145_v29, %v1144_v16  ;;  %v1154_v35 = vld [vmem:[%s6310_s23 + $0x2e0] sm:$0xff]  ;;  %v1141_v16 = vld [vmem:[%s6310_s23 + $0x278] sm:$0xff] }
 0xb33   : > { %v4645_v39 = vpop.eup %4644 }
 0xb34   : > { %v4647_v42 = vpop.eup %4646 }
 0xb35   : > { %4125 = vmatprep.mubr.msk.f32.mxu1 %vm1603_vm4, %v4647_v42  ;;  %v4388_v44 = vpack.c.bf16 %v4645_v39, %v4647_v42  ;;  %v4424_v42 = vpack.c.bf16 %v1077_v37, %v1076_v36  ;;  %v1138_v37 = vld [vmem:[%s6310_s23 + $0x260] sm:$0xff] }
 0xb37   : > { %4390 = vmatprep.subr.msk.bf16.mxu1 %vm5304_vm5, %v4388_v44 }
 0xb38   : > { %4393 = vmatpush3.bf16.xpose.msk.msra.mxu1 %vm5304_vm5, %v4388_v44 }
 0xb39   : > { %4395 = vmatprep.subr.bf16.mxu1 %v4394_v62  ;;  %v1126_v62 = vld [vmem:[%s6310_s23 + $0x200] sm:$0xff] }
 0xb3a   : > { %v4460_v31 = vpack.c.bf16 %v1127_v9, %v1126_v62  ;;  %v1140_v9 = vld [vmem:[%s6310_s23 + $0x270] sm:$0xff] }
 0xb3b   : > { %v4488_v29 = vpack.c.bf16 %v1141_v16, %v1140_v9 }
 0xb3f   : > { %4126 = vmatmul.mubr.msk.f32.vlgmr.msra.gmra.mrb[18].mxu1 %vm1603_vm4, %v4645_v39  ;;  %v1143_v39 = vld [vmem:[%s6310_s23 + $0x288] sm:$0xff] }
 0xb40   : > { %4397 = vmatpush3.bf16.msra.mxu1 %v4396_v18  ;;  %2916 = vmatprep.mubr.f32.mxu1 %v2837_v47  ;;  %v4458_v44 = vpack.c.bf16 %v1143_v39, %v1142_v41  ;;  %v4664_v18 = vld [vmem:[%s6303_s28] sm:$0xff]  ;;  %v4665_v47 = vld [vmem:[%s6303_s28 + $0x48] sm:$0xff]  ;;  %v1156_v39 = vld [vmem:[%s6310_s23 + $0x2f0] sm:$0xff] }
 0xb41   : > { %4399 = vmatprep.subr.bf16.mxu1 %v4398_v25  ;;  %v2836_v25 = vmul.f32 %v4664_v18, %v5723_v51  ;;  %v2845_v48 = vmul.f32 %v4665_v47, %v5827_v34  ;;  %v1139_v41 = vld [vmem:[%s6310_s23 + $0x268] sm:$0xff] }
 0xb42   : > { %v1193_v47 = vld [vmem:[%s6314_s16 + $0x8] sm:$0xff] }
 0xb44   : > { %v3878_v56 = vpop.f32.mrb[24].mxu0  ;;  %4401 = vmatpush3.bf16.msra.mxu1 %v4400_v10  ;;  %v1147_v10 = vld [vmem:[%s6310_s23 + $0x2a8] sm:$0xff] }
 0xb45   : > { %v3879_v58 = vpop.f32.mrb[25].mxu0  ;;  %4403 = vmatprep.subr.bf16.mxu1 %v4402_v49  ;;  %v4464_v49 = vpack.c.bf16 %v1129_v46, %v1128_v33  ;;  %v4466_v54 = vpack.c.bf16 %v1147_v10, %v1146_v40  ;;  %v4670_v33 = vld [vmem:[%s6303_s28 + $0x60] sm:$0xff]  ;;  %v1195_v40 = vld [vmem:[%s6314_s16 + $0x18] sm:$0xff] }
 0xb46   : > { %v5984_v4 = vadd.f32 %v3879_v58, %v3878_v56  ;;  %v1131_v56 = vld [vmem:[%s6310_s23 + $0x228] sm:$0xff]  ;;  %v2848_v46 = vmul.f32 %v4670_v33, %v5827_v34  ;;  %v3328_v33 = vsub.f32 1.0, %v5606_v53 }
 0xb47   : > { %v4468_v5 = vpack.c.bf16 %v1131_v56, %v1130_v55 }
 0xb48   : > { %v3881_v15 = vpop.f32.mrb[26].mxu0  ;;  %4405 = vmatpush3.bf16.msra.mxu1 %v4404_v57  ;;  %v4667_v57 = vld [vmem:[%s6303_s28 + $0x28] sm:$0xff] }
 0xb49   : > { %v3882_v19 = vpop.f32.mrb[27].mxu0  ;;  %4407 = vmatprep.subr.bf16.mxu1 %v4406_v61  ;;  %v2841_v58 = vmul.f32 %v4667_v57, %v5723_v51  ;;  %v1148_v61 = vld [vmem:[%s6310_s23 + $0x2b0] sm:$0xff] }
 0xb4a   : > { %v5998_v13 = vadd.f32 %v3882_v19, %v3881_v15  ;;  %v4470_v15 = vpack.c.bf16 %v1149_v63, %v1148_v61  ;;  %v1133_v19 = vld [vmem:[%s6310_s23 + $0x238] sm:$0xff] }
 0xb4c   : > { %4409 = vmatpush3.bf16.msra.mxu1 %v4408_v17  ;;  %v1132_v17 = vld [vmem:[%s6310_s23 + $0x230] sm:$0xff] }
 0xb4d   : > { %4411 = vmatprep.subr.bf16.mxu1 %v4410_v20  ;;  %v4472_v23 = vpack.c.bf16 %v1133_v19, %v1132_v17 }
 0xb50   : > { %4413 = vmatpush3.bf16.msra.mxu1 %v4412_v24 }
 0xb51   : > { %4415 = vmatprep.subr.bf16.mxu1 %v4414_v3  ;;  %v4474_v3 = vpack.c.bf16 %v1151_v14, %v1150_v21 }
 0xb54   : > { %4417 = vmatpush3.bf16.msra.mxu1 %v4416_v60  ;;  %v1153_v60 = vld [vmem:[%s6310_s23 + $0x2d8] sm:$0xff] }
 0xb55   : > { %4419 = vmatprep.subr.bf16.mxu1 %v4418_v59  ;;  %v4476_v59 = vpack.c.bf16 %v1135_v26, %v1134_v12  ;;  %v4478_v7 = vpack.c.bf16 %v1153_v60, %v1152_v28 }
 0xb58   : > { %4421 = vmatpush3.bf16.msra.mxu1 %v4420_v1  ;;  %v1155_v1 = vld [vmem:[%s6310_s23 + $0x2e8] sm:$0xff] }
 0xb59   : > { %4423 = vmatprep.subr.bf16.mxu1 %v4422_v38  ;;  %v4480_v38 = vpack.c.bf16 %v1137_v32, %v1136_v30  ;;  %v4482_v36 = vpack.c.bf16 %v1155_v1, %v1154_v35 }
 0xb5c   : > { %4425 = vmatpush3.bf16.msra.mxu1 %v4424_v42  ;;  %v1157_v42 = vld [vmem:[%s6310_s23 + $0x2f8] sm:$0xff] }
 0xb5d   : > { %4459 = vmatprep.subr.bf16.mxu1 %v4458_v44  ;;  %v4484_v44 = vpack.c.bf16 %v1139_v41, %v1138_v37  ;;  %v4486_v62 = vpack.c.bf16 %v1157_v42, %v1156_v39 }
 0xb5f   : > { %2917 = vmatmul.mubr.f32.vlgmr.msra.gmra.mrb[20].mxu1 %v2836_v25  ;;  %v4669_v25 = vld [vmem:[%s6303_s28 + $0x68] sm:$0xff] }
 0xb60   : > { %2921 = vmatprep.mubr.f32.mxu1 %v2845_v48  ;;  %4461 = vmatpush3.bf16.msra.mxu1 %v4460_v31  ;;  %v4668_v31 = vld [vmem:[%s6303_s28 + $0x20] sm:$0xff]  ;;  %v1194_v48 = vld [vmem:[%s6314_s16 + $0x10] sm:$0xff] }
 0xb61   : > { %4463 = vmatprep.subr.bf16.mxu1 %v4462_v45  ;;  %v2840_v18 = vmul.f32 %v4668_v31, %v5723_v51  ;;  %v2849_v45 = vmul.f32 %v4669_v25, %v5827_v34  ;;  %v1192_v51 = vld [vmem:[%s6313_s30] sm:$0xff]  ;;  %v4530_v10 = vpack.c.bf16 %v1195_v40, %v1194_v48  ;;  %v3329_v25 = vsub.f32 1.0, %v5604_v52  ;;  %s4733_s30 = smov 96  }
 0xb62   : > { %v1196_v34 = vld [vmem:[%s6314_s16 + $0x20] sm:$0xff]  ;;  %v3326_v48 = vmul.f32 %v5606_v53, %v4956_v6 }
 0xb63   : > { %2922 = vmatmul.mubr.f32.gmra.mrb[22].mxu1 %v2844_v43  ;;  %v1198_v43 = vld [vmem:[%s6314_s16 + $0x30] sm:$0xff] }
 0xb64   : > { %v3954_v0 = vpop.f32.mrb[28].mxu0  ;;  %4465 = vmatpush3.bf16.msra.mxu1 %v4464_v49  ;;  %3066 = vmatprep.mubr.f32.mxu1 %v2841_v58  ;;  %v1197_v49 = vld [vmem:[%s6314_s16 + $0x28] sm:$0xff] }
 0xb65   : > { %v3955_v8 = vpop.f32.mrb[29].mxu0  ;;  %4467 = vmatprep.subr.bf16.mxu1 %v4466_v54  ;;  %v4534_v50 = vpack.c.bf16 %v1197_v49, %v1196_v34  ;;  %v1199_v54 = vld [vmem:[%s6314_s16 + $0x38] sm:$0xff] }
 0xb66   : > { %v6100_v20 = vadd.f32 %v3955_v8, %v3954_v0  ;;  %v4538_v55 = vpack.c.bf16 %v1199_v54, %v1198_v43 }
 0xb68   : > { %v3957_v22 = vpop.f32.mrb[30].mxu0  ;;  %4469 = vmatpush3.bf16.msra.mxu1 %v4468_v5 }
 0xb69   : > { %v3958_v24 = vpop.f32.mrb[31].mxu0  ;;  %4471 = vmatprep.subr.bf16.mxu1 %v4470_v15 }
 0xb6a   : > { %v6114_v27 = vadd.f32 %v3958_v24, %v3957_v22 }
 0xb6c   : > { %4473 = vmatpush3.bf16.msra.mxu1 %v4472_v23 }
 0xb6d   : > { %4475 = vmatprep.subr.bf16.mxu1 %v4474_v3 }
 0xb70   : > { %4477 = vmatpush3.bf16.msra.mxu1 %v4476_v59 }
 0xb71   : > { %4479 = vmatprep.subr.bf16.mxu1 %v4478_v7 }
 0xb74   : > { %4481 = vmatpush3.bf16.msra.mxu1 %v4480_v38 }
 0xb75   : > { %4483 = vmatprep.subr.bf16.mxu1 %v4482_v36  ;;  %v3319_v36 = vstv %s3516_s27 }
 0xb78   : > { %4485 = vmatpush3.bf16.msra.mxu1 %v4484_v44 }
 0xb79   : > { %4487 = vmatprep.subr.bf16.mxu1 %v4486_v62 }
 0xb7c   : > { %4489 = vmatpush3.bf16.msra.mxu1 %v4488_v29 }
 0xb7d   : > { %4523 = vmatprep.subr.bf16.mxu1 %v5622_v2 }
 0xb7f   : > { %3067 = vmatmul.mubr.f32.vlgmr.msra.gmra.mrb[24].mxu1 %v2840_v18 }
 0xb80   : > { %3071 = vmatprep.mubr.f32.mxu1 %v2849_v45  ;;  %4525 = vmatpush3.bf16.msra.mxu1 %v5622_v2  ;;  %v4526_v2 = vpack.c.bf16 %v1193_v47, %v1192_v51 }
 0xb82   : > { %4527 = vmatprep.subr.bf16.mxu0 %v4526_v2 }
 0xb83   : > { %3072 = vmatmul.mubr.f32.gmra.mrb[26].mxu1 %v2848_v46  ;;  %4529 = vmatpush3.bf16.msra.mxu0 %v4526_v2  ;;  %v3327_v46 = vmul.f32 %v5604_v52, %v4966_v11 }
 0xb84   : > { %4531 = vmatprep.subr.bf16.mxu0 %v4530_v10 }
 0xb87   : > { %4533 = vmatpush3.bf16.msra.mxu0 %v4530_v10 }
 0xb88   : > { %4535 = vmatprep.subr.bf16.mxu0 %v4534_v50 }
 0xb8b   : > { %4537 = vmatpush3.bf16.msra.mxu0 %v4534_v50 }
 0xb8c   : > { %4539 = vmatprep.subr.bf16.mxu0 %v4538_v55 }
 0xb8f   : > { %4541 = vmatpush3.bf16.msra.mxu0 %v4538_v55 }
 0xc12   : > { %v4127_v56 = vpop.f32.mrb[18].mxu1 }
 0xc13   : > { %v2821_v57 = vmul.f32 3.0, %v4127_v56  ;;  %v2811_v58 = vpop.f32.mrb[19].mxu1 }
 0xc14   : > { %v2820_v61 = vmul.f32 3.0, %v2811_v58 }
 0xc15   : > { %4648 = vtanh.f32 %v2821_v57 }
 0xc16   : > { %4650 = vtanh.f32 %v2820_v61 }
 0xc1f   : > { %v4649_v63 = vpop.eup %4648 }
 0xc20   : > { %v4651_v0 = vpop.eup %4650  ;;  %v2825_v8 = vmax.f32 %v4649_v63, 0.0 }
 0xc21   : > { %v2824_v5 = vmax.f32 %v4651_v0, 0.0 }
 0xc23   : > { %4132 = vmatprep.mubr.msk.f32.mxu1 %vm1235_vm1, %v2824_v5 }
 0xc24   : > { %4133 = vmatmul.mubr.msk.f32.vlgmr.msra.gmra.mrb[28].mxu1 %vm1235_vm1, %v2825_v8 }
 0xc32   : > { %v3840_v15 = vpop.f32.mrb[20].mxu1 }
 0xc33   : > { %v3841_v17 = vpop.f32.mrb[21].mxu1 }
 0xc34   : > { %v3842_v19 = vadd.f32 %v3841_v17, %v3840_v15 }
 0xc36   : > { %v2994_v21 = vadd.f32 %v5984_v4, %v3842_v19  ;;  %v3843_v14 = vpop.f32.mrb[22].mxu1  ;;  %v1191_v4 = vld [vmem:[%s6315_s22 + $0x8] sm:$0xff] }
 0xc37   : > { %v3844_v22 = vpop.f32.mrb[23].mxu1 }
 0xc38   : > { %v3845_v23 = vadd.f32 %v3844_v22, %v3843_v14 }
 0xc3a   : > { %v2999_v24 = vadd.f32 %v5998_v13, %v3845_v23  ;;  %v1190_v13 = vld [vmem:[%s6315_s22] sm:$0xff] }
 0xc52   : > { %v3916_v3 = vpop.f32.mrb[24].mxu1 }
 0xc53   : > { %v3917_v12 = vpop.f32.mrb[25].mxu1 }
 0xc54   : > { %v3918_v26 = vadd.f32 %v3917_v12, %v3916_v3 }
 0xc56   : > { %v3069_v28 = vadd.f32 %v3918_v26, %v2994_v21  ;;  %v3919_v60 = vpop.f32.mrb[26].mxu1 }
 0xc57   : > { %v3920_v59 = vpop.f32.mrb[27].mxu1 }
 0xc58   : > { %v3144_v7 = vadd.f32 %v6100_v20, %v3069_v28  ;;  %v3921_v30 = vadd.f32 %v3920_v59, %v3919_v60 }
 0xc5a   : > { %v3074_v32 = vadd.f32 %v3921_v30, %v2999_v24  ;;  %v3152_v37 = vadd.f32 %v3144_v7, %v1190_v13 }
 0xc5c   : > { %v3149_v35 = vadd.f32 %v6114_v27, %v3074_v32  ;;  %v3316_v27 = vstv %s3515_s17 }
 0xc5d   : > { %v3317_v62 = vmul.f32 %v3316_v27, %v3152_v37 }
 0xc5e   : > { %v3153_v20 = vadd.f32 %v3149_v35, %v1191_v4 }
 0xc60   : > { %v3318_v39 = vmul.f32 %v3316_v27, %v3153_v20 }
 0xcf7   : > { %v4134_v1 = vpop.f32.mrb[28].mxu1 }
 0xcf8   : > { %v3226_v38 = vpop.f32.mrb[29].mxu1 }
 0xcf9   : > { %4151 = vmatprep.mubr.msk.f32.mxu0 %vm1404_vm3, %v3226_v38 }
 0xcfa   : > { %4152 = vmatmul.mubr.msk.f32.vlgmr.msra.gmra.mrb[32].mxu0 %vm1404_vm3, %v4134_v1 }
 0xdcd   : > { %v4153_v41 = vpop.f32.mrb[32].mxu0 }
 0xdce   : > { %v3321_v42 = vmul.f32 %v4153_v41, %v3319_v36  ;;  %v3307_v44 = vpop.f32.mrb[33].mxu0 }
 0xdcf   : > { %v3320_v9 = vmul.f32 %v3319_v36, %v3307_v44 }
 0xdd0   : > { %v3323_v16 = vadd.f32 %v3321_v42, %v3318_v39 }
 0xdd1   : > { %v3322_v29 = vadd.f32 %v3320_v9, %v3317_v62 }
 0xdd2   : > { %4652 = vtanh.f32 %v3323_v16 }
 0xdd3   : > { %4654 = vtanh.f32 %v3322_v29 }
 0xddc   : > { %v4653_v31 = vpop.eup %4652 }
 0xddd   : > { %v4655_v18 = vpop.eup %4654  ;;  %3334 = vrot.lane.b32.xlu1 %v4653_v31, %s4731_s18 }
 0xdde   : > { %3332 = vrot.lane.b32.xlu0 %v4655_v18, %s4731_s18 }
 0xe4f   : > { %v3335_v45 = vpop.permute.xlu1 %3334 }
 0xe50   : > { %v3339_v51 = vmul.f32 %v3335_v45, %v3329_v25  ;;  %v3333_v47 = vpop.permute.xlu0 %3332 }
 0xe51   : > { %v3338_v2 = vmul.f32 %v3333_v47, %v3328_v33 }
 0xe52   : > { %v3341_v40 = vadd.f32 %v3339_v51, %v3327_v46 }
 0xe53   : > { %v3340_v10 = vadd.f32 %v3338_v2, %v3326_v48 }
 0xe54   : > { %3346 = vrot.lane.b32.xlu1 %v3341_v40, %s4733_s30 }
 0xe55   : > { %3344 = vrot.lane.b32.xlu0 %v3340_v10, %s4733_s30 }
 0xec6   : > { %v3347_v34 = vpop.permute.xlu1 %3346 }
 0xec7   : > { %3351 = vst.msk [vmem:[#allocation2 + $0x8] sm:$0xff] %vm1232_vm2, %v3347_v34  ;;  %3353 = vst.msk [vmem:[%s4940_s2 + $0x8] sm:$0xff] %vm1232_vm2, %v3347_v34  ;;  %v3345_v49 = vpop.permute.xlu0 %3344 }
 0xec8   : > { %3350 = vst.msk [vmem:[#allocation2] sm:$0xff] %vm1232_vm2, %v3345_v49  ;;  %3352 = vst.msk [vmem:[%s4940_s2] sm:$0xff] %vm1232_vm2, %v3345_v49 }
 0xec9 PF: > { %s6316_s18 = sld [smem:[#allocation8_spill]]  ;;  %s6317_s29 = sld [smem:[#allocation6_spill]] }
 0xeca   : > { %s6318_s2 = sld [smem:[#allocation7_spill]]  ;;  %s6319_s6 = sld [smem:[#allocation9_spill]] }
 0xecb   : > { %s6320_s30 = sld [smem:[#allocation10_spill]] }
 0xecf   : > { %s36_s7 = sadd.s32 1, %s6316_s18  }
 0xed0   : > { %p33_p5 = scmp.ge.s32.totalorder %s36_s7, 10  }
 0xed2   :  { %35 = sbr.rel (!%p33_p5) target bundleno = 20 (0x14), region = 165 }
 0xed9   :  { %3383 = vsyncpa [#allocation4], 1 }
 0xeda   :  { %3385 = vsyncpa [#allocation4 + $0x1], 1 }

</bundles_post_ra>
